<compile_context>
chip_gen: v5e
topology: v5e:2x2
jax: 0.10.0
libtpu: 0.0.40
codegen_flags: <defaults>
</compile_context>

<pallas_src>
import functools

import jax
import jax.numpy as jnp
from jax.experimental import pallas as pl
from jax.experimental.pallas import tpu as pltpu


# ----------------------------------------------------------------------------
# Fake quantization + BN fusion (host-side weight preprocessing, plain JAX)
# ----------------------------------------------------------------------------
def fake_quant(x, num_bits=8):
    mx = jnp.max(x)
    mn = jnp.min(x)
    scale = (mx - mn) / (2 ** num_bits - 1)
    scale = jnp.where(scale == 0.0, jnp.ones_like(scale), scale)  # zero-guard
    return jnp.round(x / scale) * scale


def fuse_and_quant(p, eps=1e-5, num_bits=8):
    """Fold BN into conv weight/bias exactly as ConvBN_Quant.forward, then fake-quant."""
    var_sqrt = jnp.sqrt(p["var"] + eps)
    w = p["w"] / var_sqrt[:, None, None, None] * p["bn_w"][:, None, None, None]
    b = (p["b"] - p["mean"]) / var_sqrt * p["bn_w"] + p["bn_b"]
    return fake_quant(w, num_bits), fake_quant(b, num_bits)


# ----------------------------------------------------------------------------
# Host-built boundary mask for the 9 conv taps (tap-major, matches im2col layout)
# ----------------------------------------------------------------------------
def _tap_mask(imgs, H, W, sq):
    hh = jnp.arange(H)
    ww = jnp.arange(W)
    cols = []
    for dh in (-1, 0, 1):
        for dw in (-1, 0, 1):
            mh = (hh + dh >= 0) & (hh + dh < H)                       # (H,)
            mw = (ww + dw >= 0) & (ww + dw < W)                       # (W,)
            m = (mh[:, None] & mw[None, :]).reshape(H * W, 1)         # (H*W, 1)
            cols.append(jnp.broadcast_to(m, (H * W, sq)))
    mask = jnp.concatenate(cols, axis=1).astype(jnp.bfloat16)         # (H*W, 9*sq)
    return jnp.tile(mask, (imgs, 1))                                  # (TP, 9*sq)


# ----------------------------------------------------------------------------
# Fused fire-module kernel (pixel-rows layout: one block = `imgs` whole images)
# ----------------------------------------------------------------------------
def _make_fire_kernel(H, W, imgs, sq, se, out_dtype):
    PPI = H * W
    TP = imgs * PPI
    inv_hw = 1.0 / float(PPI)
    taps = [(dh, dw) for dh in (-1, 0, 1) for dw in (-1, 0, 1)]

    def kernel(*refs):
        x_ref, wsq_ref, bsq_ref, wexp_ref, bout_ref, mask_ref = refs[:6]
        if se:
            w1_ref, b1_ref, w2_ref, b2_ref = refs[6:10]
        o_ref, col_ref = refs[-2], refs[-1]

        # ---- squeeze 1x1: dense big-M matmul over pixels, f32 accumulate ----
        s = jnp.dot(x_ref[...], wsq_ref[...], preferred_element_type=jnp.float32)
        s_bf = (s + bsq_ref[...]).astype(jnp.bfloat16)          # cast once (TP, sq)

        # ---- in-kernel im2col: static-offset row shifts into a VMEM scratch ----
        # Only the first/last (W+1) rows can stay un-written; zeroing the whole
        # scratch each step is cheap and keeps any stale VMEM (NaNs) out.
        col_ref[...] = jnp.zeros((TP, 9 * sq), jnp.bfloat16)
        for k, (dh, dw) in enumerate(taps):
            d = dh * W + dw
            c0, c1 = k * sq, (k + 1) * sq
            if d == 0:
                col_ref[:, c0:c1] = s_bf
            elif d > 0:
                col_ref[0:TP - d, c0:c1] = s_bf[d:TP, :]
            else:
                col_ref[-d:TP, c0:c1] = s_bf[0:TP + d, :]
        # zero the taps that fall outside the image (W wrap / H borders)
        col = col_ref[...] * mask_ref[...]                      # (TP, 9*sq) bf16

        # ---- expand-1x1 + expand-3x3 + channel concat: ONE dense matmul ----
        out = jnp.dot(col, wexp_ref[...], preferred_element_type=jnp.float32)
        out = out + bout_ref[...]                               # (TP, C) f32

        if se:
            # per-image global average pool + 2 quantized linears + rescale (VMEM only)
            for i in range(imgs):
                blk = out[i * PPI:(i + 1) * PPI, :]             # (PPI, C)
                pooled = jnp.sum(blk, axis=0, keepdims=True) * inv_hw       # (1, C)
                h1 = jnp.maximum(
                    jnp.dot(pooled, w1_ref[...],
                            preferred_element_type=jnp.float32) + b1_ref[...], 0.0)
                y = jax.nn.sigmoid(
                    jnp.dot(h1, w2_ref[...],
                            preferred_element_type=jnp.float32) + b2_ref[...])
                o_ref[i * PPI:(i + 1) * PPI, :] = (blk * y).astype(out_dtype)
        else:
            o_ref[...] = out.astype(out_dtype)

    return kernel


# ----------------------------------------------------------------------------
# FireModule forward (one fused pallas_call)
# ----------------------------------------------------------------------------
@functools.partial(jax.jit, static_argnames=("se", "layout"))
def fire_module(x_nchw, params, se=False, layout="NCHW"):
    N, Cin, H, W = x_nchw.shape
    PPI = H * W

    # ---- BN fusion + fake quant of the (tiny) weight tensors ----
    w_sq, b_sq = fuse_and_quant(params["conv_bn1"])          # (sq, Cin, 1, 1)
    w_e1, b_e1 = fuse_and_quant(params["expand_conv_bn1"])   # (ex, sq, 1, 1)
    w_e2, b_e2 = fuse_and_quant(params["expand_conv_bn2"])   # (ex, sq, 3, 3)
    sq = w_sq.shape[0]
    ex = w_e1.shape[0]
    C = 2 * ex

    w_sq_mat = jnp.transpose(w_sq[:, :, 0, 0]).astype(jnp.bfloat16)   # (Cin, sq)

    # Fused expand weight (9*sq, C): rows = 9 taps x sq channels; columns
    # [0, ex) = expand-1x1 (center tap only), [ex, C) = expand-3x3 tap weights.
    w_e1_mat = jnp.transpose(w_e1[:, :, 0, 0])                        # (sq, ex)
    zero_e1 = jnp.zeros((sq, ex), jnp.float32)
    blocks = []
    for kh in range(3):
        for kw in range(3):
            left = w_e1_mat if (kh == 1 and kw == 1) else zero_e1
            right = jnp.transpose(w_e2[:, :, kh, kw])                 # (sq, ex)
            blocks.append(jnp.concatenate([left, right], axis=1))     # (sq, C)
    w_exp = jnp.concatenate(blocks, axis=0).astype(jnp.bfloat16)      # (9*sq, C)

    bsq_row = b_sq.reshape(1, sq).astype(jnp.float32)
    bout_row = jnp.concatenate([b_e1, b_e2]).reshape(1, C).astype(jnp.float32)

    # ---- tiling: whole images per grid step, >=256 pixel rows of M ----
    TARGET_M = 256                                  # v6e/v7x MXU rows (2x v5e's 128)
    imgs = max(1, min(N, (TARGET_M + PPI - 1) // PPI))
    n_blocks = (N + imgs - 1) // imgs               # N=2 -> 2 parallel steps (v7x TCs)
    TP = imgs * PPI
    assert TP % 8 == 0, "pixel rows per block must be sublane (8) aligned"

    # pixel-rows activation: NCHW -> NHWC -> (pixels, Cin), bf16 (halves input DMA)
    x_pix = jnp.transpose(x_nchw, (0, 2, 3, 1)).reshape(N * PPI, Cin)
    x_pix = x_pix.astype(jnp.bfloat16)
    if n_blocks * imgs > N:
        x_pix = jnp.pad(x_pix, (((n_blocks * imgs - N) * PPI, 0)[::-1], (0, 0)))

    mask = _tap_mask(imgs, H, W, sq)                # (TP, 9*sq) bf16

    # All weight/bias/mask BlockSpecs use constant index maps -> they stay resident
    # in VMEM across grid steps (total footprint is KB-scale, so double buffering
    # of these constants is immaterial even on v7x's 64 MiB/TC).
    in_specs = [
        pl.BlockSpec((TP, Cin), lambda i: (i, 0)),
        pl.BlockSpec((Cin, sq), lambda i: (0, 0)),
        pl.BlockSpec((1, sq), lambda i: (0, 0)),
        pl.BlockSpec((9 * sq, C), lambda i: (0, 0)),
        pl.BlockSpec((1, C), lambda i: (0, 0)),
        pl.BlockSpec((TP, 9 * sq), lambda i: (0, 0)),
    ]
    inputs = [x_pix, w_sq_mat, bsq_row, w_exp, bout_row, mask]

    if se:
        r = params["se_w1"].shape[0]
        w1 = jnp.transpose(fake_quant(params["se_w1"])).astype(jnp.float32)   # (C, r)
        b1 = fake_quant(params["se_b1"]).reshape(1, r).astype(jnp.float32)
        w2 = jnp.transpose(fake_quant(params["se_w2"])).astype(jnp.float32)   # (r, C)
        b2 = fake_quant(params["se_b2"]).reshape(1, C).astype(jnp.float32)
        in_specs += [
            pl.BlockSpec((C, r), lambda i: (0, 0)),
            pl.BlockSpec((1, r), lambda i: (0, 0)),
            pl.BlockSpec((r, C), lambda i: (0, 0)),
            pl.BlockSpec((1, C), lambda i: (0, 0)),
        ]
        inputs += [w1, b1, w2, b2]

    out_pix = pl.pallas_call(
        _make_fire_kernel(H, W, imgs, sq, se, jnp.bfloat16),
        out_shape=jax.ShapeDtypeStruct((n_blocks * TP, C), jnp.bfloat16),
        grid_spec=pltpu.PrefetchScalarGridSpec(
            num_scalar_prefetch=0,
            grid=(n_blocks,),
            in_specs=in_specs,
            out_specs=pl.BlockSpec((TP, C), lambda i: (i, 0)),
            scratch_shapes=[pltpu.VMEM((TP, 9 * sq), jnp.bfloat16)],   # im2col scratch
        ),
        compiler_params=pltpu.CompilerParams(
            dimension_semantics=("parallel",),
            vmem_limit_bytes=32 * 1024 * 1024,     # actual usage is <1 MiB at test size
        ),
    )(*inputs)

    out = out_pix[: N * PPI].reshape(N, H, W, C)    # NHWC, bf16, lane-dense (free)
    if layout == "NHWC":
        return out                                  # preferred for fused consumers
    return jnp.transpose(out, (0, 3, 1, 2))         # NCHW for PyTorch-module parity


# ----------------------------------------------------------------------------
# Pure-JAX reference (for correctness check only)
# ----------------------------------------------------------------------------
def fire_reference(x_nchw, params, se=False):
    x = jnp.transpose(x_nchw, (0, 2, 3, 1))
    w_sq, b_sq = fuse_and_quant(params["conv_bn1"])
    s = jnp.einsum("nhwc,oc->nhwo", x, w_sq[:, :, 0, 0]) + b_sq
    w_e1, b_e1 = fuse_and_quant(params["expand_conv_bn1"])
    e1 = jnp.einsum("nhwc,oc->nhwo", s, w_e1[:, :, 0, 0]) + b_e1
    w_e2, b_e2 = fuse_and_quant(params["expand_conv_bn2"])
    e2 = jax.lax.conv_general_dilated(
        s, jnp.transpose(w_e2, (2, 3, 1, 0)), (1, 1), "SAME",
        dimension_numbers=("NHWC", "HWIO", "NHWC"),
    ) + b_e2
    out = jnp.concatenate([e1, e2], axis=-1)
    if se:
        pooled = jnp.mean(out, axis=(1, 2))
        w1 = fake_quant(params["se_w1"]); b1 = fake_quant(params["se_b1"])
        w2 = fake_quant(params["se_w2"]); b2 = fake_quant(params["se_b2"])
        h = jax.nn.relu(pooled @ w1.T + b1)
        y = jax.nn.sigmoid(h @ w2.T + b2)
        out = out * y[:, None, None, :]
    return jnp.transpose(out, (0, 3, 1, 2))


# ----------------------------------------------------------------------------
# Deterministic parameter init (synthetic; shapes follow FireModule.__init__)
# ----------------------------------------------------------------------------
def init_convbn(key, cin, cout, k):
    k1, k2, k3, k4, k5, k6 = jax.random.split(key, 6)
    return dict(
        w=0.2 * jax.random.normal(k1, (cout, cin, k, k), jnp.float32),
        b=0.1 * jax.random.normal(k2, (cout,), jnp.float32),
        bn_w=1.0 + 0.1 * jax.random.normal(k3, (cout,), jnp.float32),
        bn_b=0.1 * jax.random.normal(k4, (cout,), jnp.float32),
        mean=0.1 * jax.random.normal(k5, (cout,), jnp.float32),
        var=0.9 + 0.1 * jnp.abs(jax.random.normal(k6, (cout,), jnp.float32)),
    )


def init_fire_params(key, in_channel, out_channel):
    sq_out = out_channel // 8
    ex_out = out_channel // 2
    r = out_channel // 16
    ks = jax.random.split(key, 7)
    return dict(
        conv_bn1=init_convbn(ks[0], in_channel, sq_out, 1),
        expand_conv_bn1=init_convbn(ks[1], sq_out, ex_out, 1),
        expand_conv_bn2=init_convbn(ks[2], sq_out, ex_out, 3),
        se_w1=0.2 * jax.random.normal(ks[3], (r, out_channel), jnp.float32),
        se_b1=0.1 * jax.random.normal(ks[4], (r,), jnp.float32),
        se_w2=0.2 * jax.random.normal(ks[5], (out_channel, r), jnp.float32),
        se_b2=0.1 * jax.random.normal(ks[6], (out_channel,), jnp.float32),
    )


# ----------------------------------------------------------------------------
if __name__ == "__main__":
    key = jax.random.PRNGKey(0)
    kx, kp = jax.random.split(key)

    N, Cin, H, W = 2, 4, 16, 16
    out_channel = 32  # -> squeeze=4, expand=16 each, concat=32, SE r=2

    x = jax.random.normal(kx, (N, Cin, H, W), jnp.float32)
    params = init_fire_params(kp, Cin, out_channel)

    for se in (False, True):
        out = jax.block_until_ready(fire_module(x, params, se=se))
        ref = jax.block_until_ready(fire_reference(x, params, se=se))
        assert out.shape == (N, out_channel, H, W), out.shape
        err = float(jnp.max(jnp.abs(out.astype(jnp.float32) - ref)))
        assert err < 5e-2, f"se={se} max abs err {err}"

    print("KERNEL_OK")
</pallas_src>

<mosaic_0001>
module attributes {stable_mosaic.version = 11 : i64} {
  func.func @kernel(%arg0: i32, %arg1: memref<256x4xbf16, #tpu.memory_space<vmem>>, %arg2: memref<4x4xbf16, #tpu.memory_space<vmem>>, %arg3: memref<1x4xf32, #tpu.memory_space<vmem>>, %arg4: memref<36x32xbf16, #tpu.memory_space<vmem>>, %arg5: memref<1x32xf32, #tpu.memory_space<vmem>>, %arg6: memref<256x36xbf16, #tpu.memory_space<vmem>>, %arg7: memref<256x32xbf16, #tpu.memory_space<vmem>>, %arg8: memref<256x36xbf16, #tpu.memory_space<vmem>>) attributes {dimension_semantics = [#tpu.dimension_semantics<parallel>], iteration_bounds = array<i64: 2>, scalar_prefetch = 0 : i64, scratch_operands = 1 : i64, tpu.core_type = #tpu.core_type<tc>, window_params = [{transform_indices = @transform_0, window_bounds = array<i64: 256, 4>}, {pipeline_mode = #tpu.pipeline_mode<synchronous>, transform_indices = @transform_1, window_bounds = array<i64: 4, 4>}, {pipeline_mode = #tpu.pipeline_mode<synchronous>, transform_indices = @transform_2, window_bounds = array<i64: 1, 4>}, {pipeline_mode = #tpu.pipeline_mode<synchronous>, transform_indices = @transform_3, window_bounds = array<i64: 36, 32>}, {pipeline_mode = #tpu.pipeline_mode<synchronous>, transform_indices = @transform_4, window_bounds = array<i64: 1, 32>}, {pipeline_mode = #tpu.pipeline_mode<synchronous>, transform_indices = @transform_5, window_bounds = array<i64: 256, 36>}, {transform_indices = @transform_6, window_bounds = array<i64: 256, 32>}]} {
    %c0 = arith.constant 0 : index
    %c0_0 = arith.constant 0 : index
    %0 = vector.load %arg1[%c0, %c0_0] : memref<256x4xbf16, #tpu.memory_space<vmem>>, vector<256x4xbf16>
    %c0_1 = arith.constant 0 : index
    %c0_2 = arith.constant 0 : index
    %1 = vector.load %arg2[%c0_1, %c0_2] : memref<4x4xbf16, #tpu.memory_space<vmem>>, vector<4x4xbf16>
    %cst = arith.constant dense<0.000000e+00> : vector<256x4xf32>
    %2 = tpu.matmul %0, %1, %cst {dimension_numbers = #tpu.dot_dimension_numbers<[1], [0], [0], [1], [0, 0, 1, 1], [], []>} : vector<256x4xbf16>, vector<4x4xbf16>, vector<256x4xf32> -> vector<256x4xf32>
    %c0_3 = arith.constant 0 : index
    %c0_4 = arith.constant 0 : index
    %3 = vector.load %arg3[%c0_3, %c0_4] : memref<1x4xf32, #tpu.memory_space<vmem>>, vector<1x4xf32>
    %4 = vector.broadcast %3 : vector<1x4xf32> to vector<256x4xf32>
    %5 = arith.addf %2, %4 : vector<256x4xf32>
    %6 = arith.truncf %5 : vector<256x4xf32> to vector<256x4xbf16>
    %cst_5 = arith.constant 0.000000e+00 : bf16
    %7 = vector.broadcast %cst_5 : bf16 to vector<256x36xbf16>
    %c0_6 = arith.constant 0 : index
    %c0_7 = arith.constant 0 : index
    %8 = vector.load %arg8[%c0_6, %c0_7] : memref<256x36xbf16, #tpu.memory_space<vmem>>, vector<256x36xbf16>
    tpu.vector_store %arg8[%c0_6, %c0_7], %7 {strides = array<i32>} : memref<256x36xbf16, #tpu.memory_space<vmem>>, vector<256x36xbf16>,
    %9 = vector.extract_strided_slice %6 {offsets = [0, 0], sizes = [239, 4], strides = [1, 1]} : vector<256x4xbf16> to vector<239x4xbf16>
    %c17 = arith.constant 17 : index
    %c0_8 = arith.constant 0 : index
    %10 = vector.load %arg8[%c17, %c0_8] : memref<256x36xbf16, #tpu.memory_space<vmem>>, vector<239x4xbf16>
    tpu.vector_store %arg8[%c17, %c0_8], %9 {strides = array<i32>} : memref<256x36xbf16, #tpu.memory_space<vmem>>, vector<239x4xbf16>,
    %11 = vector.extract_strided_slice %6 {offsets = [0, 0], sizes = [240, 4], strides = [1, 1]} : vector<256x4xbf16> to vector<240x4xbf16>
    %c16 = arith.constant 16 : index
    %c4 = arith.constant 4 : index
    %12 = vector.load %arg8[%c16, %c4] : memref<256x36xbf16, #tpu.memory_space<vmem>>, vector<240x4xbf16>
    tpu.vector_store %arg8[%c16, %c4], %11 {strides = array<i32>} : memref<256x36xbf16, #tpu.memory_space<vmem>>, vector<240x4xbf16>,
    %13 = vector.extract_strided_slice %6 {offsets = [0, 0], sizes = [241, 4], strides = [1, 1]} : vector<256x4xbf16> to vector<241x4xbf16>
    %c15 = arith.constant 15 : index
    %c8 = arith.constant 8 : index
    %14 = vector.load %arg8[%c15, %c8] : memref<256x36xbf16, #tpu.memory_space<vmem>>, vector<241x4xbf16>
    tpu.vector_store %arg8[%c15, %c8], %13 {strides = array<i32>} : memref<256x36xbf16, #tpu.memory_space<vmem>>, vector<241x4xbf16>,
    %15 = vector.extract_strided_slice %6 {offsets = [0, 0], sizes = [255, 4], strides = [1, 1]} : vector<256x4xbf16> to vector<255x4xbf16>
    %c1 = arith.constant 1 : index
    %c12 = arith.constant 12 : index
    %16 = vector.load %arg8[%c1, %c12] : memref<256x36xbf16, #tpu.memory_space<vmem>>, vector<255x4xbf16>
    tpu.vector_store %arg8[%c1, %c12], %15 {strides = array<i32>} : memref<256x36xbf16, #tpu.memory_space<vmem>>, vector<255x4xbf16>,
    %c0_9 = arith.constant 0 : index
    %c16_10 = arith.constant 16 : index
    %17 = vector.load %arg8[%c0_9, %c16_10] : memref<256x36xbf16, #tpu.memory_space<vmem>>, vector<256x4xbf16>
    tpu.vector_store %arg8[%c0_9, %c16_10], %6 {strides = array<i32>} : memref<256x36xbf16, #tpu.memory_space<vmem>>, vector<256x4xbf16>,
    %18 = vector.extract_strided_slice %6 {offsets = [1, 0], sizes = [255, 4], strides = [1, 1]} : vector<256x4xbf16> to vector<255x4xbf16>
    %c0_11 = arith.constant 0 : index
    %c20 = arith.constant 20 : index
    %19 = vector.load %arg8[%c0_11, %c20] : memref<256x36xbf16, #tpu.memory_space<vmem>>, vector<255x4xbf16>
    tpu.vector_store %arg8[%c0_11, %c20], %18 {strides = array<i32>} : memref<256x36xbf16, #tpu.memory_space<vmem>>, vector<255x4xbf16>,
    %20 = vector.extract_strided_slice %6 {offsets = [15, 0], sizes = [241, 4], strides = [1, 1]} : vector<256x4xbf16> to vector<241x4xbf16>
    %c0_12 = arith.constant 0 : index
    %c24 = arith.constant 24 : index
    %21 = vector.load %arg8[%c0_12, %c24] : memref<256x36xbf16, #tpu.memory_space<vmem>>, vector<241x4xbf16>
    tpu.vector_store %arg8[%c0_12, %c24], %20 {strides = array<i32>} : memref<256x36xbf16, #tpu.memory_space<vmem>>, vector<241x4xbf16>,
    %22 = vector.extract_strided_slice %6 {offsets = [16, 0], sizes = [240, 4], strides = [1, 1]} : vector<256x4xbf16> to vector<240x4xbf16>
    %c0_13 = arith.constant 0 : index
    %c28 = arith.constant 28 : index
    %23 = vector.load %arg8[%c0_13, %c28] : memref<256x36xbf16, #tpu.memory_space<vmem>>, vector<240x4xbf16>
    tpu.vector_store %arg8[%c0_13, %c28], %22 {strides = array<i32>} : memref<256x36xbf16, #tpu.memory_space<vmem>>, vector<240x4xbf16>,
    %24 = vector.extract_strided_slice %6 {offsets = [17, 0], sizes = [239, 4], strides = [1, 1]} : vector<256x4xbf16> to vector<239x4xbf16>
    %c0_14 = arith.constant 0 : index
    %c32 = arith.constant 32 : index
    %25 = vector.load %arg8[%c0_14, %c32] : memref<256x36xbf16, #tpu.memory_space<vmem>>, vector<239x4xbf16>
    tpu.vector_store %arg8[%c0_14, %c32], %24 {strides = array<i32>} : memref<256x36xbf16, #tpu.memory_space<vmem>>, vector<239x4xbf16>,
    %c0_15 = arith.constant 0 : index
    %c0_16 = arith.constant 0 : index
    %26 = vector.load %arg8[%c0_15, %c0_16] : memref<256x36xbf16, #tpu.memory_space<vmem>>, vector<256x36xbf16>
    %c0_17 = arith.constant 0 : index
    %c0_18 = arith.constant 0 : index
    %27 = vector.load %arg6[%c0_17, %c0_18] : memref<256x36xbf16, #tpu.memory_space<vmem>>, vector<256x36xbf16>
    %28 = arith.mulf %26, %27 : vector<256x36xbf16>
    %c0_19 = arith.constant 0 : index
    %c0_20 = arith.constant 0 : index
    %29 = vector.load %arg4[%c0_19, %c0_20] : memref<36x32xbf16, #tpu.memory_space<vmem>>, vector<36x32xbf16>
    %cst_21 = arith.constant dense<0.000000e+00> : vector<256x32xf32>
    %30 = tpu.matmul %28, %29, %cst_21 {dimension_numbers = #tpu.dot_dimension_numbers<[1], [0], [0], [1], [0, 0, 1, 1], [], []>} : vector<256x36xbf16>, vector<36x32xbf16>, vector<256x32xf32> -> vector<256x32xf32>
    %c0_22 = arith.constant 0 : index
    %c0_23 = arith.constant 0 : index
    %31 = vector.load %arg5[%c0_22, %c0_23] : memref<1x32xf32, #tpu.memory_space<vmem>>, vector<1x32xf32>
    %32 = vector.broadcast %31 : vector<1x32xf32> to vector<256x32xf32>
    %33 = arith.addf %30, %32 : vector<256x32xf32>
    %34 = arith.truncf %33 : vector<256x32xf32> to vector<256x32xbf16>
    %c0_24 = arith.constant 0 : index
    %c0_25 = arith.constant 0 : index
    %35 = vector.load %arg7[%c0_24, %c0_25] : memref<256x32xbf16, #tpu.memory_space<vmem>>, vector<256x32xbf16>
    tpu.vector_store %arg7[%c0_24, %c0_25], %34 {strides = array<i32>} : memref<256x32xbf16, #tpu.memory_space<vmem>>, vector<256x32xbf16>,
    return
  }
  func.func @transform_0(%arg0: i32) -> (i32, i32) {
    %c0_i32 = arith.constant 0 : i32
    %c0_i32_0 = arith.constant 0 : i32
    return %arg0, %c0_i32 : i32, i32
  }
  func.func @transform_1(%arg0: i32) -> (i32, i32) {
    %c0_i32 = arith.constant 0 : i32
    %c0_i32_0 = arith.constant 0 : i32
    %c0_i32_1 = arith.constant 0 : i32
    return %c0_i32, %c0_i32_0 : i32, i32
  }
  func.func @transform_2(%arg0: i32) -> (i32, i32) {
    %c0_i32 = arith.constant 0 : i32
    %c0_i32_0 = arith.constant 0 : i32
    %c0_i32_1 = arith.constant 0 : i32
    return %c0_i32, %c0_i32_0 : i32, i32
  }
  func.func @transform_3(%arg0: i32) -> (i32, i32) {
    %c0_i32 = arith.constant 0 : i32
    %c0_i32_0 = arith.constant 0 : i32
    %c0_i32_1 = arith.constant 0 : i32
    return %c0_i32, %c0_i32_0 : i32, i32
  }
  func.func @transform_4(%arg0: i32) -> (i32, i32) {
    %c0_i32 = arith.constant 0 : i32
    %c0_i32_0 = arith.constant 0 : i32
    %c0_i32_1 = arith.constant 0 : i32
    return %c0_i32, %c0_i32_0 : i32, i32
  }
  func.func @transform_5(%arg0: i32) -> (i32, i32) {
    %c0_i32 = arith.constant 0 : i32
    %c0_i32_0 = arith.constant 0 : i32
    %c0_i32_1 = arith.constant 0 : i32
    return %c0_i32, %c0_i32_0 : i32, i32
  }
  func.func @transform_6(%arg0: i32) -> (i32, i32) {
    %c0_i32 = arith.constant 0 : i32
    %c0_i32_0 = arith.constant 0 : i32
    return %arg0, %c0_i32 : i32, i32
  }
}

</mosaic_0001>

<bundles_post_ra>
// kernel: fire_module.1
= control target key start
LH: loop header
LB: loop body
LE: loop exit
PB: predicated region body
PF: predicated region fallthrough
CT: control target
= control target key end

     0   :  { %11 = vsyncpa [#allocation4], 0  ;;  %s5002_s0 = inlined_call_operand.vmem [shape: bf16[512,4], index: 0, kind: input, shape index: {}]   ;;  %s5003_s1 = inlined_call_operand.vmem [shape: bf16[4,4], index: 1, kind: input, shape index: {}]   ;;  %s5004_s2 = inlined_call_operand.vmem [shape: f32[1,4], index: 2, kind: input, shape index: {}]   ;;  %s5005_s3 = inlined_call_operand.vmem [shape: bf16[36,32], index: 3, kind: input, shape index: {}]   ;;  %s5006_s4 = inlined_call_operand.vmem [shape: f32[1,32], index: 4, kind: input, shape index: {}]   ;;  %s5007_s5 = inlined_call_operand.vmem [shape: bf16[256,36], index: 5, kind: input, shape index: {}]   ;;  %s5008_s6 = inlined_call_operand.hbm [shape: bf16[512,32], index: 6, kind: output, shape index: {}]  }
   0x1   :  { %13 = vsyncpa [#allocation4 + $0x1], 0  ;;  %s3091_s21 = smov 0   ;;  %s3093_s22 = smov 0  }
   0x2   :  { %s3095_s23 = smov 0   ;;  %s3097_s24 = smov 0  }
   0x3 LB: > { %s3112_s25 = sadd.s32 4294967295, %s3044_s24   ;;  %s2633_s26 = sadd.s32 4294967294, %s3044_s24   ;;  %s3044_s24 = sphi %s3097_s24, %s5223_s24   ;;  %s3040_s23 = sphi %s3095_s23, %s5222_s23   ;;  %s3036_s22 = sphi %s3093_s22, %s5221_s22   ;;  %s3032_s21 = sphi %s3091_s21, %s5220_s21  }
   0x4   : > { %s3116_s27 = sadd.s32 1, %s3044_s24   ;;  %s157_s28 = sadd.s32 1, %s3040_s23 }
   0x5   : > { %s154_s29 = ssub.s32 %s3044_s24, %s3116_s27  ;;  %p167_p0 = scmp.ne.s32.totalorder %s3040_s23, %s3036_s22 }
   0x6   : > { %p155_p1 = scmp.eq.s32.totalorder %s154_s29, 0  ;;  %p168_p2 = scmp.eq.s32.totalorder %s3112_s25, 1 }
   0x7   : > { %p173_p3 = scmp.ne.s32.totalorder %s3036_s22, %s3032_s21  ;;  %p174_p4 = scmp.eq.s32.totalorder %s2633_s26, 1 }
   0x8   : > { %s3127_s30 = scalar_select %p155_p1, %s3040_s23, %s157_s28  }
   0x9   : > { %p3129_p5 = por %p168_p2, %p167_p0  ;;  %p3133_p6 = por %p174_p4, %p173_p3 }
   0xa   : > { %p2636_p7 = scmp.ge.s32.totalorder %s3044_s24, 1  ;;  %p216_p8 = scmp.lt.s32.totalorder %s3044_s24, 3 }
   0xc   : > { %p217_p9 = pnand %p2636_p7, %p216_p8 }
   0xe   : > { %220 = sbr.rel (%p217_p9) target bundleno = 1089 (0x441), region = 44 }
  0x13   : > { %v286_v0 = vld [vmem:[%s5003_s1] sm:$0x3]  ;;  %vm420_vm0 = vcmask 1041408   ;;  %s2638_s11 = sshll.u32 %s3112_s25, 5  ;;  %vm371_vm1 = vcmask 31744   ;;  %vm545_vm2 = vcmask 289792  }
  0x14   : > { %v422_v1 = vsel %vm420_vm0, %v286_v0, 0  ;;  %p247_p10 = scmp.lt.s32.totalorder %s2638_s11, 63  ;;  %v3046_v14 = vmov 0   ;;  %v3204_v16 = vld [vmem:[%s5004_s2] ss:$0 sm:$0xff]  ;;  %s3047_s18 = smov 4  }
  0x15   : > { %431 = vmatpush.bf16.msra.mxu0 %v422_v1  ;;  %2926 = vmatpush.bf16.msra.mxu3 %v422_v1  ;;  %549 = vst.msk [vmem:[#allocation2 + $0xc] sm:$0xf] %vm545_vm2, %v3046_v14  ;;  %vm879_vm3 = vcmask 27648   ;;  %vm880_vm4 = vsmask.f32 7938  ;;  %s3048_s19 = smov 12  }
  0x16   : > { %s5225_s11 = smov (!%p247_p10, %s2638_s11), 63  ;;  %546 = vst.msk [vmem:[#allocation2] sm:$0xf] %vm545_vm2, %v3046_v14  ;;  %vm881_vm5 = vmand %vm879_vm3, %vm880_vm4  ;;  %s3049_s20 = smov 16   ;;  %vm578_vm6 = vsmask.f32 256 }
  0x17   : > { %s2639_s12 = sshll.u32 %s5225_s11, 2  ;;  %547 = vst.msk [vmem:[#allocation2 + $0x4] sm:$0xf] %vm545_vm2, %v3046_v14  ;;  %vm579_vm7 = vsmask.f32 4368  ;;  %s3050_s26 = smov 8  }
  0x18   : > { %s3147_s15 = scalar_lea.vmem %s5002_s0, %s2639_s12  ;;  %548 = vst.msk [vmem:[#allocation2 + $0x8] sm:$0xf] %vm545_vm2, %v3046_v14  ;;  %vm3236_vm8 = vmor %vm578_vm6, %vm579_vm7  ;;  %vm1066_vm9 = vsmask.f32 3328  ;;  %vm1067_vm10 = vsmask.f32 7440 }
  0x19   : > { %v2749_v2 = vld [vmem:[%s3147_s15] sm:$0xff]  ;;  %v2758_v3 = vld [vmem:[%s3147_s15 + $0x48] sm:$0xff]  ;;  %v2759_v5 = vld [vmem:[%s3147_s15 + $0x50] sm:$0xff]  ;;  %550 = vst.msk [vmem:[#allocation2 + $0x10] sm:$0xf] %vm545_vm2, %v3046_v14  ;;  %vm1035_vm12 = vcmask 60448  }
  0x1a   : > { %2704 = vmatmul.msk.bf16.vlgmr.msra.gmra.mxu0 %vm371_vm1, %v2749_v2  ;;  %2713 = vmatmul.msk.bf16.vlgmr.msra.gmra.mxu3 %vm371_vm1, %v2758_v3  ;;  %v2750_v4 = vld [vmem:[%s3147_s15 + $0x8] sm:$0xff]  ;;  %v2751_v6 = vld [vmem:[%s3147_s15 + $0x10] sm:$0xff]  ;;  %v2760_v7 = vld [vmem:[%s3147_s15 + $0x58] sm:$0xff]  ;;  %551 = vst.msk [vmem:[#allocation2 + $0x14] sm:$0xf] %vm545_vm2, %v3046_v14  ;;  %vm1464_vm13 = vcmask 126048  }
  0x1b   : > { %v2752_v8 = vld [vmem:[%s3147_s15 + $0x18] sm:$0xff]  ;;  %v2761_v9 = vld [vmem:[%s3147_s15 + $0x60] sm:$0xff]  ;;  %v2754_v11 = vld [vmem:[%s3147_s15 + $0x28] sm:$0xff]  ;;  %552 = vst.msk [vmem:[#allocation2 + $0x18] sm:$0xf] %vm545_vm2, %v3046_v14  ;;  %vm1599_vm15 = vcmask 158848  }
  0x1c   : > { %v2753_v10 = vld [vmem:[%s3147_s15 + $0x20] sm:$0xff]  ;;  %v2755_v12 = vld [vmem:[%s3147_s15 + $0x30] sm:$0xff]  ;;  %v2762_v13 = vld [vmem:[%s3147_s15 + $0x68] sm:$0xff]  ;;  %553 = vst.msk [vmem:[#allocation2 + $0x1c] sm:$0xf] %vm545_vm2, %v3046_v14  ;;  %s3051_s9 = smov 20  }
  0x1d   : > { %554 = vst.msk [vmem:[#allocation2 + $0x20] sm:$0xf] %vm545_vm2, %v3046_v14  ;;  %v2756_v15 = vld [vmem:[%s3147_s15 + $0x38] sm:$0xff]  ;;  %v2757_v17 = vld [vmem:[%s3147_s15 + $0x40] sm:$0xff]  ;;  %v2763_v32 = vld [vmem:[%s3147_s15 + $0x70] sm:$0xff]  ;;  %s3052_s10 = smov 24  }
  0x1e   : > { %555 = vst.msk [vmem:[#allocation2 + $0x24] sm:$0xf] %vm545_vm2, %v3046_v14  ;;  %vm3263_vm11 = vmor %vm1066_vm9, %vm1067_vm10  ;;  %s3053_s11 = smov 28   ;;  %s3054_s12 = smov 32   ;;  %vm1993_vm7 = vcmask 257248   ;;  %vm2349_vm10 = vcmask 293888  }
  0x1f   : > { %556 = vst.msk [vmem:[#allocation2 + $0x28] sm:$0xf] %vm545_vm2, %v3046_v14  ;;  %v882_v27 = vld [vmem:[#allocation2 + $0x8] sm:$0xf]  ;;  %vm1465_vm14 = vmand %vm1464_vm13, %vm880_vm4 }
  0x20   : > { %557 = vst.msk [vmem:[#allocation2 + $0x2c] sm:$0xf] %vm545_vm2, %v3046_v14 }
  0x21   : > { %558 = vst.msk [vmem:[#allocation2 + $0x30] sm:$0xf] %vm545_vm2, %v3046_v14 }
  0x22   : > { %559 = vst.msk [vmem:[#allocation2 + $0x34] sm:$0xf] %vm545_vm2, %v3046_v14 }
  0x23   : > { %560 = vst.msk [vmem:[#allocation2 + $0x38] sm:$0xf] %vm545_vm2, %v3046_v14 }
  0x24   : > { %561 = vst.msk [vmem:[#allocation2 + $0x3c] sm:$0xf] %vm545_vm2, %v3046_v14 }
  0x25   : > { %562 = vst.msk [vmem:[#allocation2 + $0x40] sm:$0xf] %vm545_vm2, %v3046_v14 }
  0x26   : > { %563 = vst.msk [vmem:[#allocation2 + $0x44] sm:$0xf] %vm545_vm2, %v3046_v14 }
  0x27   : > { %564 = vst.msk [vmem:[#allocation2 + $0x48] sm:$0xf] %vm545_vm2, %v3046_v14 }
  0x28   : > { %565 = vst.msk [vmem:[#allocation2 + $0x4c] sm:$0xf] %vm545_vm2, %v3046_v14 }
  0x29   : > { %566 = vst.msk [vmem:[#allocation2 + $0x50] sm:$0xf] %vm545_vm2, %v3046_v14 }
  0x2a   : > { %2705 = vmatmul.msk.bf16.gmra.mxu0 %vm371_vm1, %v2750_v4  ;;  %2714 = vmatmul.msk.bf16.gmra.mxu3 %vm371_vm1, %v2759_v5  ;;  %567 = vst.msk [vmem:[#allocation2 + $0x54] sm:$0xf] %vm545_vm2, %v3046_v14 }
  0x2b   : > { %568 = vst.msk [vmem:[#allocation2 + $0x58] sm:$0xf] %vm545_vm2, %v3046_v14 }
  0x2c   : > { %569 = vst.msk [vmem:[#allocation2 + $0x5c] sm:$0xf] %vm545_vm2, %v3046_v14 }
  0x2d   : > { %570 = vst.msk [vmem:[#allocation2 + $0x60] sm:$0xf] %vm545_vm2, %v3046_v14 }
  0x2e   : > { %571 = vst.msk [vmem:[#allocation2 + $0x64] sm:$0xf] %vm545_vm2, %v3046_v14 }
  0x2f   : > { %572 = vst.msk [vmem:[#allocation2 + $0x68] sm:$0xf] %vm545_vm2, %v3046_v14 }
  0x30   : > { %573 = vst.msk [vmem:[#allocation2 + $0x6c] sm:$0xf] %vm545_vm2, %v3046_v14 }
  0x31   : > { %574 = vst.msk [vmem:[#allocation2 + $0x70] sm:$0xf] %vm545_vm2, %v3046_v14 }
  0x32   : > { %575 = vst.msk [vmem:[#allocation2 + $0x74] sm:$0xf] %vm545_vm2, %v3046_v14 }
  0x33   : > { %576 = vst.msk [vmem:[#allocation2 + $0x78] sm:$0xf] %vm545_vm2, %v3046_v14 }
  0x34   : > { %577 = vst.msk [vmem:[#allocation2 + $0x7c] sm:$0xf] %vm545_vm2, %v3046_v14  ;;  %vm1317_vm2 = vsmask.f32 7950 }
  0x3a   : > { %2706 = vmatmul.msk.bf16.gmra.mxu0 %vm371_vm1, %v2751_v6  ;;  %2715 = vmatmul.msk.bf16.gmra.mxu3 %vm371_vm1, %v2760_v7 }
  0x4a   : > { %2707 = vmatmul.msk.bf16.gmra.mxu0 %vm371_vm1, %v2752_v8  ;;  %2716 = vmatmul.msk.bf16.gmra.mxu3 %vm371_vm1, %v2761_v9 }
  0x5a   : > { %2708 = vmatmul.msk.bf16.gmra.mxu0 %vm371_vm1, %v2753_v10  ;;  %2717 = vmatmul.msk.bf16.gmra.mxu3 %vm371_vm1, %v2762_v13 }
  0x6a   : > { %2709 = vmatmul.msk.bf16.gmra.mxu0 %vm371_vm1, %v2754_v11  ;;  %2718 = vmatmul.msk.bf16.gmra.mxu3 %vm371_vm1, %v2763_v32 }
  0x7a   : > { %2710 = vmatmul.msk.bf16.gmra.mxu0 %vm371_vm1, %v2755_v12 }
  0x8a   : > { %2711 = vmatmul.msk.bf16.gmra.mxu0 %vm371_vm1, %v2756_v15 }
  0x97   : > { %v433_v18 = vpop.f32.mrf.mxu0 }
  0x98   : > { %v434_v19 = vadd.f32 %v3204_v16, %v433_v18 }
  0x9a   : > { %v513_v20 = vpack.c.bf16 %v434_v19, %v434_v19  ;;  %2712 = vmatmul.msk.bf16.gmra.mxu0 %vm371_vm1, %v2757_v17 }
  0x9c   : > { %945 = vrot.lane.b32.xlu0 %v513_v20, %s3047_s18  ;;  %v582_v21 = vshrl.u32 %v513_v20, 16  ;;  %v585_v25 = vshll.u32 %v513_v20, 16 }
  0x9d   : > { %v478_v22 = vpop.f32.mrf.mxu3 }
  0x9e   : > { %v479_v23 = vadd.f32 %v3204_v16, %v478_v22  ;;  %v584_v24 = vrot.slane %v582_v21, 7  ;;  %v1070_v42 = vrot.slane %v582_v21, 4  ;;  %v1069_v45 = vrot.slane %v585_v25, 5 }
  0x9f   : > { %v435_v26 = vpop.f32.mrf.mxu0 }
  0xa0   : > { %v3219_v28 = vpack.c.bf16 %v479_v23, %v479_v23  ;;  %v436_v29 = vadd.f32 %v3204_v16, %v435_v26  ;;  %v587_v30 = vor.u32 %v585_v25, %v584_v24  ;;  %v588_v49 = vrot.slane %v584_v24, 4 }
  0xa1   : > { %v1071_v55 = vor.u32 %v1070_v42, %v1069_v45 }
  0xa2   : > { %v3222_v31 = vpack.c.bf16 %v436_v29, %v436_v29  ;;  %1368 = vrot.lane.b32.xlu1 %v587_v30, %s3048_s19  ;;  %v743_v33 = vshrl.u32 %v3219_v28, 16  ;;  %v883_v34 = vsel %vm881_vm5, %v587_v30, %v882_v27  ;;  %v746_v38 = vshll.u32 %v3219_v28, 16 }
  0xa3   : > { %884 = vst [vmem:[#allocation2 + $0x8] sm:$0xf] %v883_v34  ;;  %v1072_v2 = vrot.slane %v1071_v55, 4  ;;  %vm1322_vm5 = vcmask 93248  }
  0xa4   : > { %1503 = vrot.lane.b32.xlu0 %v513_v20, %s3049_s20  ;;  %v590_v35 = vshrl.u32 %v3222_v31, 16  ;;  %v745_v36 = vrot.slane %v743_v33, 7  ;;  %v593_v41 = vshll.u32 %v3222_v31, 16 }
  0xa5   : > { %v480_v37 = vpop.f32.mrf.mxu3 }
  0xa6   : > { %v481_v39 = vadd.f32 %v3204_v16, %v480_v37  ;;  %v592_v40 = vrot.slane %v590_v35, 7  ;;  %v3242_v46 = vor.u32 %v746_v38, %v745_v36  ;;  %v750_v56 = vrot.slane %v745_v36, 4 }
  0xa7   : > { %v438_v43 = vpop.f32.mrf.mxu0  ;;  %v1073_v60 = vrot.slane %v593_v41, 5  ;;  %v1075_v6 = vrot.slane %v590_v35, 4 }
  0xa8   : > { %v3244_v47 = vpack.c.bf16 %v481_v39, %v481_v39  ;;  %v439_v48 = vadd.f32 %v3204_v16, %v438_v43  ;;  %v595_v50 = vor.u32 %v593_v41, %v592_v40  ;;  %v597_v9 = vrot.slane %v592_v40, 4 }
  0xa9   : > { %v3281_v8 = vsel %vm3263_vm11, %v1072_v2, %v1073_v60  ;;  %v1076_v15 = vor.u32 %v1075_v6, %v1073_v60 }
  0xaa   : > { %v3247_v51 = vpack.c.bf16 %v439_v48, %v439_v48  ;;  %1505 = vrot.lane.b32.xlu1 %v3222_v31, %s3049_s20  ;;  %v596_v52 = vsel %vm3236_vm8, %v588_v49, %v595_v50  ;;  %v752_v53 = vshrl.u32 %v3244_v47, 16  ;;  %v755_v54 = vshll.u32 %v3244_v47, 16  ;;  %5096 = vst [vmem:[#allocation8_spill] sm:$0xff] %v3281_v8 }
  0xab   : > { %1370 = vrot.lane.b32.xlu2 %v596_v52, %s3048_s19  ;;  %886 = vst.msk [vmem:[#allocation2 + $0xc] sm:$0xf] %vm879_vm3, %v596_v52  ;;  %v1077_v30 = vrot.slane %v1076_v15, 4  ;;  %v1160_v48 = vrot.slane %v743_v33, 4 }
  0xac   : > { %5092 = vst [vmem:[#allocation6_spill] sm:$0xff] %v3247_v51  ;;  %1223 = vrot.lane.b32.xlu0 %v1069_v45, %s3050_s26  ;;  %v754_v57 = vrot.slane %v752_v53, 7  ;;  %v599_v58 = vshrl.u32 %v3247_v51, 16  ;;  %v602_v3 = vshll.u32 %v3247_v51, 16  ;;  %v3348_v45 = vrot.slane %v746_v38, 5 }
  0xad   : > { %v483_v59 = vpop.f32.mrf.mxu3  ;;  %v1163_v15 = vrot.slane %v755_v54, 5 }
  0xae   : > { %v484_v61 = vadd.f32 %v3204_v16, %v483_v59  ;;  %v757_v63 = vor.u32 %v755_v54, %v754_v57  ;;  %v601_v0 = vrot.slane %v599_v58, 7  ;;  %v759_v21 = vrot.slane %v754_v57, 4 }
  0xaf   : > { %v440_v1 = vpop.f32.mrf.mxu0  ;;  %v3305_v22 = vrot.slane %v602_v3, 5 }
  0xb0   : > { %v3272_v4 = vpack.c.bf16 %v484_v61, %v484_v61  ;;  %v441_v5 = vadd.f32 %v3204_v16, %v440_v1  ;;  %v3277_v7 = vsel %vm3236_vm8, %v750_v56, %v757_v63  ;;  %v604_v10 = vor.u32 %v602_v3, %v601_v0  ;;  %v2764_v63 = vld [vmem:[%s3147_s15 + $0x78] sm:$0xff] }
  0xb1   : > { %5095 = vst [vmem:[#allocation7_spill] sm:$0xff] %v3277_v7  ;;  %v606_v24 = vrot.slane %v601_v0, 4  ;;  %v3328_v37 = vsel %vm3263_vm11, %v1077_v30, %v3305_v22  ;;  %v1161_v61 = vor.u32 %v1160_v48, %v3348_v45  ;;  %2719 = vmatmul.msk.bf16.gmra.mxu3 %vm371_vm1, %v2764_v63  ;;  %vm1316_vm1 = vcmask 93251  }
  0xb2   : > { %904 = vst.msk [vmem:[#allocation2 + $0x54] sm:$0xf] %vm879_vm3, %v3277_v7  ;;  %v3285_v11 = vpack.c.bf16 %v441_v5, %v441_v5  ;;  %1225 = vrot.lane.b32.xlu1 %v3281_v8, %s3050_s26  ;;  %v761_v12 = vshrl.u32 %v3272_v4, 16  ;;  %v3294_v13 = vsel %vm3236_vm8, %v597_v9, %v604_v10  ;;  %v764_v14 = vshll.u32 %v3272_v4, 16  ;;  %vm1318_vm4 = vmand %vm1316_vm1, %vm1317_vm2 }
  0xb3   : > { %1507 = vrot.lane.b32.xlu2 %v3247_v51, %s3049_s20  ;;  %5098 = vst [vmem:[#allocation10_spill] sm:$0xff] %v3294_v13  ;;  %v1162_v10 = vrot.slane %v1161_v61, 4 }
  0xb4   : > { %5097 = vst [vmem:[#allocation9_spill] sm:$0xff] %v3285_v11  ;;  %981 = vrot.lane.b32.xlu0 %v3219_v28, %s3047_s18  ;;  %v611_v17 = vshll.u32 %v3285_v11, 16  ;;  %v608_v18 = vshrl.u32 %v3285_v11, 16  ;;  %v763_v19 = vrot.slane %v761_v12, 7 }
  0xb5   : > { %887 = vst.msk [vmem:[#allocation2 + $0x10] sm:$0xf] %vm879_vm3, %v3294_v13  ;;  %v485_v20 = vpop.f32.mrf.mxu3 }
  0xb6   : > { %v486_v23 = vadd.f32 %v3204_v16, %v485_v20  ;;  %v610_v25 = vrot.slane %v608_v18, 7  ;;  %v766_v27 = vor.u32 %v764_v14, %v763_v19  ;;  %v768_v57 = vrot.slane %v763_v19, 4 }
  0xb7   : > { %v443_v26 = vpop.f32.mrf.mxu0 }
  0xb8   : > { %v444_v29 = vadd.f32 %v3204_v16, %v443_v26  ;;  %v3313_v32 = vpack.c.bf16 %v486_v23, %v486_v23  ;;  %v613_v34 = vor.u32 %v611_v17, %v610_v25  ;;  %v3319_v35 = vsel %vm3236_vm8, %v759_v21, %v766_v27 }
  0xb9   : > { %5099 = vst [vmem:[#allocation11_spill] sm:$0xff] %v3319_v35  ;;  %v615_v52 = vrot.slane %v610_v25, 4  ;;  %v1165_v21 = vrot.slane %v752_v53, 4  ;;  %v1080_v26 = vrot.slane %v599_v58, 4  ;;  %v3411_v53 = vsel %vm3263_vm11, %v1162_v10, %v1163_v15 }
  0xba   : > { %v3321_v36 = vpack.c.bf16 %v444_v29, %v444_v29  ;;  %983 = vrot.lane.b32.xlu1 %v3244_v47, %s3047_s18  ;;  %v3332_v39 = vsel %vm3236_vm8, %v606_v24, %v613_v34  ;;  %905 = vst.msk [vmem:[#allocation2 + $0x58] sm:$0xf] %vm879_vm3, %v3319_v35  ;;  %v770_v40 = vshrl.u32 %v3313_v32, 16  ;;  %v773_v43 = vshll.u32 %v3313_v32, 16 }
  0xbb   : > { %5101 = vst [vmem:[#allocation13_spill] sm:$0xff] %v3332_v39  ;;  %1227 = vrot.lane.b32.xlu2 %v3328_v37, %s3050_s26  ;;  %v1166_v58 = vor.u32 %v1165_v21, %v1163_v15 }
  0xbc   : > { %5100 = vst [vmem:[#allocation12_spill] sm:$0xff] %v3321_v36  ;;  %947 = vrot.lane.b32.xlu0 %v3222_v31, %s3047_s18  ;;  %v617_v41 = vshrl.u32 %v3321_v36, 16  ;;  %v620_v42 = vshll.u32 %v3321_v36, 16  ;;  %v772_v50 = vrot.slane %v770_v40, 7 }
  0xbd   : > { %888 = vst.msk [vmem:[#allocation2 + $0x14] sm:$0xf] %vm879_vm3, %v3332_v39  ;;  %v488_v49 = vpop.f32.mrf.mxu3 }
  0xbe   : > { %v489_v31 = vadd.f32 %v3204_v16, %v488_v49  ;;  %v619_v55 = vrot.slane %v617_v41, 7  ;;  %v775_v59 = vor.u32 %v773_v43, %v772_v50  ;;  %v777_v19 = vrot.slane %v772_v50, 4  ;;  %5105 = vst [vmem:[#allocation17_spill] sm:$0xff] %v3411_v53 }
  0xbf   : > { %v445_v56 = vpop.f32.mrf.mxu0  ;;  %v1081_v49 = vor.u32 %v1080_v26, %v3305_v22 }
  0xc0   : > { %v446_v38 = vadd.f32 %v3204_v16, %v445_v56  ;;  %v3360_v60 = vpack.c.bf16 %v489_v31, %v489_v31  ;;  %v622_v33 = vor.u32 %v620_v42, %v619_v55  ;;  %v3368_v0 = vsel %vm3236_vm8, %v768_v57, %v775_v59 }
  0xc1   : > { %5102 = vst [vmem:[#allocation14_spill] sm:$0xff] %v3368_v0  ;;  %v624_v23 = vrot.slane %v619_v55, 4  ;;  %v1167_v55 = vrot.slane %v1166_v58, 4  ;;  %v3438_v56 = vrot.slane %v764_v14, 5 }
  0xc2   : > { %v3370_v1 = vpack.c.bf16 %v446_v38, %v446_v38  ;;  %949 = vrot.lane.b32.xlu1 %v3247_v51, %s3047_s18  ;;  %v3376_v2 = vsel %vm3236_vm8, %v615_v52, %v622_v33  ;;  %906 = vst.msk [vmem:[#allocation2 + $0x5c] sm:$0xf] %vm879_vm3, %v3368_v0  ;;  %v782_v3 = vshll.u32 %v3360_v60, 16  ;;  %v5011_v5 = vshrl.u32 %v3360_v60, 16 }
  0xc3   : > { %5104 = vst [vmem:[#allocation16_spill] sm:$0xff] %v3376_v2  ;;  %1406 = vrot.lane.b32.xlu2 %v3277_v7, %s3048_s19  ;;  %v1082_v38 = vrot.slane %v1081_v49, 4  ;;  %v1083_v33 = vrot.slane %v611_v17, 5  ;;  %v3455_v14 = vsel %vm3263_vm11, %v1167_v55, %v3438_v56  ;;  %v1085_v49 = vrot.slane %v608_v18, 4 }
  0xc4   : > { %5103 = vst [vmem:[#allocation15_spill] sm:$0xff] %v3370_v1  ;;  %1372 = vrot.lane.b32.xlu0 %v3294_v13, %s3048_s19  ;;  %v5014_v6 = vshrl.u32 %v3370_v1, 16  ;;  %v629_v9 = vshll.u32 %v3370_v1, 16  ;;  %v3395_v20 = vrot.slane %v5011_v5, 7  ;;  %v1170_v18 = vrot.slane %v761_v12, 4 }
  0xc5   : > { %889 = vst.msk [vmem:[#allocation2 + $0x18] sm:$0xf] %vm879_vm3, %v3376_v2  ;;  %v490_v50 = vpop.f32.mrf.mxu3  ;;  %v3465_v17 = vsel %vm3263_vm11, %v1082_v38, %v1083_v33 }
  0xc6   : > { %v628_v24 = vrot.slane %v5014_v6, 7  ;;  %v784_v54 = vor.u32 %v782_v3, %v3395_v20  ;;  %v491_v63 = vadd.f32 %v3204_v16, %v490_v50  ;;  %5109 = vst [vmem:[#allocation21_spill] sm:$0xff] %v3455_v14 }
  0xc7   : > { %v448_v25 = vpop.f32.mrf.mxu0  ;;  %5111 = vst [vmem:[#allocation23_spill] sm:$0xff] %v3465_v17 }
  0xc8   : > { %v449_v27 = vadd.f32 %v3204_v16, %v448_v25  ;;  %v631_v29 = vor.u32 %v629_v9, %v628_v24  ;;  %v3415_v30 = vsel %vm3236_vm8, %v777_v19, %v784_v54  ;;  %v633_v57 = vrot.slane %v628_v24, 4 }
  0xc9   : > { %5106 = vst [vmem:[#allocation18_spill] sm:$0xff] %v3415_v30  ;;  %v3471_v19 = vpack.c.bf16 %v491_v63, %v491_v63 }
  0xca   : > { %v3417_v34 = vpack.c.bf16 %v449_v27, %v449_v27  ;;  %1261 = vrot.lane.b32.xlu1 %v3411_v53, %s3050_s26  ;;  %v3423_v48 = vsel %vm3236_vm8, %v624_v23, %v631_v29  ;;  %907 = vst.msk [vmem:[#allocation2 + $0x60] sm:$0xf] %vm879_vm3, %v3415_v30 }
  0xcb   : > { %5108 = vst [vmem:[#allocation20_spill] sm:$0xff] %v3423_v48  ;;  %985 = vrot.lane.b32.xlu2 %v3272_v4, %s3047_s18  ;;  %v788_v26 = vshrl.u32 %v3471_v19, 16  ;;  %v791_v27 = vshll.u32 %v3471_v19, 16 }
  0xcc   : > { %5107 = vst [vmem:[#allocation19_spill] sm:$0xff] %v3417_v34  ;;  %1509 = vrot.lane.b32.xlu0 %v3285_v11, %s3049_s20  ;;  %v5009_v31 = vshrl.u32 %v3417_v34, 16  ;;  %v5010_v52 = vshll.u32 %v3417_v34, 16 }
  0xcd   : > { %890 = vst.msk [vmem:[#allocation2 + $0x1c] sm:$0xf] %vm879_vm3, %v3423_v48  ;;  %v493_v15 = vpop.f32.mrf.mxu3  ;;  %v790_v29 = vrot.slane %v788_v26, 7  ;;  %v3491_v55 = vrot.slane %v791_v27, 5 }
  0xce   : > { %v3442_v22 = vrot.slane %v5009_v31, 7  ;;  %v494_v21 = vadd.f32 %v3204_v16, %v493_v15 }
  0xcf   : > { %v450_v59 = vpop.f32.mrf.mxu0 }
  0xd0   : > { %v640_v61 = vor.u32 %v5010_v52, %v3442_v22  ;;  %v3474_v24 = vpack.c.bf16 %v494_v21, %v494_v21  ;;  %v451_v25 = vadd.f32 %v3204_v16, %v450_v59  ;;  %v793_v59 = vor.u32 %v791_v27, %v790_v29 }
  0xd2   : > { %951 = vrot.lane.b32.xlu1 %v3285_v11, %s3047_s18  ;;  %v3459_v10 = vsel %vm3236_vm8, %v633_v57, %v640_v61  ;;  %v5012_v58 = vshrl.u32 %v3474_v24, 16  ;;  %v3489_v50 = vpack.c.bf16 %v451_v25, %v451_v25  ;;  %v786_v57 = vrot.slane %v3395_v20, 4 }
  0xd3   : > { %5110 = vst [vmem:[#allocation22_spill] sm:$0xff] %v3459_v10  ;;  %1263 = vrot.lane.b32.xlu2 %v3455_v14, %s3050_s26  ;;  %v800_v38 = vshll.u32 %v3474_v24, 16  ;;  %v1185_v61 = vrot.slane %v788_v26, 4  ;;  %v795_v20 = vrot.slane %v790_v29, 4  ;;  %v1086_v25 = vor.u32 %v1085_v49, %v1083_v33 }
  0xd4   : > { %891 = vst.msk [vmem:[#allocation2 + $0x20] sm:$0xf] %vm879_vm3, %v3459_v10  ;;  %1229 = vrot.lane.b32.xlu0 %v3465_v17, %s3050_s26  ;;  %v3497_v63 = vrot.slane %v5012_v58, 7  ;;  %v1171_v33 = vor.u32 %v1170_v18, %v3438_v56  ;;  %v647_v49 = vshll.u32 %v3489_v50, 16  ;;  %v1088_v56 = vrot.slane %v620_v42, 5 }
  0xd5   : > { %5112 = vst [vmem:[#allocation24_spill] sm:$0xff] %v3489_v50  ;;  %v1186_v26 = vor.u32 %v1185_v61, %v3491_v55  ;;  %v3514_v31 = vrot.slane %v800_v38, 5  ;;  %v642_v18 = vrot.slane %v3442_v22, 4 }
  0xd6   : > { %v802_v27 = vor.u32 %v800_v38, %v3497_v63  ;;  %v1087_v38 = vrot.slane %v1086_v25, 4  ;;  %v1172_v58 = vrot.slane %v1171_v33, 4 }
  0xd7   : > { %v453_v23 = vpop.f32.mrf.mxu0  ;;  %v1187_v12 = vrot.slane %v1186_v26, 4  ;;  %v3539_v26 = vrot.slane %v647_v49, 5 }
  0xd8   : > { %v454_v54 = vadd.f32 %v3204_v16, %v453_v23  ;;  %v3507_v23 = vsel %vm3236_vm8, %v786_v57, %v793_v59  ;;  %v3520_v57 = vsel %vm3236_vm8, %v795_v20, %v802_v27 }
  0xd9   : > { %5114 = vst [vmem:[#allocation26_spill] sm:$0xff] %v3507_v23  ;;  %v3534_v61 = vsel %vm3263_vm11, %v1187_v12, %v3514_v31  ;;  %v1173_v12 = vrot.slane %v773_v43, 5 }
  0xda   : > { %1374 = vrot.lane.b32.xlu1 %v3332_v39, %s3048_s19  ;;  %v3499_v15 = vpack.c.bf16 %v454_v54, %v454_v54  ;;  %908 = vst.msk [vmem:[#allocation2 + $0x64] sm:$0xf] %vm879_vm3, %v3507_v23  ;;  %v644_v54 = vshrl.u32 %v3489_v50, 16 }
  0xdb   : > { %953 = vrot.lane.b32.xlu2 %v3321_v36, %s3047_s18  ;;  %5115 = vst [vmem:[#allocation27_spill] sm:$0xff] %v3520_v57 }
  0xdc   : > { %1408 = vrot.lane.b32.xlu0 %v3319_v35, %s3048_s19  ;;  %5113 = vst [vmem:[#allocation25_spill] sm:$0xff] %v3499_v15  ;;  %v646_v29 = vrot.slane %v644_v54, 7  ;;  %v5013_v59 = vshrl.u32 %v3499_v15, 16  ;;  %v656_v52 = vshll.u32 %v3499_v15, 16  ;;  %v1105_v25 = vrot.slane %v644_v54, 4 }
  0xdd   : > { %909 = vst.msk [vmem:[#allocation2 + $0x68] sm:$0xf] %vm879_vm3, %v3520_v57  ;;  %v3558_v54 = vsel %vm3263_vm11, %v1087_v38, %v1088_v56 }
  0xde   : > { %5116 = vst [vmem:[#allocation28_spill] sm:$0xff] %v3534_v61  ;;  %v649_v20 = vor.u32 %v647_v49, %v646_v29  ;;  %v3543_v27 = vrot.slane %v5013_v59, 7  ;;  %v651_v22 = vrot.slane %v646_v29, 4  ;;  %v1106_v59 = vor.u32 %v1105_v25, %v3539_v26 }
  0xdf   : > { %v3501_v21 = vpop.f32.mrf.mxu0  ;;  %5118 = vst [vmem:[#allocation30_spill] sm:$0xff] %v3558_v54  ;;  %v3560_v33 = vrot.slane %v656_v52, 5 }
  0xe0   : > { %v3550_v42 = vsel %vm3236_vm8, %v642_v18, %v649_v20  ;;  %v658_v49 = vor.u32 %v656_v52, %v3543_v27  ;;  %v1107_v29 = vrot.slane %v1106_v59, 4  ;;  %v3572_v18 = vsel %vm3263_vm11, %v1172_v58, %v1173_v12 }
  0xe1   : > { %5117 = vst [vmem:[#allocation29_spill] sm:$0xff] %v3550_v42  ;;  %v1090_v59 = vrot.slane %v617_v41, 4  ;;  %v1175_v20 = vrot.slane %v770_v40, 4  ;;  %v495_v41 = vpop.f32.mrf.mxu3 }
  0xe2   : > { %1511 = vrot.lane.b32.xlu1 %v3321_v36, %s3049_s20  ;;  %892 = vst.msk [vmem:[#allocation2 + $0x24] sm:$0xf] %vm879_vm3, %v3550_v42  ;;  %v3566_v43 = vsel %vm3236_vm8, %v651_v22, %v658_v49  ;;  %v3581_v52 = vsel %vm3263_vm11, %v1107_v29, %v3560_v33  ;;  %v1093_v22 = vrot.slane %v629_v9, 5  ;;  %v496_v6 = vadd.f32 %v3204_v16, %v495_v41 }
  0xe3   : > { %1376 = vrot.lane.b32.xlu2 %v3376_v2, %s3048_s19  ;;  %5119 = vst [vmem:[#allocation31_spill] sm:$0xff] %v3566_v43  ;;  %v1091_v58 = vor.u32 %v1090_v59, %v1088_v56  ;;  %v1176_v29 = vor.u32 %v1175_v20, %v1173_v12  ;;  %v1178_v9 = vrot.slane %v782_v3, 5  ;;  %v5123_v59 = vshrl.u32 %v3370_v1, 16 }
  0xe4   : > { %987 = vrot.lane.b32.xlu0 %v3313_v32, %s3047_s18  ;;  %5120 = vst [vmem:[#allocation32_spill] sm:$0xff] %v3572_v18  ;;  %v3612_v12 = vpack.c.bf16 %v496_v6, %v496_v6  ;;  %v456_v6 = vadd.f32 %v3204_v16, %v3501_v21  ;;  %v5126_v21 = vshrl.u32 %v3360_v60, 16 }
  0xe5   : > { %893 = vst.msk [vmem:[#allocation2 + $0x28] sm:$0xf] %vm879_vm3, %v3566_v43  ;;  %v1092_v25 = vrot.slane %v1091_v58, 4  ;;  %v1177_v40 = vrot.slane %v1176_v29, 4  ;;  %v1095_v58 = vrot.slane %v5123_v59, 4  ;;  %v5125_v29 = vshrl.u32 %v3474_v24, 16 }
  0xe6   : > { %5121 = vst [vmem:[#allocation33_spill] sm:$0xff] %v3581_v52  ;;  %v806_v3 = vshrl.u32 %v3612_v12, 16 }
  0xe7   : > { %v458_v5 = vpop.f32.mrf.mxu0  ;;  %v3604_v56 = vsel %vm3263_vm11, %v1092_v25, %v1093_v22  ;;  %v1096_v59 = vor.u32 %v1095_v58, %v1093_v22 }
  0xe8   : > { %5122 = vst [vmem:[#allocation34_spill] sm:$0xff] %v3604_v56  ;;  %v459_v2 = vadd.f32 %v3204_v16, %v458_v5  ;;  %v5128_v5 = vshll.u32 %v3417_v34, 16 }
  0xe9   : > { %v498_v20 = vpop.f32.mrf.mxu3 }
  0xea   : > { %1231 = vrot.lane.b32.xlu1 %v3558_v54, %s3050_s26  ;;  %v499_v25 = vadd.f32 %v3204_v16, %v498_v20  ;;  %v3661_v14 = vrot.slane %v5128_v5, 5 }
  0xeb   : > { %955 = vrot.lane.b32.xlu2 %v3370_v1, %s3047_s18 }
  0xec   : > { %1265 = vrot.lane.b32.xlu0 %v3572_v18, %s3050_s26  ;;  %v3623_v36 = vpack.c.bf16 %v499_v25, %v499_v25  ;;  %v3627_v18 = vrot.slane %v5125_v29, 4  ;;  %v808_v25 = vrot.slane %v806_v3, 7  ;;  %v1195_v29 = vrot.slane %v806_v3, 4 }
  0xee   : > { %v818_v20 = vshll.u32 %v3623_v36, 16  ;;  %v5127_v35 = vshrl.u32 %v3623_v36, 16 }
  0xef   : > { %v3585_v38 = vpop.f32.mrf.mxu0 }
  0xf0   : > { %v3655_v51 = vrot.slane %v5127_v35, 7  ;;  %v3673_v39 = vrot.slane %v818_v20, 5 }
  0xf2   : > { %1410 = vrot.lane.b32.xlu1 %v3368_v0, %s3048_s19  ;;  %v3650_v0 = vpack.c.bf16 %v456_v6, %v456_v6  ;;  %v813_v6 = vrot.slane %v808_v25, 4  ;;  %v820_v35 = vor.u32 %v818_v20, %v3655_v51 }
  0xf3   : > { %1513 = vrot.lane.b32.xlu2 %v3370_v1, %s3049_s20  ;;  %v1180_v1 = vrot.slane %v5126_v21, 4  ;;  %v1097_v21 = vrot.slane %v1096_v59, 4 }
  0xf4   : > { %1378 = vrot.lane.b32.xlu0 %v3423_v48, %s3048_s19  ;;  %v3621_v48 = vsel %vm3263_vm11, %v1177_v40, %v1178_v9  ;;  %v809_v40 = vshll.u32 %v3612_v12, 16  ;;  %v662_v5 = vshrl.u32 %v3650_v0, 16  ;;  %v3691_v20 = vsel %vm3236_vm8, %v813_v6, %v820_v35 }
  0xf5   : > { %5124 = vst [vmem:[#allocation35_spill] sm:$0xff] %v3621_v48  ;;  %v1181_v59 = vor.u32 %v1180_v1, %v1178_v9  ;;  %v665_v9 = vshll.u32 %v3650_v0, 16 }
  0xf6   : > { %v3647_v58 = vrot.slane %v809_v40, 5  ;;  %5132 = vst [vmem:[#allocation38_spill] sm:$0xff] %v3691_v20  ;;  %v664_v1 = vrot.slane %v662_v5, 7  ;;  %v1115_v54 = vrot.slane %v662_v5, 4 }
  0xf7   : > { %v3597_v49 = vpop.f32.mrf.mxu0  ;;  %911 = vst.msk [vmem:[#allocation2 + $0x70] sm:$0xf] %vm879_vm3, %v3691_v20  ;;  %v3709_v53 = vrot.slane %v665_v9, 5 }
  0xf8   : > { %v1196_v3 = vor.u32 %v1195_v29, %v3647_v58  ;;  %v667_v13 = vor.u32 %v665_v9, %v664_v1 }
  0xfa   : > { %989 = vrot.lane.b32.xlu1 %v3360_v60, %s3047_s18 }
  0xfb   : > { %1233 = vrot.lane.b32.xlu2 %v3604_v56, %s3050_s26 }
  0xfc   : > { %957 = vrot.lane.b32.xlu0 %v3417_v34, %s3047_s18 }
  0xff   : > { %v3616_v41 = vpop.f32.mrf.mxu0 }
 0x102   : > { %1267 = vrot.lane.b32.xlu1 %v3621_v48, %s3050_s26  ;;  %v811_v48 = vor.u32 %v809_v40, %v808_v25  ;;  %v3671_v40 = vpack.c.bf16 %v459_v2, %v459_v2  ;;  %v1197_v25 = vrot.slane %v1196_v3, 4  ;;  %v3687_v2 = vsel %vm3263_vm11, %v1097_v21, %v3661_v14 }
 0x103   : > { %1412 = vrot.lane.b32.xlu2 %v3415_v30, %s3048_s19  ;;  %v804_v30 = vrot.slane %v3497_v63, 4  ;;  %5131 = vst [vmem:[#allocation37_spill] sm:$0xff] %v3687_v2 }
 0x104   : > { %1515 = vrot.lane.b32.xlu0 %v3417_v34, %s3049_s20  ;;  %5129 = vst [vmem:[#allocation36_spill] sm:$0xff] %v3671_v40  ;;  %v3701_v3 = vsel %vm3263_vm11, %v1197_v25, %v3673_v39  ;;  %v5038_v6 = vshrl.u32 %v3671_v40, 16  ;;  %v674_v7 = vshll.u32 %v3671_v40, 16 }
 0x105   : > { %v3645_v22 = vpop.permute.xlu2 %1370  ;;  %v3665_v63 = vsel %vm3236_vm8, %v804_v30, %v811_v48  ;;  %v5130_v30 = vshrl.u32 %v3499_v15, 16 }
 0x106   : > { %910 = vst.msk [vmem:[#allocation2 + $0x6c] sm:$0xf] %vm879_vm3, %v3665_v63  ;;  %v3716_v25 = vrot.slane %v5038_v6, 7 }
 0x107   : > { %v3657_v11 = vpop.f32.mrf.mxu0  ;;  %v3680_v48 = vrot.slane %v5130_v30, 4  ;;  %v1182_v30 = vrot.slane %v1181_v59, 4 }
 0x108   : > { %v676_v9 = vor.u32 %v674_v7, %v3716_v25 }
 0x109   : > { %v3732_v6 = vsel %vm3263_vm11, %v1182_v30, %v3491_v55 }
 0x10a   : > { %1380 = vrot.lane.b32.xlu1 %v3459_v10, %s3048_s19  ;;  %v660_v10 = vrot.slane %v3543_v27, 4  ;;  %v669_v27 = vrot.slane %v664_v1, 4  ;;  %5133 = vst [vmem:[#allocation39_spill] sm:$0xff] %v3732_v6 }
 0x10b   : > { %991 = vrot.lane.b32.xlu2 %v3471_v19, %s3047_s18 }
 0x10c   : > { %1235 = vrot.lane.b32.xlu0 %v3687_v2, %s3050_s26  ;;  %v3721_v59 = vsel %vm3236_vm8, %v660_v10, %v667_v13  ;;  %v1466_v13 = vld [vmem:[#allocation2] sm:$0xf]  ;;  %v3736_v10 = vrot.slane %v674_v7, 5  ;;  %v5135_v7 = vshrl.u32 %v3417_v34, 16 }
 0x10d   : > { %v3705_v21 = vpop.permute.xlu2 %1507  ;;  %894 = vst.msk [vmem:[#allocation2 + $0x2c] sm:$0xf] %vm879_vm3, %v3721_v59 }
 0x10e   : > { %v946_v35 = vpop.permute.xlu0 %945  ;;  %v1100_v2 = vrot.slane %v5135_v7, 4 }
 0x10f   : > { %1036 = vst.msk [vmem:[#allocation2 + $0x8] sm:$0xf] %vm1035_vm12, %v946_v35  ;;  %v3712_v29 = vpop.f32.mrf.mxu0  ;;  %v1116_v35 = vor.u32 %v1115_v54, %v3709_v53  ;;  %v3742_v54 = vsel %vm3236_vm8, %v669_v27, %v676_v9 }
 0x110   : > { %5134 = vst [vmem:[#allocation40_spill] sm:$0xff] %v3742_v54 }
 0x111   : > { %v1117_v5 = vrot.slane %v1116_v35, 4  ;;  %895 = vst.msk [vmem:[#allocation2 + $0x30] sm:$0xf] %vm879_vm3, %v3742_v54 }
 0x112   : > { %959 = vrot.lane.b32.xlu1 %v3489_v50, %s3047_s18 }
 0x113   : > { %1269 = vrot.lane.b32.xlu2 %v3732_v6, %s3050_s26  ;;  %v3755_v27 = vsel %vm3263_vm11, %v1117_v5, %v3736_v10 }
 0x114   : > { %1414 = vrot.lane.b32.xlu0 %v3507_v23, %s3048_s19  ;;  %v1369_v1 = vpop.permute.xlu1 %1368 }
 0x115   : > { %v1467_v55 = vsel %vm1465_vm14, %v1369_v1, %v1466_v13  ;;  %v3748_v30 = vpop.permute.xlu2 %1227  ;;  %v1101_v13 = vor.u32 %v1100_v2, %v3661_v14  ;;  %v1319_v1 = vld [vmem:[#allocation2 + $0x4] sm:$0x8]  ;;  %v461_v2 = vadd.f32 %v3204_v16, %v3585_v38  ;;  %vm1898_vm14 = vcmask 221376  }
 0x116   : > { %1468 = vst [vmem:[#allocation2] sm:$0xf] %v1467_v55  ;;  %v1504_v9 = vpop.permute.xlu0 %1503 }
 0x117   : > { %1600 = vst.msk [vmem:[#allocation2] sm:$0xf] %vm1599_vm15, %v1504_v9  ;;  %v3758_v35 = vpop.f32.mrf.mxu0  ;;  %v1102_v7 = vrot.slane %v1101_v13, 4  ;;  %v500_v9 = vpop.f32.mrf.mxu3  ;;  %v3790_v38 = vpack.c.bf16 %v461_v2, %v461_v2 }
 0x119   : > { %5138 = vst [vmem:[#allocation43_spill] sm:$0xff] %v3790_v38 }
 0x11a   : > { %1517 = vrot.lane.b32.xlu1 %v3489_v50, %s3049_s20  ;;  %v3777_v50 = vsel %vm3263_vm11, %v1102_v7, %v3539_v26 }
 0x11b   : > { %1382 = vrot.lane.b32.xlu2 %v3550_v42, %s3048_s19  ;;  %5137 = vst [vmem:[#allocation42_spill] sm:$0xff] %v3777_v50 }
 0x11c   : > { %993 = vrot.lane.b32.xlu0 %v3474_v24, %s3047_s18  ;;  %v1506_v5 = vpop.permute.xlu1 %1505 }
 0x11d   : > { %v3767_v55 = vpop.permute.xlu2 %1406 }
 0x11e   : > { %5136 = vst [vmem:[#allocation41_spill] sm:$0xff] %v3767_v55  ;;  %v1224_v34 = vpop.permute.xlu0 %1223 }
 0x11f   : > { %v1320_v6 = vsel %vm1318_vm4, %v1224_v34, %v1319_v1  ;;  %v475_v23 = vpop.f32.mrf.mxu0  ;;  %v501_v34 = vadd.f32 %v3204_v16, %v500_v9  ;;  %v503_v9 = vpop.f32.mrf.mxu3 }
 0x120   : > { %1321 = vst [vmem:[#allocation2 + $0x4] sm:$0x8] %v1320_v6  ;;  %v476_v14 = vadd.f32 %v3204_v16, %v475_v23  ;;  %v504_v2 = vadd.f32 %v3204_v16, %v503_v9  ;;  %v5141_v9 = vshrl.u32 %v3623_v36, 16 }
 0x121   : > { %1470 = vst.msk [vmem:[#allocation2 + $0x4] sm:$0xf] %vm1464_vm13, %v3645_v22  ;;  %v464_v22 = vadd.f32 %v3204_v16, %v3597_v49  ;;  %v3800_v7 = vpack.c.bf16 %v501_v34, %v501_v34  ;;  %v680_v49 = vshrl.u32 %v3790_v38, 16 }
 0x122   : > { %1601 = vst.msk [vmem:[#allocation2 + $0x4] sm:$0xf] %vm1599_vm15, %v1506_v5  ;;  %v3780_v13 = vpack.c.bf16 %v476_v14, %v476_v14  ;;  %1237 = vrot.lane.b32.xlu1 %v3777_v50, %s3050_s26  ;;  %v3818_v34 = vpack.c.bf16 %v504_v2, %v504_v2 }
 0x123   : > { %961 = vrot.lane.b32.xlu2 %v3499_v15, %s3047_s18 }
 0x124   : > { %v5049_v23 = vshrl.u32 %v3780_v13, 16  ;;  %1271 = vrot.lane.b32.xlu0 %v3534_v61, %s3050_s26  ;;  %v1226_v26 = vpop.permute.xlu1 %1225  ;;  %v3804_v61 = vpack.c.bf16 %v464_v22, %v464_v22  ;;  %v3822_v22 = vrot.slane %v5141_v9, 4  ;;  %v5058_v55 = vshrl.u32 %v3818_v34, 16 }
 0x125   : > { %1323 = vst.msk [vmem:[#allocation2 + $0x8] sm:$0xf] %vm1322_vm5, %v1226_v26  ;;  %v986_v6 = vpop.permute.xlu2 %985  ;;  %v5140_v26 = vshrl.u32 %v3671_v40, 16  ;;  %v822_v9 = vrot.slane %v3655_v51, 4 }
 0x126   : > { %1056 = vst.msk [vmem:[#allocation2 + $0x58] sm:$0xf] %vm1035_vm12, %v986_v6  ;;  %v3798_v5 = vrot.slane %v5049_v23, 7  ;;  %v982_v1 = vpop.permute.xlu0 %981  ;;  %v5059_v56 = vshrl.u32 %v3804_v61, 16  ;;  %v5143_v23 = vshll.u32 %v3800_v7, 16  ;;  %v3864_v51 = vrot.slane %v5058_v55, 7 }
 0x127   : > { %5139 = vst [vmem:[#allocation44_spill] sm:$0xff] %v3804_v61  ;;  %v3809_v42 = vrot.slane %v5140_v26, 4  ;;  %v682_v26 = vrot.slane %v680_v49, 7 }
 0x128   : > { %v741_v14 = vrot.slane %v3798_v5, 4 }
 0x12a   : > { %v3814_v6 = vsel %vm3236_vm8, %v741_v14, %v3242_v46  ;;  %1416 = vrot.lane.b32.xlu1 %v3520_v57, %s3048_s19  ;;  %v683_v46 = vshll.u32 %v3790_v38, 16  ;;  %v5142_v57 = vshrl.u32 %v3800_v7, 16  ;;  %v678_v14 = vrot.slane %v3716_v25, 4 }
 0x12b   : > { %903 = vst.msk [vmem:[#allocation2 + $0x50] sm:$0xf] %vm879_vm3, %v3814_v6  ;;  %1519 = vrot.lane.b32.xlu2 %v3499_v15, %s3049_s20 }
 0x12c   : > { %1054 = vst.msk [vmem:[#allocation2 + $0x50] sm:$0xf] %vm1035_vm12, %v982_v1  ;;  %1384 = vrot.lane.b32.xlu0 %v3566_v43, %s3048_s19  ;;  %v984_v2 = vpop.permute.xlu1 %983  ;;  %v826_v15 = vrot.slane %v5142_v57, 7  ;;  %v685_v1 = vor.u32 %v683_v46, %v682_v26  ;;  %v3860_v25 = vrot.slane %v683_v46, 5  ;;  %v1125_v46 = vrot.slane %v680_v49, 4 }
 0x12d   : > { %1055 = vst.msk [vmem:[#allocation2 + $0x54] sm:$0xf] %vm1035_vm12, %v984_v2  ;;  %v1264_v50 = vpop.permute.xlu2 %1263  ;;  %v5060_v2 = vshll.u32 %v3818_v34, 16  ;;  %v5146_v49 = vor.u32 %v3627_v18, %v3514_v31 }
 0x12e   : > { %1342 = vst.msk [vmem:[#allocation2 + $0x54] sm:$0xf] %vm1322_vm5, %v1264_v50  ;;  %v948_v43 = vpop.permute.xlu0 %947  ;;  %v829_v8 = vor.u32 %v5143_v23, %v826_v15  ;;  %v3851_v57 = vsel %vm3236_vm8, %v678_v14, %v685_v1  ;;  %v692_v23 = vshll.u32 %v3804_v61, 16  ;;  %v687_v14 = vrot.slane %v682_v26, 4 }
 0x12f   : > { %1037 = vst.msk [vmem:[#allocation2 + $0xc] sm:$0xf] %vm1035_vm12, %v948_v43  ;;  %v3870_v43 = vrot.slane %v5059_v56, 7  ;;  %v1126_v55 = vor.u32 %v1125_v46, %v3860_v25 }
 0x130   : > { %5144 = vst [vmem:[#allocation45_spill] sm:$0xff] %v3851_v57  ;;  %v3858_v50 = vsel %vm3236_vm8, %v822_v9, %v829_v8  ;;  %v831_v8 = vrot.slane %v826_v15, 4  ;;  %v3886_v56 = vrot.slane %v692_v23, 5 }
 0x131   : > { %1324 = vst.msk [vmem:[#allocation2 + $0xc] sm:$0xf] %vm1322_vm5, %v3748_v30  ;;  %v838_v30 = vor.u32 %v5060_v2, %v3864_v51  ;;  %v694_v9 = vor.u32 %v692_v23, %v3870_v43  ;;  %v1192_v2 = vrot.slane %v5146_v49, 4  ;;  %v1127_v17 = vrot.slane %v1126_v55, 4 }
 0x132   : > { %5145 = vst [vmem:[#allocation46_spill] sm:$0xff] %v3858_v50  ;;  %995 = vrot.lane.b32.xlu1 %v3612_v12, %s3047_s18  ;;  %v5148_v55 = vor.u32 %v3680_v48, %v3560_v33 }
 0x133   : > { %912 = vst.msk [vmem:[#allocation2 + $0x74] sm:$0xf] %vm879_vm3, %v3858_v50  ;;  %1239 = vrot.lane.b32.xlu2 %v3581_v52, %s3050_s26  ;;  %v3895_v52 = vsel %vm3236_vm8, %v831_v8, %v838_v30  ;;  %v3900_v23 = vsel %vm3236_vm8, %v687_v14, %v694_v9  ;;  %v3907_v31 = vsel %vm3263_vm11, %v1127_v17, %v3886_v56  ;;  %v505_v8 = vpop.f32.mrf.mxu3 }
 0x134   : > { %896 = vst.msk [vmem:[#allocation2 + $0x34] sm:$0xf] %vm879_vm3, %v3851_v57  ;;  %963 = vrot.lane.b32.xlu0 %v3650_v0, %s3047_s18  ;;  %v950_v1 = vpop.permute.xlu1 %949  ;;  %v3912_v18 = vsel %vm3263_vm11, %v1192_v2, %v3647_v58  ;;  %v1112_v2 = vrot.slane %v5148_v55, 4  ;;  %v506_v30 = vadd.f32 %v3204_v16, %v505_v8 }
 0x135   : > { %1038 = vst.msk [vmem:[#allocation2 + $0x10] sm:$0xf] %vm1035_vm12, %v950_v1  ;;  %v954_v15 = vpop.permute.xlu2 %953 }
 0x136   : > { %1040 = vst.msk [vmem:[#allocation2 + $0x18] sm:$0xf] %vm1035_vm12, %v954_v15  ;;  %v1373_v26 = vpop.permute.xlu0 %1372  ;;  %v3936_v46 = vsel %vm3263_vm11, %v1112_v2, %v3709_v53  ;;  %v3941_v48 = vpack.c.bf16 %v506_v30, %v506_v30  ;;  %v466_v53 = vadd.f32 %v3204_v16, %v3616_v41  ;;  %v469_v15 = vadd.f32 %v3204_v16, %v3657_v11 }
 0x137   : > { %5147 = vst [vmem:[#allocation47_spill] sm:$0xff] %v3895_v52  ;;  %v840_v16 = vrot.slane %v3864_v51, 4  ;;  %v5149_v30 = vshrl.u32 %v3804_v61, 16 }
 0x138   : > { %1471 = vst.msk [vmem:[#allocation2 + $0x8] sm:$0xf] %vm1464_vm13, %v1373_v26  ;;  %v5065_v1 = vshrl.u32 %v3941_v48, 16  ;;  %v5066_v49 = vshll.u32 %v3941_v48, 16  ;;  %v3972_v2 = vpack.c.bf16 %v469_v15, %v469_v15 }
 0x139   : > { %1602 = vst.msk [vmem:[#allocation2 + $0x8] sm:$0xf] %vm1599_vm15, %v3705_v21 }
 0x13a   : > { %913 = vst.msk [vmem:[#allocation2 + $0x78] sm:$0xf] %vm879_vm3, %v3895_v52  ;;  %1273 = vrot.lane.b32.xlu1 %v3912_v18, %s3050_s26  ;;  %v3958_v26 = vrot.slane %v5065_v1, 7  ;;  %v710_v1 = vshll.u32 %v3972_v2, 16 }
 0x13b   : > { %897 = vst.msk [vmem:[#allocation2 + $0x38] sm:$0xf] %vm879_vm3, %v3900_v23  ;;  %1418 = vrot.lane.b32.xlu2 %v3665_v63, %s3048_s19 }
 0x13c   : > { %1521 = vrot.lane.b32.xlu0 %v3650_v0, %s3049_s20  ;;  %v1262_v17 = vpop.permute.xlu1 %1261  ;;  %v847_v11 = vor.u32 %v5066_v49, %v3958_v26 }
 0x13d   : > { %1341 = vst.msk [vmem:[#allocation2 + $0x50] sm:$0xf] %vm1322_vm5, %v1262_v17  ;;  %v1377_v58 = vpop.permute.xlu2 %1376  ;;  %v3962_v17 = vpack.c.bf16 %v466_v53, %v466_v53  ;;  %v5069_v53 = vshrl.u32 %v3972_v2, 16 }
 0x13e   : > { %v1510_v21 = vpop.permute.xlu0 %1509  ;;  %v3977_v8 = vsel %vm3236_vm8, %v840_v16, %v847_v11  ;;  %v696_v16 = vrot.slane %v3870_v43, 4  ;;  %v5151_v43 = vshll.u32 %v3800_v7, 16 }
 0x13f   : > { %914 = vst.msk [vmem:[#allocation2 + $0x7c] sm:$0xf] %vm879_vm3, %v3977_v8  ;;  %v698_v51 = vshrl.u32 %v3962_v17, 16 }
 0x141   : > { %v1135_v49 = vrot.slane %v698_v51, 4 }
 0x142   : > { %1386 = vrot.lane.b32.xlu1 %v3721_v59, %s3048_s19 }
 0x143   : > { %997 = vrot.lane.b32.xlu2 %v3623_v36, %s3047_s18 }
 0x144   : > { %1241 = vrot.lane.b32.xlu0 %v3936_v46, %s3050_s26  ;;  %v952_v14 = vpop.permute.xlu1 %951 }
 0x145   : > { %1039 = vst.msk [vmem:[#allocation2 + $0x14] sm:$0xf] %vm1035_vm12, %v952_v14  ;;  %v956_v33 = vpop.permute.xlu2 %955  ;;  %v3984_v14 = vrot.slane %v5149_v30, 4 }
 0x146   : > { %1041 = vst.msk [vmem:[#allocation2 + $0x1c] sm:$0xf] %vm1035_vm12, %v956_v33  ;;  %v1230_v9 = vpop.permute.xlu0 %1229  ;;  %v701_v33 = vshll.u32 %v3962_v17, 16 }
 0x147   : > { %1325 = vst.msk [vmem:[#allocation2 + $0x10] sm:$0xf] %vm1322_vm5, %v1230_v9  ;;  %v4003_v9 = vrot.slane %v5069_v53, 7 }
 0x148   : > { %1473 = vst.msk [vmem:[#allocation2 + $0x10] sm:$0xf] %vm1464_vm13, %v1377_v58 }
 0x149   : > { %v712_v53 = vor.u32 %v710_v1, %v4003_v9 }
 0x14a   : > { %965 = vrot.lane.b32.xlu1 %v3671_v40, %s3047_s18 }
 0x14b   : > { %1275 = vrot.lane.b32.xlu2 %v3701_v3, %s3050_s26 }
 0x14c   : > { %1420 = vrot.lane.b32.xlu0 %v3691_v20, %s3048_s19  ;;  %v1375_v41 = vpop.permute.xlu1 %1374 }
 0x14d   : > { %1472 = vst.msk [vmem:[#allocation2 + $0xc] sm:$0xf] %vm1464_vm13, %v1375_v41  ;;  %v3965_v58 = vpop.permute.xlu2 %1513 }
 0x14e   : > { %1603 = vst.msk [vmem:[#allocation2 + $0xc] sm:$0xf] %vm1599_vm15, %v1510_v21  ;;  %v1409_v55 = vpop.permute.xlu0 %1408  ;;  %v700_v21 = vrot.slane %v698_v51, 7 }
 0x14f   : > { %1489 = vst.msk [vmem:[#allocation2 + $0x50] sm:$0xf] %vm1464_vm13, %v1409_v55  ;;  %v3998_v55 = vrot.slane %v701_v33, 5 }
 0x150   : > { %v703_v11 = vor.u32 %v701_v33, %v700_v21  ;;  %v1203_v33 = vrot.slane %v5151_v43, 5 }
 0x151   : > { %v1136_v51 = vor.u32 %v1135_v49, %v3998_v55 }
 0x152   : > { %1523 = vrot.lane.b32.xlu1 %v3671_v40, %s3049_s20 }
 0x153   : > { %1388 = vrot.lane.b32.xlu2 %v3742_v54, %s3048_s19  ;;  %v705_v54 = vrot.slane %v700_v21, 4 }
 0x154   : > { %999 = vrot.lane.b32.xlu0 %v3800_v7, %s3047_s18  ;;  %v1512_v15 = vpop.permute.xlu1 %1511 }
 0x155   : > { %1604 = vst.msk [vmem:[#allocation2 + $0x10] sm:$0xf] %vm1599_vm15, %v1512_v15  ;;  %v1234_v41 = vpop.permute.xlu2 %1233  ;;  %v5150_v15 = vor.u32 %v3822_v22, %v3673_v39  ;;  %v4026_v39 = vsel %vm3236_vm8, %v705_v54, %v712_v53  ;;  %v1137_v22 = vrot.slane %v1136_v51, 4 }
 0x156   : > { %1327 = vst.msk [vmem:[#allocation2 + $0x18] sm:$0xf] %vm1322_vm5, %v1234_v41  ;;  %v988_v30 = vpop.permute.xlu0 %987  ;;  %v4014_v41 = vsel %vm3236_vm8, %v696_v16, %v703_v11  ;;  %v508_v16 = vpop.f32.mrf.mxu3 }
 0x157   : > { %1057 = vst.msk [vmem:[#allocation2 + $0x5c] sm:$0xf] %vm1035_vm12, %v988_v30  ;;  %v1202_v40 = vrot.slane %v5150_v15, 4  ;;  %v4020_v30 = vrot.slane %v710_v1, 5 }
 0x158   : > { %898 = vst.msk [vmem:[#allocation2 + $0x3c] sm:$0xf] %vm879_vm3, %v4014_v41 }
 0x159   : > { %5152 = vst [vmem:[#allocation48_spill] sm:$0xff] %v4026_v39  ;;  %v4032_v21 = vsel %vm3263_vm11, %v1202_v40, %v1203_v33  ;;  %v4041_v54 = vsel %vm3263_vm11, %v1137_v22, %v4020_v30  ;;  %v2981_v40 = vld [vmem:[%s5004_s2] ss:$0 sm:$0xff]  ;;  %v5154_v22 = vshrl.u32 %v3800_v7, 16 }
 0x15a   : > { %1243 = vrot.lane.b32.xlu1 %v3755_v27, %s3050_s26  ;;  %5153 = vst [vmem:[#allocation49_spill] sm:$0xff] %v4032_v21  ;;  %v509_v11 = vadd.f32 %v2981_v40, %v508_v16 }
 0x15b   : > { %967 = vrot.lane.b32.xlu2 %v3790_v38, %s3047_s18  ;;  %899 = vst.msk [vmem:[#allocation2 + $0x40] sm:$0xf] %vm879_vm3, %v4026_v39 }
 0x15c   : > { %1277 = vrot.lane.b32.xlu0 %v4032_v21, %s3050_s26  ;;  %v1232_v1 = vpop.permute.xlu1 %1231  ;;  %v4056_v43 = vpack.c.bf16 %v509_v11, %v509_v11  ;;  %v714_v21 = vrot.slane %v4003_v9, 4 }
 0x15d   : > { %1326 = vst.msk [vmem:[#allocation2 + $0x14] sm:$0xf] %vm1322_vm5, %v1232_v1  ;;  %v1413_v49 = vpop.permute.xlu2 %1412  ;;  %v1205_v1 = vrot.slane %v5154_v22, 4 }
 0x15e   : > { %v1266_v53 = vpop.permute.xlu0 %1265 }
 0x15f   : > { %1343 = vst.msk [vmem:[#allocation2 + $0x58] sm:$0xf] %vm1322_vm5, %v1266_v53  ;;  %v5155_v53 = vor.u32 %v3809_v42, %v3736_v10  ;;  %v1206_v11 = vor.u32 %v1205_v1, %v1203_v33  ;;  %v510_v10 = vpop.f32.mrf.mxu3  ;;  %v5156_v1 = vshll.u32 %v3818_v34, 16 }
 0x160   : > { %1491 = vst.msk [vmem:[#allocation2 + $0x58] sm:$0xf] %vm1464_vm13, %v1413_v49 }
 0x161   : > { %v1122_v16 = vrot.slane %v5155_v53, 4  ;;  %v1207_v22 = vrot.slane %v1206_v11, 4  ;;  %v511_v53 = vadd.f32 %v2981_v40, %v510_v10 }
 0x162   : > { %1422 = vrot.lane.b32.xlu1 %v3858_v50, %s3048_s19 }
 0x163   : > { %1525 = vrot.lane.b32.xlu2 %v3790_v38, %s3049_s20  ;;  %v471_v38 = vadd.f32 %v2981_v40, %v3712_v29  ;;  %v4075_v42 = vsel %vm3263_vm11, %v1122_v16, %v3860_v25  ;;  %v474_v29 = vadd.f32 %v2981_v40, %v3758_v35  ;;  %v4102_v11 = vpack.c.bf16 %v511_v53, %v511_v53 }
 0x164   : > { %1390 = vrot.lane.b32.xlu0 %v3851_v57, %s3048_s19  ;;  %v1411_v15 = vpop.permute.xlu1 %1410  ;;  %v5072_v57 = vshll.u32 %v4056_v43, 16 }
 0x165   : > { %1490 = vst.msk [vmem:[#allocation2 + $0x54] sm:$0xf] %vm1464_vm13, %v1411_v15  ;;  %v992_v51 = vpop.permute.xlu2 %991  ;;  %v5073_v15 = vshrl.u32 %v4056_v43, 16  ;;  %v4096_v35 = vpack.c.bf16 %v474_v29, %v474_v29  ;;  %v5160_v50 = vshll.u32 %v4102_v11, 16 }
 0x166   : > { %1059 = vst.msk [vmem:[#allocation2 + $0x64] sm:$0xf] %vm1035_vm12, %v992_v51  ;;  %v1379_v49 = vpop.permute.xlu0 %1378 }
 0x167   : > { %1474 = vst.msk [vmem:[#allocation2 + $0x14] sm:$0xf] %vm1464_vm13, %v1379_v49  ;;  %v1632_v33 = vrot.slane %v5073_v15, 4  ;;  %v1208_v49 = vrot.slane %v5156_v1, 5  ;;  %v5083_v1 = vshrl.u32 %v4096_v35, 16 }
 0x168   : > { %1605 = vst.msk [vmem:[#allocation2 + $0x14] sm:$0xf] %vm1599_vm15, %v3965_v58  ;;  %v4081_v58 = vrot.slane %v5072_v57, 5  ;;  %v4092_v57 = vpack.c.bf16 %v471_v38, %v471_v38  ;;  %v5158_v38 = vshrl.u32 %v3972_v2, 16 }
 0x16a   : > { %1001 = vrot.lane.b32.xlu1 %v3818_v34, %s3047_s18  ;;  %v1633_v16 = vor.u32 %v1632_v33, %v4081_v58  ;;  %v5078_v40 = vshrl.u32 %v4092_v57, 16  ;;  %v4109_v10 = vrot.slane %v5158_v38, 4 }
 0x16b   : > { %1245 = vrot.lane.b32.xlu2 %v4075_v42, %s3050_s26 }
 0x16c   : > { %969 = vrot.lane.b32.xlu0 %v3804_v61, %s3047_s18  ;;  %v990_v51 = vpop.permute.xlu1 %989  ;;  %v718_v29 = vrot.slane %v5078_v40, 7 }
 0x16d   : > { %1058 = vst.msk [vmem:[#allocation2 + $0x60] sm:$0xf] %vm1035_vm12, %v990_v51  ;;  %v1270_v25 = vpop.permute.xlu2 %1269  ;;  %v4100_v51 = vsel %vm3263_vm11, %v1207_v22, %v1208_v49  ;;  %v5085_v22 = vshll.u32 %v4096_v35, 16 }
 0x16e   : > { %1345 = vst.msk [vmem:[#allocation2 + $0x60] sm:$0xf] %vm1322_vm5, %v1270_v25  ;;  %v958_v15 = vpop.permute.xlu0 %957  ;;  %v5084_v25 = vshll.u32 %v4092_v57, 16 }
 0x16f   : > { %1042 = vst.msk [vmem:[#allocation2 + $0x20] sm:$0xf] %vm1035_vm12, %v958_v15  ;;  %v5159_v15 = vshrl.u32 %v3818_v34, 16 }
 0x170   : > { %5157 = vst [vmem:[#allocation50_spill] sm:$0xff] %v4100_v51  ;;  %v721_v40 = vor.u32 %v5084_v25, %v718_v29  ;;  %v1634_v25 = vrot.slane %v1633_v16, 4 }
 0x172   : > { %1279 = vrot.lane.b32.xlu1 %v4100_v51, %s3050_s26  ;;  %v727_v51 = vrot.slane %v5083_v1, 7  ;;  %v4138_v20 = vsel %vm3236_vm8, %v714_v21, %v721_v40 }
 0x173   : > { %1424 = vrot.lane.b32.xlu2 %v3895_v52, %s3048_s19  ;;  %v1210_v52 = vrot.slane %v5159_v15, 4  ;;  %v723_v15 = vrot.slane %v718_v29, 4  ;;  %900 = vst.msk [vmem:[#allocation2 + $0x44] sm:$0xf] %vm879_vm3, %v4138_v20 }
 0x174   : > { %1527 = vrot.lane.b32.xlu0 %v3804_v61, %s3049_s20  ;;  %v1268_v33 = vpop.permute.xlu1 %1267  ;;  %v5086_v61 = vshrl.u32 %v4102_v11, 16  ;;  %v730_v1 = vor.u32 %v5085_v22, %v727_v51 }
 0x175   : > { %1344 = vst.msk [vmem:[#allocation2 + $0x5c] sm:$0xf] %vm1322_vm5, %v1268_v33  ;;  %v1383_v53 = vpop.permute.xlu2 %1382  ;;  %v4134_v33 = vrot.slane %v5160_v50, 5  ;;  %v1211_v50 = vor.u32 %v1210_v52, %v1208_v49 }
 0x176   : > { %v1516_v38 = vpop.permute.xlu0 %1515  ;;  %v4142_v9 = vrot.slane %v5086_v61, 4  ;;  %v4156_v40 = vsel %vm3236_vm8, %v723_v15, %v730_v1  ;;  %v5161_v15 = vshll.u32 %v3941_v48, 16 }
 0x177   : > { %v4161_v29 = vsel %vm3263_vm11, %v1634_v25, %v4134_v33  ;;  %901 = vst.msk [vmem:[#allocation2 + $0x48] sm:$0xf] %vm879_vm3, %v4156_v40  ;;  %v1212_v1 = vrot.slane %v1211_v50, 4  ;;  %v5162_v25 = vshrl.u32 %v3941_v48, 16 }
 0x178   : > { %v1213_v21 = vrot.slane %v5161_v15, 5  ;;  %v732_v15 = vrot.slane %v727_v51, 4 }
 0x179   : > { %v1215_v22 = vrot.slane %v5162_v25, 4 }
 0x17a   : > { %1392 = vrot.lane.b32.xlu1 %v3900_v23, %s3048_s19 }
 0x17b   : > { %1003 = vrot.lane.b32.xlu2 %v3941_v48, %s3047_s18  ;;  %v1216_v50 = vor.u32 %v1215_v22, %v1213_v21 }
 0x17c   : > { %1247 = vrot.lane.b32.xlu0 %v3907_v31, %s3050_s26  ;;  %v1381_v16 = vpop.permute.xlu1 %1380 }
 0x17d   : > { %1475 = vst.msk [vmem:[#allocation2 + $0x18] sm:$0xf] %vm1464_vm13, %v1381_v16  ;;  %v962_v52 = vpop.permute.xlu2 %961 }
 0x17e   : > { %1606 = vst.msk [vmem:[#allocation2 + $0x18] sm:$0xf] %vm1599_vm15, %v1516_v38  ;;  %v1236_v49 = vpop.permute.xlu0 %1235  ;;  %v4180_v38 = vsel %vm3263_vm11, %v1212_v1, %v1213_v21  ;;  %v1217_v1 = vrot.slane %v1216_v50, 4  ;;  %v5163_v21 = vor.u32 %v3984_v14, %v3886_v56 }
 0x17f   : > { %1044 = vst.msk [vmem:[#allocation2 + $0x28] sm:$0xf] %vm1035_vm12, %v962_v52  ;;  %v737_v52 = vshll.u32 %v3780_v13, 16 }
 0x180   : > { %1328 = vst.msk [vmem:[#allocation2 + $0x1c] sm:$0xf] %vm1322_vm5, %v1236_v49  ;;  %v1132_v50 = vrot.slane %v5163_v21, 4 }
 0x181   : > { %1476 = vst.msk [vmem:[#allocation2 + $0x1c] sm:$0xf] %vm1464_vm13, %v1383_v53  ;;  %v739_v25 = vor.u32 %v737_v52, %v3798_v5  ;;  %v4203_v5 = vsel %vm3263_vm11, %v1217_v1, %v4081_v58 }
 0x182   : > { %971 = vrot.lane.b32.xlu1 %v3962_v17, %s3047_s18  ;;  %v4216_v58 = vsel %vm3263_vm11, %v1132_v50, %v3998_v55  ;;  %v5165_v55 = vshll.u32 %v4056_v43, 16 }
 0x183   : > { %1281 = vrot.lane.b32.xlu2 %v4180_v38, %s3050_s26  ;;  %v4192_v61 = vsel %vm3236_vm8, %v732_v15, %v739_v25  ;;  %v1353_v25 = vrot.slane %v3958_v26, 4 }
 0x184   : > { %1426 = vrot.lane.b32.xlu0 %v3977_v8, %s3048_s19  ;;  %v960_v16 = vpop.permute.xlu1 %959  ;;  %902 = vst.msk [vmem:[#allocation2 + $0x4c] sm:$0xf] %vm879_vm3, %v4192_v61  ;;  %vm1736_vm3 = vcmask 191648  }
 0x185   : > { %1043 = vst.msk [vmem:[#allocation2 + $0x24] sm:$0xf] %vm1035_vm12, %v960_v16  ;;  %v1520_v53 = vpop.permute.xlu2 %1519 }
 0x186   : > { %v1415_v49 = vpop.permute.xlu0 %1414 }
 0x187   : > { %1492 = vst.msk [vmem:[#allocation2 + $0x5c] sm:$0xf] %vm1464_vm13, %v1415_v49  ;;  %v5164_v49 = vshrl.u32 %v4056_v43, 16 }
 0x189   : > { %v1356_v15 = vrot.slane %v5164_v49, 7 }
 0x18a   : > { %1529 = vrot.lane.b32.xlu1 %v3962_v17, %s3049_s20 }
 0x18b   : > { %1394 = vrot.lane.b32.xlu2 %v4014_v41, %s3048_s19  ;;  %v1357_v1 = vor.u32 %v1356_v15, %v5165_v55 }
 0x18c   : > { %1283 = vrot.lane.b32.xlu0 %v4203_v5, %s3050_s26  ;;  %v1518_v51 = vpop.permute.xlu1 %1517 }
 0x18d   : > { %1607 = vst.msk [vmem:[#allocation2 + $0x1c] sm:$0xf] %vm1599_vm15, %v1518_v51  ;;  %v1240_v22 = vpop.permute.xlu2 %1239 }
 0x18e   : > { %1330 = vst.msk [vmem:[#allocation2 + $0x24] sm:$0xf] %vm1322_vm5, %v1240_v22  ;;  %v994_v16 = vpop.permute.xlu0 %993  ;;  %v4234_v22 = vsel %vm3236_vm8, %v1353_v25, %v1357_v1  ;;  %v5168_v25 = vshrl.u32 %v4102_v11, 16 }
 0x18f   : > { %1060 = vst.msk [vmem:[#allocation2 + $0x68] sm:$0xf] %vm1035_vm12, %v994_v16  ;;  %v5166_v16 = vor.u32 %v4109_v10, %v4020_v30 }
 0x190   : > { %v4255_v55 = vrot.slane %v5168_v25, 7 }
 0x191   : > { %v1142_v49 = vrot.slane %v5166_v16, 4 }
 0x192   : > { %1249 = vrot.lane.b32.xlu1 %v4216_v58, %s3050_s26 }
 0x193   : > { %973 = vrot.lane.b32.xlu2 %v3972_v2, %s3047_s18 }
 0x194   : > { %1396 = vrot.lane.b32.xlu0 %v4026_v39, %s3048_s19  ;;  %v1238_v56 = vpop.permute.xlu1 %1237 }
 0x195   : > { %1329 = vst.msk [vmem:[#allocation2 + $0x20] sm:$0xf] %vm1322_vm5, %v1238_v56  ;;  %v1419_v14 = vpop.permute.xlu2 %1418  ;;  %v5167_v56 = vshll.u32 %v4092_v57, 16 }
 0x196   : > { %v1272_v51 = vpop.permute.xlu0 %1271 }
 0x197   : > { %1346 = vst.msk [vmem:[#allocation2 + $0x64] sm:$0xf] %vm1322_vm5, %v1272_v51 }
 0x198   : > { %1494 = vst.msk [vmem:[#allocation2 + $0x64] sm:$0xf] %vm1464_vm13, %v1419_v14  ;;  %v1143_v14 = vrot.slane %v5167_v56, 5  ;;  %v5171_v56 = vshrl.u32 %v3780_v13, 16 }
 0x19a   : > { %1428 = vrot.lane.b32.xlu1 %v4234_v22, %s3048_s19  ;;  %v4261_v1 = vsel %vm3263_vm11, %v1142_v49, %v1143_v14  ;;  %v1153_v49 = vrot.slane %v737_v52, 5  ;;  %v1155_v25 = vrot.slane %v5171_v56, 4 }
 0x19b   : > { %1531 = vrot.lane.b32.xlu2 %v3972_v2, %s3049_s20 }
 0x19c   : > { %975 = vrot.lane.b32.xlu0 %v4092_v57, %s3047_s18  ;;  %v1417_v26 = vpop.permute.xlu1 %1416 }
 0x19d   : > { %1493 = vst.msk [vmem:[#allocation2 + $0x60] sm:$0xf] %vm1464_vm13, %v1417_v26  ;;  %v998_v21 = vpop.permute.xlu2 %997 }
 0x19e   : > { %1062 = vst.msk [vmem:[#allocation2 + $0x70] sm:$0xf] %vm1035_vm12, %v998_v21  ;;  %v1385_v50 = vpop.permute.xlu0 %1384  ;;  %v1359_v21 = vrot.slane %v1356_v15, 4  ;;  %v1156_v15 = vor.u32 %v1155_v25, %v1153_v49  ;;  %v5173_v25 = vshrl.u32 %v4096_v35, 16 }
 0x19f   : > { %1477 = vst.msk [vmem:[#allocation2 + $0x20] sm:$0xf] %vm1464_vm13, %v1385_v50  ;;  %v5170_v50 = vshll.u32 %v4102_v11, 16 }
 0x1a0   : > { %1608 = vst.msk [vmem:[#allocation2 + $0x20] sm:$0xf] %vm1599_vm15, %v1520_v53  ;;  %v5169_v53 = vshrl.u32 %v4092_v57, 16 }
 0x1a1   : > { %v1366_v16 = vor.u32 %v5170_v50, %v4255_v55  ;;  %v1157_v50 = vrot.slane %v1156_v15, 4  ;;  %v1150_v15 = vrot.slane %v5173_v25, 4 }
 0x1a2   : > { %1398 = vrot.lane.b32.xlu1 %v4138_v20, %s3048_s19  ;;  %v1145_v51 = vrot.slane %v5169_v53, 4 }
 0x1a3   : > { %1251 = vrot.lane.b32.xlu2 %v4041_v54, %s3050_s26 }
 0x1a4   : > { %1253 = vrot.lane.b32.xlu0 %v4261_v1, %s3050_s26  ;;  %v996_v30 = vpop.permute.xlu1 %995  ;;  %v1146_v39 = vor.u32 %v1145_v51, %v1143_v14  ;;  %v5172_v14 = vshll.u32 %v4096_v35, 16 }
 0x1a5   : > { %1061 = vst.msk [vmem:[#allocation2 + $0x6c] sm:$0xf] %vm1035_vm12, %v996_v30  ;;  %v1276_v10 = vpop.permute.xlu2 %1275  ;;  %v4279_v30 = vsel %vm3236_vm8, %v1359_v21, %v1366_v16  ;;  %v4299_v21 = vsel %vm3263_vm11, %v1157_v50, %v3348_v45  ;;  %vm2114_vm8 = vcmask 290048  }
 0x1a6   : > { %1348 = vst.msk [vmem:[#allocation2 + $0x6c] sm:$0xf] %vm1322_vm5, %v1276_v10  ;;  %v964_v26 = vpop.permute.xlu0 %963  ;;  %v1147_v53 = vrot.slane %v1146_v39, 4  ;;  %v1148_v51 = vrot.slane %v5172_v14, 5 }
 0x1a7   : > { %1045 = vst.msk [vmem:[#allocation2 + $0x2c] sm:$0xf] %vm1035_vm12, %v964_v26 }
 0x1a8   : > { %v4290_v44 = vsel %vm3263_vm11, %v1147_v53, %v1148_v51  ;;  %v1151_v45 = vor.u32 %v1150_v15, %v1148_v51 }
 0x1aa   : > { %977 = vrot.lane.b32.xlu1 %v4096_v35, %s3047_s18 }
 0x1ab   : > { %1430 = vrot.lane.b32.xlu2 %v4279_v30, %s3048_s19 }
 0x1ac   : > { %1402 = vrot.lane.b32.xlu0 %v4192_v61, %s3048_s19  ;;  %v1274_v10 = vpop.permute.xlu1 %1273 }
 0x1ad   : > { %1347 = vst.msk [vmem:[#allocation2 + $0x68] sm:$0xf] %vm1322_vm5, %v1274_v10  ;;  %v1389_v52 = vpop.permute.xlu2 %1388 }
 0x1ae   : > { %v1522_v26 = vpop.permute.xlu0 %1521 }
 0x1b2   : > { %1255 = vrot.lane.b32.xlu1 %v4290_v44, %s3050_s26 }
 0x1b3   : > { %1400 = vrot.lane.b32.xlu2 %v4156_v40, %s3048_s19 }
 0x1b4   : > { %1259 = vrot.lane.b32.xlu0 %v4299_v21, %s3050_s26  ;;  %v1387_v39 = vpop.permute.xlu1 %1386 }
 0x1b5   : > { %1478 = vst.msk [vmem:[#allocation2 + $0x24] sm:$0xf] %vm1464_vm13, %v1387_v39  ;;  %v968_v16 = vpop.permute.xlu2 %967 }
 0x1b6   : > { %1609 = vst.msk [vmem:[#allocation2 + $0x24] sm:$0xf] %vm1599_vm15, %v1522_v26  ;;  %v1242_v56 = vpop.permute.xlu0 %1241  ;;  %v1152_v26 = vrot.slane %v1151_v45, 4 }
 0x1b7   : > { %1047 = vst.msk [vmem:[#allocation2 + $0x34] sm:$0xf] %vm1035_vm12, %v968_v16 }
 0x1b8   : > { %1331 = vst.msk [vmem:[#allocation2 + $0x28] sm:$0xf] %vm1322_vm5, %v1242_v56 }
 0x1b9   : > { %1479 = vst.msk [vmem:[#allocation2 + $0x28] sm:$0xf] %vm1464_vm13, %v1389_v52  ;;  %v4322_v52 = vsel %vm3263_vm11, %v1152_v26, %v1153_v49  ;;  %vm2522_vm11 = vcmask 257024  }
 0x1ba   : > { %1404 = vrot.lane.b32.xlu1 %v3814_v6, %s3048_s19 }
 0x1bb   : > { %979 = vrot.lane.b32.xlu2 %v3780_v13, %s3047_s18 }
 0x1bc   : > { %1533 = vrot.lane.b32.xlu0 %v4092_v57, %s3049_s20  ;;  %v966_v10 = vpop.permute.xlu1 %965 }
 0x1bd   : > { %1046 = vst.msk [vmem:[#allocation2 + $0x30] sm:$0xf] %vm1035_vm12, %v966_v10  ;;  %v1526_v53 = vpop.permute.xlu2 %1525 }
 0x1be   : > { %v1421_v14 = vpop.permute.xlu0 %1420 }
 0x1bf   : > { %1495 = vst.msk [vmem:[#allocation2 + $0x68] sm:$0xf] %vm1464_vm13, %v1421_v14 }
 0x1c2   : > { %1535 = vrot.lane.b32.xlu1 %v4096_v35, %s3049_s20 }
 0x1c3   : > { %1257 = vrot.lane.b32.xlu2 %v4322_v52, %s3050_s26  ;;  %s2767_s26 = sshll.u32 %s3112_s25, 7 }
 0x1c4   : > { %1539 = vrot.lane.b32.xlu0 %v3219_v28, %s3049_s20  ;;  %v1524_v51 = vpop.permute.xlu1 %1523  ;;  %s2567_s13 = scalar_lea.hbm %s5008_s6, %s2767_s26 }
 0x1c5   : > { %1610 = vst.msk [vmem:[#allocation2 + $0x28] sm:$0xf] %vm1599_vm15, %v1524_v51  ;;  %v1246_v50 = vpop.permute.xlu2 %1245  ;;  %s2570_s15 = sshll.u32 %s2567_s13, 4  ;;  %s2571_s15 = int_to_ptr.hbm [resolvable:$true] %s2570_s15 }
 0x1c6   : > { %1333 = vst.msk [vmem:[#allocation2 + $0x30] sm:$0xf] %vm1322_vm5, %v1246_v50  ;;  %v1000_v39 = vpop.permute.xlu0 %999  ;;  %s2996_s16 = sshra.s32 %s2571_s15, 4  ;;  %s2997_s16 = int_to_ptr.hbm [resolvable:$true] %s2996_s16 }
 0x1c7   : > { %1063 = vst.msk [vmem:[#allocation2 + $0x74] sm:$0xf] %vm1035_vm12, %v1000_v39  ;;  %p3003_p0 = scmp.lt.s32.totalorder %s2997_s16, %s5008_s6 }
 0x1ca   : > { %1541 = vrot.lane.b32.xlu1 %v3244_v47, %s3049_s20 }
 0x1cb   : > { %1537 = vrot.lane.b32.xlu2 %v3780_v13, %s3049_s20 }
 0x1cc   : > { %1545 = vrot.lane.b32.xlu0 %v3313_v32, %s3049_s20  ;;  %v1244_v62 = vpop.permute.xlu1 %1243 }
 0x1cd   : > { %1332 = vst.msk [vmem:[#allocation2 + $0x2c] sm:$0xf] %vm1322_vm5, %v1244_v62  ;;  %v1425_v49 = vpop.permute.xlu2 %1424 }
 0x1ce   : > { %v1278_v16 = vpop.permute.xlu0 %1277 }
 0x1cf   : > { %1349 = vst.msk [vmem:[#allocation2 + $0x70] sm:$0xf] %vm1322_vm5, %v1278_v16  ;;  %v5175_v16 = vld [vmem:[#allocation8_spill] sm:$0xff] }
 0x1d0   : > { %1497 = vst.msk [vmem:[#allocation2 + $0x70] sm:$0xf] %vm1464_vm13, %v1425_v49  ;;  %v5174_v49 = vld [vmem:[#allocation23_spill] sm:$0xff] }
 0x1d2   : > { %1547 = vrot.lane.b32.xlu1 %v3360_v60, %s3049_s20 }
 0x1d3   : > { %1543 = vrot.lane.b32.xlu2 %v3272_v4, %s3049_s20 }
 0x1d4   : > { %1551 = vrot.lane.b32.xlu0 %v3474_v24, %s3049_s20  ;;  %v1423_v56 = vpop.permute.xlu1 %1422 }
 0x1d5   : > { %1496 = vst.msk [vmem:[#allocation2 + $0x6c] sm:$0xf] %vm1464_vm13, %v1423_v56  ;;  %v1004_v25 = vpop.permute.xlu2 %1003 }
 0x1d6   : > { %1065 = vst.msk [vmem:[#allocation2 + $0x7c] sm:$0xf] %vm1035_vm12, %v1004_v25  ;;  %v1391_v15 = vpop.permute.xlu0 %1390 }
 0x1d7   : > { %1480 = vst.msk [vmem:[#allocation2 + $0x2c] sm:$0xf] %vm1464_vm13, %v1391_v15 }
 0x1d8   : > { %1611 = vst.msk [vmem:[#allocation2 + $0x2c] sm:$0xf] %vm1599_vm15, %v1526_v53 }
 0x1da   : > { %1553 = vrot.lane.b32.xlu1 %v3612_v12, %s3049_s20 }
 0x1db   : > { %1549 = vrot.lane.b32.xlu2 %v3471_v19, %s3049_s20 }
 0x1dc   : > { %1557 = vrot.lane.b32.xlu0 %v3800_v7, %s3049_s20  ;;  %v1002_v45 = vpop.permute.xlu1 %1001 }
 0x1dd   : > { %1064 = vst.msk [vmem:[#allocation2 + $0x78] sm:$0xf] %vm1035_vm12, %v1002_v45  ;;  %v1282_v10 = vpop.permute.xlu2 %1281  ;;  %v5177_v45 = vld [vmem:[#allocation37_spill] sm:$0xff] }
 0x1de   : > { %1351 = vst.msk [vmem:[#allocation2 + $0x78] sm:$0xf] %vm1322_vm5, %v1282_v10  ;;  %v970_v14 = vpop.permute.xlu0 %969  ;;  %v5178_v10 = vld [vmem:[#allocation30_spill] sm:$0xff] }
 0x1df   : > { %1048 = vst.msk [vmem:[#allocation2 + $0x38] sm:$0xf] %vm1035_vm12, %v970_v14  ;;  %v5179_v14 = vld [vmem:[#allocation33_spill] sm:$0xff] }
 0x1e2   : > { %1559 = vrot.lane.b32.xlu1 %v3818_v34, %s3049_s20 }
 0x1e3   : > { %1555 = vrot.lane.b32.xlu2 %v3623_v36, %s3049_s20 }
 0x1e4   : > { %1563 = vrot.lane.b32.xlu0 %v4056_v43, %s3049_s20  ;;  %v1280_v53 = vpop.permute.xlu1 %1279 }
 0x1e5   : > { %1350 = vst.msk [vmem:[#allocation2 + $0x74] sm:$0xf] %vm1322_vm5, %v1280_v53  ;;  %v1395_v26 = vpop.permute.xlu2 %1394 }
 0x1e6   : > { %v1528_v51 = vpop.permute.xlu0 %1527 }
 0x1ea   : > { %1565 = vrot.lane.b32.xlu1 %v4102_v11, %s3049_s20 }
 0x1eb   : > { %1561 = vrot.lane.b32.xlu2 %v3941_v48, %s3049_s20 }
 0x1ec   : > { %1642 = vrot.lane.b32.xlu0 %v3328_v37, %s3051_s9  ;;  %v1393_v50 = vpop.permute.xlu1 %1392  ;;  %v5176_v37 = vld [vmem:[#allocation34_spill] sm:$0xff] }
 0x1ed   : > { %1481 = vst.msk [vmem:[#allocation2 + $0x30] sm:$0xf] %vm1464_vm13, %v1393_v50  ;;  %v974_v39 = vpop.permute.xlu2 %973  ;;  %v5180_v50 = vld [vmem:[#allocation42_spill] sm:$0xff] }
 0x1ee   : > { %1612 = vst.msk [vmem:[#allocation2 + $0x30] sm:$0xf] %vm1599_vm15, %v1528_v51  ;;  %v1248_v62 = vpop.permute.xlu0 %1247 }
 0x1ef   : > { %1050 = vst.msk [vmem:[#allocation2 + $0x40] sm:$0xf] %vm1035_vm12, %v974_v39 }
 0x1f0   : > { %1334 = vst.msk [vmem:[#allocation2 + $0x34] sm:$0xf] %vm1322_vm5, %v1248_v62 }
 0x1f1   : > { %1482 = vst.msk [vmem:[#allocation2 + $0x34] sm:$0xf] %vm1464_vm13, %v1395_v26 }
 0x1f2   : > { %1644 = vrot.lane.b32.xlu1 %v5174_v49, %s3051_s9 }
 0x1f3   : > { %1640 = vrot.lane.b32.xlu2 %v5175_v16, %s3051_s9 }
 0x1f4   : > { %1648 = vrot.lane.b32.xlu0 %v5176_v37, %s3051_s9  ;;  %v972_v56 = vpop.permute.xlu1 %971 }
 0x1f5   : > { %1049 = vst.msk [vmem:[#allocation2 + $0x3c] sm:$0xf] %vm1035_vm12, %v972_v56  ;;  %v1532_v25 = vpop.permute.xlu2 %1531 }
 0x1f6   : > { %v1427_v15 = vpop.permute.xlu0 %1426 }
 0x1f7   : > { %1498 = vst.msk [vmem:[#allocation2 + $0x74] sm:$0xf] %vm1464_vm13, %v1427_v15 }
 0x1fa   : > { %1650 = vrot.lane.b32.xlu1 %v5177_v45, %s3051_s9 }
 0x1fb   : > { %1646 = vrot.lane.b32.xlu2 %v5178_v10, %s3051_s9 }
 0x1fc   : > { %1654 = vrot.lane.b32.xlu0 %v5179_v14, %s3051_s9  ;;  %v1530_v53 = vpop.permute.xlu1 %1529 }
 0x1fd   : > { %1613 = vst.msk [vmem:[#allocation2 + $0x34] sm:$0xf] %vm1599_vm15, %v1530_v53  ;;  %v1252_v26 = vpop.permute.xlu2 %1251 }
 0x1fe   : > { %1336 = vst.msk [vmem:[#allocation2 + $0x3c] sm:$0xf] %vm1322_vm5, %v1252_v26  ;;  %v1284_v51 = vpop.permute.xlu0 %1283 }
 0x1ff   : > { %1352 = vst.msk [vmem:[#allocation2 + $0x7c] sm:$0xf] %vm1322_vm5, %v1284_v51 }
 0x202   : > { %1656 = vrot.lane.b32.xlu1 %v3936_v46, %s3051_s9 }
 0x203   : > { %1652 = vrot.lane.b32.xlu2 %v5180_v50, %s3051_s9 }
 0x204   : > { %1660 = vrot.lane.b32.xlu0 %v4075_v42, %s3051_s9  ;;  %v1250_v39 = vpop.permute.xlu1 %1249 }
 0x205   : > { %1335 = vst.msk [vmem:[#allocation2 + $0x38] sm:$0xf] %vm1322_vm5, %v1250_v39  ;;  %v1431_v62 = vpop.permute.xlu2 %1430 }
 0x206   : > { %1500 = vst.msk [vmem:[#allocation2 + $0x7c] sm:$0xf] %vm1464_vm13, %v1431_v62  ;;  %v1397_v16 = vpop.permute.xlu0 %1396 }
 0x207   : > { %1483 = vst.msk [vmem:[#allocation2 + $0x38] sm:$0xf] %vm1464_vm13, %v1397_v16 }
 0x208   : > { %1614 = vst.msk [vmem:[#allocation2 + $0x38] sm:$0xf] %vm1599_vm15, %v1532_v25 }
 0x20a   : > { %1662 = vrot.lane.b32.xlu1 %v3907_v31, %s3051_s9 }
 0x20b   : > { %1658 = vrot.lane.b32.xlu2 %v3755_v27, %s3051_s9 }
 0x20c   : > { %1666 = vrot.lane.b32.xlu0 %v4041_v54, %s3051_s9  ;;  %v1429_v56 = vpop.permute.xlu1 %1428 }
 0x20d   : > { %1499 = vst.msk [vmem:[#allocation2 + $0x78] sm:$0xf] %vm1464_vm13, %v1429_v56  ;;  %v1401_v15 = vpop.permute.xlu2 %1400  ;;  %v5181_v56 = vld [vmem:[#allocation7_spill] sm:$0xff] }
 0x20e   : > { %v976_v53 = vpop.permute.xlu0 %975 }
 0x20f   : > { %1051 = vst.msk [vmem:[#allocation2 + $0x44] sm:$0xf] %vm1035_vm12, %v976_v53 }
 0x212   : > { %1668 = vrot.lane.b32.xlu1 %v4261_v1, %s3051_s9 }
 0x213   : > { %1664 = vrot.lane.b32.xlu2 %v4216_v58, %s3051_s9 }
 0x214   : > { %1672 = vrot.lane.b32.xlu0 %v4322_v52, %s3051_s9  ;;  %v1399_v25 = vpop.permute.xlu1 %1398 }
 0x215   : > { %1484 = vst.msk [vmem:[#allocation2 + $0x3c] sm:$0xf] %vm1464_vm13, %v1399_v25  ;;  %v980_v26 = vpop.permute.xlu2 %979 }
 0x216   : > { %1053 = vst.msk [vmem:[#allocation2 + $0x4c] sm:$0xf] %vm1035_vm12, %v980_v26  ;;  %v1254_v51 = vpop.permute.xlu0 %1253  ;;  %v5183_v26 = vld [vmem:[#allocation41_spill] sm:$0xff] }
 0x217   : > { %1337 = vst.msk [vmem:[#allocation2 + $0x40] sm:$0xf] %vm1322_vm5, %v1254_v51 }
 0x218   : > { %1485 = vst.msk [vmem:[#allocation2 + $0x40] sm:$0xf] %vm1464_vm13, %v1401_v15  ;;  %v5182_v15 = vld [vmem:[#allocation17_spill] sm:$0xff] }
 0x21a   : > { %1674 = vrot.lane.b32.xlu1 %v4299_v21, %s3051_s9 }
 0x21b   : > { %1670 = vrot.lane.b32.xlu2 %v4290_v44, %s3051_s9 }
 0x21c   : > { %1806 = vrot.lane.b32.xlu0 %v3814_v6, %s3052_s10  ;;  %v978_v39 = vpop.permute.xlu1 %977 }
 0x21d   : > { %1052 = vst.msk [vmem:[#allocation2 + $0x48] sm:$0xf] %vm1035_vm12, %v978_v39  ;;  %v1258_v62 = vpop.permute.xlu2 %1257  ;;  %vm2145_vm12 = vmand %vm2114_vm8, %vm1066_vm9 }
 0x21e   : > { %1339 = vst.msk [vmem:[#allocation2 + $0x48] sm:$0xf] %vm1322_vm5, %v1258_v62  ;;  %v1403_v16 = vpop.permute.xlu0 %1402 }
 0x222   : > { %1808 = vrot.lane.b32.xlu1 %v5181_v56, %s3052_s10  ;;  %v5186_v56 = vld [vmem:[#allocation21_spill] sm:$0xff] }
 0x223   : > { %1676 = vrot.lane.b32.xlu2 %v5182_v15, %s3051_s9 }
 0x224   : > { %1937 = vrot.lane.b32.xlu0 %v3244_v47, %s3053_s11  ;;  %v1256_v53 = vpop.permute.xlu1 %1255  ;;  %v5184_v47 = vld [vmem:[#allocation10_spill] sm:$0xff] }
 0x225   : > { %1338 = vst.msk [vmem:[#allocation2 + $0x44] sm:$0xf] %vm1322_vm5, %v1256_v53  ;;  %v1538_v6 = vpop.permute.xlu2 %1537 }
 0x226   : > { %1486 = vst.msk [vmem:[#allocation2 + $0x44] sm:$0xf] %vm1464_vm13, %v1403_v16  ;;  %v1260_v25 = vpop.permute.xlu0 %1259  ;;  %v5185_v16 = vld [vmem:[#allocation13_spill] sm:$0xff] }
 0x227   : > { %1617 = vst.msk [vmem:[#allocation2 + $0x44] sm:$0xf] %vm1599_vm15, %v1538_v6 }
 0x228   : > { %1340 = vst.msk [vmem:[#allocation2 + $0x4c] sm:$0xf] %vm1322_vm5, %v1260_v25  ;;  %v5188_v25 = vld [vmem:[#allocation6_spill] sm:$0xff] }
 0x229   : > { %1488 = vst.msk [vmem:[#allocation2 + $0x4c] sm:$0xf] %vm1464_vm13, %v5183_v26 }
 0x22a   : > { %2056 = vrot.lane.b32.xlu1 %v5182_v15, %s3054_s12 }
 0x22b   : > { %1935 = vrot.lane.b32.xlu2 %v3219_v28, %s3053_s11  ;;  %v5187_v28 = vld [vmem:[#allocation9_spill] sm:$0xff] }
 0x22c   : > { %1774 = vrot.lane.b32.xlu0 %v5184_v47, %s3052_s10  ;;  %v1405_v51 = vpop.permute.xlu1 %1404 }
 0x22d   : > { %1487 = vst.msk [vmem:[#allocation2 + $0x48] sm:$0xf] %vm1464_vm13, %v1405_v51  ;;  %v1544_v39 = vpop.permute.xlu2 %1543  ;;  %vm1769_vm13 = vmand %vm1736_vm3, %vm1066_vm9 }
 0x22e   : > { %1620 = vst.msk [vmem:[#allocation2 + $0x50] sm:$0xf] %vm1599_vm15, %v1544_v39  ;;  %v1534_v62 = vpop.permute.xlu0 %1533  ;;  %v5189_v39 = vld [vmem:[#allocation11_spill] sm:$0xff] }
 0x22f   : > { %1615 = vst.msk [vmem:[#allocation2 + $0x3c] sm:$0xf] %vm1599_vm15, %v1534_v62 }
 0x232   : > { %1776 = vrot.lane.b32.xlu1 %v5185_v16, %s3052_s10 }
 0x233   : > { %2058 = vrot.lane.b32.xlu2 %v5186_v56, %s3054_s12 }
 0x234   : > { %1905 = vrot.lane.b32.xlu0 %v5187_v28, %s3053_s11  ;;  %v1536_v15 = vpop.permute.xlu1 %1535 }
 0x235   : > { %1616 = vst.msk [vmem:[#allocation2 + $0x40] sm:$0xf] %vm1599_vm15, %v1536_v15  ;;  %v1550_v53 = vpop.permute.xlu2 %1549 }
 0x236   : > { %1623 = vst.msk [vmem:[#allocation2 + $0x5c] sm:$0xf] %vm1599_vm15, %v1550_v53  ;;  %v1540_v6 = vpop.permute.xlu0 %1539  ;;  %v5192_v53 = vld [vmem:[#allocation16_spill] sm:$0xff] }
 0x237   : > { %1618 = vst.msk [vmem:[#allocation2 + $0x48] sm:$0xf] %vm1599_vm15, %v1540_v6  ;;  %v5194_v6 = vld [vmem:[#allocation12_spill] sm:$0xff] }
 0x23a   : > { %2024 = vrot.lane.b32.xlu1 %v5174_v49, %s3054_s12 }
 0x23b   : > { %1903 = vrot.lane.b32.xlu2 %v5188_v25, %s3053_s11 }
 0x23c   : > { %1678 = vrot.lane.b32.xlu0 %v5186_v56, %s3051_s9  ;;  %v1542_v26 = vpop.permute.xlu1 %1541  ;;  %v5190_v56 = vld [vmem:[#allocation14_spill] sm:$0xff] }
 0x23d   : > { %1619 = vst.msk [vmem:[#allocation2 + $0x4c] sm:$0xf] %vm1599_vm15, %v1542_v26  ;;  %v1556_v47 = vpop.permute.xlu2 %1555 }
 0x23e   : > { %1626 = vst.msk [vmem:[#allocation2 + $0x68] sm:$0xf] %vm1599_vm15, %v1556_v47  ;;  %v1546_v51 = vpop.permute.xlu0 %1545 }
 0x23f   : > { %1621 = vst.msk [vmem:[#allocation2 + $0x54] sm:$0xf] %vm1599_vm15, %v1546_v51  ;;  %v5195_v51 = vld [vmem:[#allocation15_spill] sm:$0xff] }
 0x242   : > { %1810 = vrot.lane.b32.xlu1 %v5189_v39, %s3052_s10  ;;  %v5196_v39 = vld [vmem:[#allocation20_spill] sm:$0xff] }
 0x243   : > { %2026 = vrot.lane.b32.xlu2 %v5178_v10, %s3054_s12  ;;  %v5191_v10 = vld [vmem:[#allocation35_spill] sm:$0xff] }
 0x244   : > { %1939 = vrot.lane.b32.xlu0 %v3272_v4, %s3053_s11  ;;  %v1548_v49 = vpop.permute.xlu1 %1547 }
 0x245   : > { %1622 = vst.msk [vmem:[#allocation2 + $0x58] sm:$0xf] %vm1599_vm15, %v1548_v49  ;;  %v1562_v62 = vpop.permute.xlu2 %1561 }
 0x246   : > { %1629 = vst.msk [vmem:[#allocation2 + $0x74] sm:$0xf] %vm1599_vm15, %v1562_v62  ;;  %v1552_v16 = vpop.permute.xlu0 %1551 }
 0x247   : > { %1624 = vst.msk [vmem:[#allocation2 + $0x60] sm:$0xf] %vm1599_vm15, %v1552_v16 }
 0x24a   : > { %1941 = vrot.lane.b32.xlu1 %v3313_v32, %s3053_s11  ;;  %v5193_v32 = vld [vmem:[#allocation32_spill] sm:$0xff] }
 0x24b   : > { %1812 = vrot.lane.b32.xlu2 %v5190_v56, %s3052_s10  ;;  %v5197_v56 = vld [vmem:[#allocation18_spill] sm:$0xff] }
 0x24c   : > { %2062 = vrot.lane.b32.xlu0 %v5191_v10, %s3054_s12  ;;  %v1554_v4 = vpop.permute.xlu1 %1553 }
 0x24d   : > { %1625 = vst.msk [vmem:[#allocation2 + $0x64] sm:$0xf] %vm1599_vm15, %v1554_v4  ;;  %v1641_v28 = vpop.permute.xlu2 %1640 }
 0x24e   : > { %1737 = vst.msk [vmem:[#allocation2] sm:$0xf] %vm1736_vm3, %v1641_v28  ;;  %v1558_v15 = vpop.permute.xlu0 %1557 }
 0x24f   : > { %1627 = vst.msk [vmem:[#allocation2 + $0x6c] sm:$0xf] %vm1599_vm15, %v1558_v15  ;;  %v5198_v15 = vld [vmem:[#allocation26_spill] sm:$0xff] }
 0x252   : > { %1778 = vrot.lane.b32.xlu1 %v5192_v53, %s3052_s10 }
 0x253   : > { %2060 = vrot.lane.b32.xlu2 %v5193_v32, %s3054_s12 }
 0x254   : > { %1907 = vrot.lane.b32.xlu0 %v5194_v6, %s3053_s11  ;;  %v1560_v25 = vpop.permute.xlu1 %1559  ;;  %v5199_v6 = vld [vmem:[#allocation39_spill] sm:$0xff] }
 0x255   : > { %1628 = vst.msk [vmem:[#allocation2 + $0x70] sm:$0xf] %vm1599_vm15, %v1560_v25  ;;  %v1647_v26 = vpop.permute.xlu2 %1646 }
 0x256   : > { %1740 = vst.msk [vmem:[#allocation2 + $0xc] sm:$0xf] %vm1736_vm3, %v1647_v26  ;;  %v1564_v47 = vpop.permute.xlu0 %1563 }
 0x257   : > { %1630 = vst.msk [vmem:[#allocation2 + $0x78] sm:$0xf] %vm1599_vm15, %v1564_v47  ;;  %v5201_v47 = vld [vmem:[#allocation29_spill] sm:$0xff] }
 0x25a   : > { %1909 = vrot.lane.b32.xlu1 %v5195_v51, %s3053_s11  ;;  %v5202_v51 = vld [vmem:[#allocation28_spill] sm:$0xff] }
 0x25b   : > { %1780 = vrot.lane.b32.xlu2 %v5196_v39, %s3052_s10 }
 0x25c   : > { %2030 = vrot.lane.b32.xlu0 %v5177_v45, %s3054_s12  ;;  %v1566_v49 = vpop.permute.xlu1 %1565 }
 0x25d   : > { %1631 = vst.msk [vmem:[#allocation2 + $0x7c] sm:$0xf] %vm1599_vm15, %v1566_v49  ;;  %v1653_v62 = vpop.permute.xlu2 %1652  ;;  %vm1899_vm15 = vmand %vm1898_vm14, %vm578_vm6 }
 0x25e   : > { %1743 = vst.msk [vmem:[#allocation2 + $0x18] sm:$0xf] %vm1736_vm3, %v1653_v62  ;;  %v1643_v16 = vpop.permute.xlu0 %1642 }
 0x25f   : > { %1738 = vst.msk [vmem:[#allocation2 + $0x4] sm:$0xf] %vm1736_vm3, %v1643_v16  ;;  %v2329_v16 = vld [vmem:[%s5005_s3 + $0x10] sm:$0x3] }
 0x262   : > { %1680 = vrot.lane.b32.xlu1 %v5193_v32, %s3051_s9 }
 0x263   : > { %2028 = vrot.lane.b32.xlu2 %v5176_v37, %s3054_s12 }
 0x264   : > { %1814 = vrot.lane.b32.xlu0 %v5197_v56, %s3052_s10  ;;  %v1645_v4 = vpop.permute.xlu1 %1644  ;;  %v2343_v56 = vunpack.c.l.b16 %v2329_v16 }
 0x265   : > { %1739 = vst.msk [vmem:[#allocation2 + $0x8] sm:$0xf] %vm1736_vm3, %v1645_v4  ;;  %v1659_v45 = vpop.permute.xlu2 %1658  ;;  %v5204_v4 = vld [vmem:[#allocation19_spill] sm:$0xff] }
 0x266   : > { %1746 = vst.msk [vmem:[#allocation2 + $0x24] sm:$0xf] %vm1736_vm3, %v1659_v45  ;;  %v1649_v28 = vpop.permute.xlu0 %1648  ;;  %v2346_v45 = vpack.c.b16 %v2343_v56, %v2343_v56 }
 0x267   : > { %1741 = vst.msk [vmem:[#allocation2 + $0x10] sm:$0xf] %vm1736_vm3, %v1649_v28 }
 0x26a   : > { %1816 = vrot.lane.b32.xlu1 %v5198_v15, %s3052_s10 }
 0x26b   : > { %1682 = vrot.lane.b32.xlu2 %v5191_v10, %s3051_s9  ;;  %v5200_v10 = vld [vmem:[#allocation22_spill] sm:$0xff] }
 0x26c   : > { %1945 = vrot.lane.b32.xlu0 %v3471_v19, %s3053_s11  ;;  %v1651_v37 = vpop.permute.xlu1 %1650 }
 0x26d   : > { %1742 = vst.msk [vmem:[#allocation2 + $0x14] sm:$0xf] %vm1736_vm3, %v1651_v37  ;;  %v1665_v53 = vpop.permute.xlu2 %1664  ;;  %v2399_v37 = vsel %vm420_vm0, %v2346_v45, 0  ;;  %vm1867_vm0 = vcmask 224448  }
 0x26e   : > { %1749 = vst.msk [vmem:[#allocation2 + $0x30] sm:$0xf] %vm1736_vm3, %v1665_v53  ;;  %v1655_v32 = vpop.permute.xlu0 %1654  ;;  %2927 = vmatpush.bf16.msra.mxu2 %v2399_v37  ;;  %2406 = vmatpush.bf16.msra.mxu1 %v2399_v37 }
 0x26f   : > { %1744 = vst.msk [vmem:[#allocation2 + $0x1c] sm:$0xf] %vm1736_vm3, %v1655_v32  ;;  %v2766_v32 = vld [vmem:[%s5005_s3 + $0x8] sm:$0xff] }
 0x272   : > { %2064 = vrot.lane.b32.xlu1 %v5199_v6, %s3054_s12  ;;  %2928 = vmatpush.bf16.msra.mxu2 %v2766_v32 }
 0x273   : > { %1943 = vrot.lane.b32.xlu2 %v3360_v60, %s3053_s11  ;;  %v5203_v60 = vld [vmem:[#allocation24_spill] sm:$0xff]  ;;  %2407 = vmatpush.bf16.msra.mxu1 %v2766_v32 }
 0x274   : > { %1782 = vrot.lane.b32.xlu0 %v5200_v10, %s3052_s10  ;;  %v1657_v25 = vpop.permute.xlu1 %1656 }
 0x275   : > { %1745 = vst.msk [vmem:[#allocation2 + $0x20] sm:$0xf] %vm1736_vm3, %v1657_v25  ;;  %v1671_v19 = vpop.permute.xlu2 %1670 }
 0x276   : > { %1752 = vst.msk [vmem:[#allocation2 + $0x3c] sm:$0xf] %vm1736_vm3, %v1671_v19  ;;  %v1661_v26 = vpop.permute.xlu0 %1660 }
 0x277   : > { %1747 = vst.msk [vmem:[#allocation2 + $0x28] sm:$0xf] %vm1736_vm3, %v1661_v26 }
 0x27a   : > { %1784 = vrot.lane.b32.xlu1 %v5201_v47, %s3052_s10 }
 0x27b   : > { %2066 = vrot.lane.b32.xlu2 %v5202_v51, %s3054_s12 }
 0x27c   : > { %1913 = vrot.lane.b32.xlu0 %v5203_v60, %s3053_s11  ;;  %v1663_v39 = vpop.permute.xlu1 %1662  ;;  %v2918_v60 = vld [vmem:[%s5007_s5 + $0x40] sm:$0xff]  }
 0x27d   : > { %1748 = vst.msk [vmem:[#allocation2 + $0x2c] sm:$0xf] %vm1736_vm3, %v1663_v39  ;;  %v1677_v49 = vpop.permute.xlu2 %1676  ;;  %v5206_v39 = vld [vmem:[#allocation25_spill] sm:$0xff] }
 0x27e   : > { %1755 = vst.msk [vmem:[#allocation2 + $0x48] sm:$0xf] %vm1736_vm3, %v1677_v49  ;;  %v1667_v62 = vpop.permute.xlu0 %1666  ;;  %v2867_v49 = vunpack.c.h.bf16 %v2918_v60 }
 0x27f   : > { %1750 = vst.msk [vmem:[#allocation2 + $0x34] sm:$0xf] %vm1736_vm3, %v1667_v62 }
 0x282   : > { %2032 = vrot.lane.b32.xlu1 %v5180_v50, %s3054_s12  ;;  %v2765_v50 = vld [vmem:[%s5005_s3] sm:$0xff] }
 0x283   : > { %1911 = vrot.lane.b32.xlu2 %v5204_v4, %s3053_s11  ;;  %2929 = vmatpush.bf16.msra.mxu2 %v2765_v50 }
 0x284   : > { %1684 = vrot.lane.b32.xlu0 %v5199_v6, %s3051_s9  ;;  %v1669_v28 = vpop.permute.xlu1 %1668  ;;  %2408 = vmatpush.bf16.msra.mxu1 %v2765_v50 }
 0x285   : > { %1751 = vst.msk [vmem:[#allocation2 + $0x38] sm:$0xf] %vm1736_vm3, %v1669_v28  ;;  %v1936_v15 = vpop.permute.xlu2 %1935 }
 0x286   : > { %v1673_v53 = vpop.permute.xlu0 %1672 }
 0x287   : > { %1753 = vst.msk [vmem:[#allocation2 + $0x40] sm:$0xf] %vm1736_vm3, %v1673_v53 }
 0x28a   : > { %1686 = vrot.lane.b32.xlu1 %v5202_v51, %s3051_s9 }
 0x28b   : > { %2034 = vrot.lane.b32.xlu2 %v5179_v14, %s3054_s12  ;;  %v5205_v14 = vld [vmem:[#allocation27_spill] sm:$0xff] }
 0x28c   : > { %1820 = vrot.lane.b32.xlu0 %v3665_v63, %s3052_s10  ;;  %v1675_v6 = vpop.permute.xlu1 %1674 }
 0x28d   : > { %1754 = vst.msk [vmem:[#allocation2 + $0x44] sm:$0xf] %vm1736_vm3, %v1675_v6  ;;  %v2059_v10 = vpop.permute.xlu2 %2058 }
 0x28e   : > { %v1807_v25 = vpop.permute.xlu0 %1806 }
 0x28f   : > { %1884 = vst.msk [vmem:[#allocation2 + $0x40] sm:$0xf] %vm1867_vm0, %v1807_v25 }
 0x290   : > { %2010 = vst.msk [vmem:[#allocation2 + $0x40] sm:$0xf] %vm1993_vm7, %v1936_v15 }
 0x292   : > { %1947 = vrot.lane.b32.xlu1 %v3474_v24, %s3053_s11 }
 0x293   : > { %1818 = vrot.lane.b32.xlu2 %v5205_v14, %s3052_s10 }
 0x294   : > { %2068 = vrot.lane.b32.xlu0 %v3912_v18, %s3054_s12  ;;  %v1809_v63 = vpop.permute.xlu1 %1808 }
 0x295   : > { %1885 = vst.msk [vmem:[#allocation2 + $0x44] sm:$0xf] %vm1867_vm0, %v1809_v63  ;;  %v1904_v19 = vpop.permute.xlu2 %1903 }
 0x296   : > { %v1938_v26 = vpop.permute.xlu0 %1937 }
 0x297   : > { %2011 = vst.msk [vmem:[#allocation2 + $0x44] sm:$0xf] %vm1993_vm7, %v1938_v26 }
 0x298   : > { %2132 = vst.msk [vmem:[#allocation2 + $0x44] sm:$0xf] %vm2114_vm8, %v2059_v10 }
 0x29a   : > { %2070 = vrot.lane.b32.xlu1 %v3701_v3, %s3054_s12 }
 0x29b   : > { %1949 = vrot.lane.b32.xlu2 %v3612_v12, %s3053_s11  ;;  %v5207_v12 = vld [vmem:[#allocation31_spill] sm:$0xff] }
 0x29c   : > { %1788 = vrot.lane.b32.xlu0 %v3721_v59, %s3052_s10  ;;  %v2057_v24 = vpop.permute.xlu1 %2056  ;;  %v2866_v59 = vunpack.c.l.bf16 %v2918_v60 }
 0x29d   : > { %2131 = vst.msk [vmem:[#allocation2 + $0x40] sm:$0xf] %vm2114_vm8, %v2057_v24  ;;  %v2027_v47 = vpop.permute.xlu2 %2026 }
 0x29e   : > { %v1775_v51 = vpop.permute.xlu0 %1774 }
 0x29f   : > { %1868 = vst.msk [vmem:[#allocation2] sm:$0xf] %vm1867_vm0, %v1775_v51  ;;  %v5210_v51 = vld [vmem:[#allocation50_spill] sm:$0xff] }
 0x2a0   : > { %1994 = vst.msk [vmem:[#allocation2] sm:$0xf] %vm1993_vm7, %v1904_v19 }
 0x2a2   : > { %1915 = vrot.lane.b32.xlu1 %v5206_v39, %s3053_s11 }
 0x2a3   : > { %1786 = vrot.lane.b32.xlu2 %v5207_v12, %s3052_s10 }
 0x2a4   : > { %2036 = vrot.lane.b32.xlu0 %v3936_v46, %s3054_s12  ;;  %v1777_v62 = vpop.permute.xlu1 %1776  ;;  %v2903_v16 = vld [vmem:[#allocation2 + $0x40] sm:$0xff]  }
 0x2a5   : > { %1869 = vst.msk [vmem:[#allocation2 + $0x4] sm:$0xf] %vm1867_vm0, %v1777_v62  ;;  %v1813_v56 = vpop.permute.xlu2 %1812  ;;  %v2802_v4 = vunpack.c.l.bf16 %v2903_v16  ;;  %v2803_v45 = vunpack.c.h.bf16 %v2903_v16  ;;  %v5213_v62 = vld [vmem:[#allocation36_spill] sm:$0xff] }
 0x2a6   : > { %v1906_v28 = vpop.permute.xlu0 %1905 }
 0x2a7   : > { %1995 = vst.msk [vmem:[#allocation2 + $0x4] sm:$0xf] %vm1993_vm7, %v1906_v28  ;;  %v2293_v15 = vmul.f32 %v2866_v59, %v2802_v4  ;;  %v2294_v37 = vmul.f32 %v2867_v49, %v2803_v45  ;;  %v5211_v59 = vld [vmem:[#allocation40_spill] sm:$0xff]  ;;  %v5212_v49 = vld [vmem:[#allocation49_spill] sm:$0xff] }
 0x2a8   : > { %2116 = vst.msk [vmem:[#allocation2 + $0x4] sm:$0xf] %vm2114_vm8, %v2027_v47 }
 0x2a9   : > { %v2317_v53 = vpack.c.bf16 %v2294_v37, %v2293_v15 }
 0x2aa   : > { %2038 = vrot.lane.b32.xlu1 %v3755_v27, %s3054_s12  ;;  %v2833_v27 = vld [vmem:[%s5007_s5] sm:$0xff]  }
 0x2ab   : > { %1917 = vrot.lane.b32.xlu2 %v3650_v0, %s3053_s11  ;;  %2736 = vmatmul.msk.bf16.vlgmr.msra.gmra.mxu2 %vm2349_vm10, %v2317_v53  ;;  %v5208_v0 = vld [vmem:[#allocation38_spill] sm:$0xff]  ;;  %v2835_v6 = vunpack.c.h.bf16 %v2833_v27 }
 0x2ac   : > { %1690 = vrot.lane.b32.xlu0 %v3701_v3, %s3051_s9  ;;  %v2025_v46 = vpop.permute.xlu1 %2024  ;;  %v2834_v3 = vunpack.c.l.bf16 %v2833_v27  ;;  %v5215_v27 = vld [vmem:[#allocation45_spill] sm:$0xff] }
 0x2ad   : > { %2115 = vst.msk [vmem:[#allocation2] sm:$0xf] %vm2114_vm8, %v2025_v46  ;;  %v2061_v32 = vpop.permute.xlu2 %2060 }
 0x2ae   : > { %v1679_v50 = vpop.permute.xlu0 %1678 }
 0x2af   : > { %1756 = vst.msk [vmem:[#allocation2 + $0x4c] sm:$0xf] %vm1736_vm3, %v1679_v50  ;;  %v5214_v50 = vld [vmem:[#allocation43_spill] sm:$0xff] }
 0x2b0   : > { %1887 = vst.msk [vmem:[#allocation2 + $0x4c] sm:$0xf] %vm1867_vm0, %v1813_v56 }
 0x2b2   : > { %1822 = vrot.lane.b32.xlu1 %v5208_v0, %s3052_s10 }
 0x2b3   : > { %1688 = vrot.lane.b32.xlu2 %v3912_v18, %s3051_s9 }
 0x2b4   : > { %1951 = vrot.lane.b32.xlu0 %v3623_v36, %s3053_s11  ;;  %v1811_v10 = vpop.permute.xlu1 %1810  ;;  %v2769_v25 = vld [vmem:[#allocation2] sm:$0xff]  }
 0x2b5   : > { %1886 = vst.msk [vmem:[#allocation2 + $0x48] sm:$0xf] %vm1867_vm0, %v1811_v10  ;;  %v1781_v14 = vpop.permute.xlu2 %1780  ;;  %v2770_v63 = vunpack.c.l.bf16 %v2769_v25  ;;  %v2771_v19 = vunpack.c.h.bf16 %v2769_v25  ;;  %v5209_v36 = vld [vmem:[#allocation46_spill] sm:$0xff]  ;;  %v2911_v25 = vld [vmem:[%s5007_s5 + $0x8] sm:$0xff]  }
 0x2b6   : > { %1871 = vst.msk [vmem:[#allocation2 + $0xc] sm:$0xf] %vm1867_vm0, %v1781_v14  ;;  %v1940_v26 = vpop.permute.xlu0 %1939 }
 0x2b7   : > { %2012 = vst.msk [vmem:[#allocation2 + $0x48] sm:$0xf] %vm1993_vm7, %v1940_v26  ;;  %v2277_v24 = vmul.f32 %v2834_v3, %v2770_v63  ;;  %v2278_v47 = vmul.f32 %v2835_v6, %v2771_v19  ;;  %v2838_v19 = vunpack.c.l.bf16 %v2911_v25  ;;  %v2839_v26 = vunpack.c.h.bf16 %v2911_v25 }
 0x2b8   : > { %2133 = vst.msk [vmem:[#allocation2 + $0x48] sm:$0xf] %vm2114_vm8, %v2061_v32 }
 0x2b9   : > { %v2309_v18 = vpack.c.bf16 %v2278_v47, %v2277_v24 }
 0x2ba   : > { %1953 = vrot.lane.b32.xlu1 %v3800_v7, %s3053_s11  ;;  %v2919_v7 = vld [vmem:[%s5007_s5 + $0x48] sm:$0xff]  }
 0x2bb   : > { %1824 = vrot.lane.b32.xlu2 %v5209_v36, %s3052_s10  ;;  %2728 = vmatmul.msk.bf16.vlgmr.msra.gmra.mxu1 %vm2349_vm10, %v2309_v18  ;;  %v2870_v4 = vunpack.c.l.bf16 %v2919_v7  ;;  %v2871_v45 = vunpack.c.h.bf16 %v2919_v7 }
 0x2bc   : > { %2074 = vrot.lane.b32.xlu0 %v5210_v51, %s3054_s12  ;;  %v1942_v60 = vpop.permute.xlu1 %1941 }
 0x2bd   : > { %2013 = vst.msk [vmem:[#allocation2 + $0x4c] sm:$0xf] %vm1993_vm7, %v1942_v60  ;;  %v2029_v39 = vpop.permute.xlu2 %2028 }
 0x2be   : > { %v2063_v12 = vpop.permute.xlu0 %2062 }
 0x2bf   : > { %2134 = vst.msk [vmem:[#allocation2 + $0x4c] sm:$0xf] %vm2114_vm8, %v2063_v12 }
 0x2c2   : > { %1790 = vrot.lane.b32.xlu1 %v5211_v59, %s3052_s10 }
 0x2c3   : > { %2072 = vrot.lane.b32.xlu2 %v5212_v49, %s3054_s12 }
 0x2c4   : > { %1919 = vrot.lane.b32.xlu0 %v5213_v62, %s3053_s11  ;;  %v1779_v16 = vpop.permute.xlu1 %1778  ;;  %v5217_v62 = vld [vmem:[#allocation44_spill] sm:$0xff] }
 0x2c5   : > { %1870 = vst.msk [vmem:[#allocation2 + $0x8] sm:$0xf] %vm1867_vm0, %v1779_v16  ;;  %v1683_v56 = vpop.permute.xlu2 %1682 }
 0x2c6   : > { %1758 = vst.msk [vmem:[#allocation2 + $0x54] sm:$0xf] %vm1736_vm3, %v1683_v56  ;;  %v1908_v28 = vpop.permute.xlu0 %1907  ;;  %v2904_v15 = vld [vmem:[#allocation2 + $0x48] sm:$0xff]  }
 0x2c7   : > { %1996 = vst.msk [vmem:[#allocation2 + $0x8] sm:$0xf] %vm1993_vm7, %v1908_v28  ;;  %v2806_v37 = vunpack.c.l.bf16 %v2904_v15  ;;  %v2807_v53 = vunpack.c.h.bf16 %v2904_v15 }
 0x2c8   : > { %2117 = vst.msk [vmem:[#allocation2 + $0x8] sm:$0xf] %vm2114_vm8, %v2029_v39 }
 0x2c9   : > { %v2295_v46 = vmul.f32 %v2870_v4, %v2806_v37  ;;  %v2296_v32 = vmul.f32 %v2871_v45, %v2807_v53 }
 0x2ca   : > { %1921 = vrot.lane.b32.xlu1 %v5214_v50, %s3053_s11 }
 0x2cb   : > { %1792 = vrot.lane.b32.xlu2 %v5215_v27, %s3052_s10  ;;  %v2318_v0 = vpack.c.bf16 %v2296_v32, %v2295_v46 }
 0x2cc   : > { %2042 = vrot.lane.b32.xlu0 %v3907_v31, %s3054_s12  ;;  %v1910_v3 = vpop.permute.xlu1 %1909  ;;  %v5216_v31 = vld [vmem:[#allocation47_spill] sm:$0xff] }
 0x2cd   : > { %1997 = vst.msk [vmem:[#allocation2 + $0xc] sm:$0xf] %vm1993_vm7, %v1910_v3  ;;  %v1944_v6 = vpop.permute.xlu2 %1943  ;;  %2737 = vmatmul.msk.bf16.gmra.mxu2 %vm2349_vm10, %v2318_v0 }
 0x2ce   : > { %v2031_v10 = vpop.permute.xlu0 %2030 }
 0x2cf   : > { %2118 = vst.msk [vmem:[#allocation2 + $0xc] sm:$0xf] %vm2114_vm8, %v2031_v10 }
 0x2d2   : > { %1692 = vrot.lane.b32.xlu1 %v5212_v49, %s3051_s9  ;;  %v2920_v49 = vld [vmem:[%s5007_s5 + $0x50] sm:$0xff]  }
 0x2d3   : > { %2040 = vrot.lane.b32.xlu2 %v4075_v42, %s3054_s12 }
 0x2d4   : > { %1826 = vrot.lane.b32.xlu0 %v5216_v31, %s3052_s10  ;;  %v1681_v14 = vpop.permute.xlu1 %1680 }
 0x2d5   : > { %1757 = vst.msk [vmem:[#allocation2 + $0x50] sm:$0xf] %vm1736_vm3, %v1681_v14  ;;  %v2067_v63 = vpop.permute.xlu2 %2066 }
 0x2d6   : > { %v1815_v24 = vpop.permute.xlu0 %1814  ;;  %v2896_v47 = vld [vmem:[#allocation2 + $0x8] sm:$0xff]  }
 0x2d7   : > { %1888 = vst.msk [vmem:[#allocation2 + $0x50] sm:$0xf] %vm1867_vm0, %v1815_v24  ;;  %v2774_v18 = vunpack.c.l.bf16 %v2896_v47  ;;  %v2775_v36 = vunpack.c.h.bf16 %v2896_v47 }
 0x2d8   : > { %2014 = vst.msk [vmem:[#allocation2 + $0x50] sm:$0xf] %vm1993_vm7, %v1944_v6 }
 0x2d9   : > { %v2279_v60 = vmul.f32 %v2838_v19, %v2774_v18  ;;  %v2280_v39 = vmul.f32 %v2839_v26, %v2775_v36 }
 0x2da   : > { %1828 = vrot.lane.b32.xlu1 %v3977_v8, %s3052_s10 }
 0x2db   : > { %1694 = vrot.lane.b32.xlu2 %v5210_v51, %s3051_s9  ;;  %v2310_v42 = vpack.c.bf16 %v2280_v39, %v2279_v60 }
 0x2dc   : > { %1957 = vrot.lane.b32.xlu0 %v3941_v48, %s3053_s11  ;;  %v1817_v12 = vpop.permute.xlu1 %1816 }
 0x2dd   : > { %1889 = vst.msk [vmem:[#allocation2 + $0x54] sm:$0xf] %vm1867_vm0, %v1817_v12  ;;  %v1912_v59 = vpop.permute.xlu2 %1911  ;;  %2729 = vmatmul.msk.bf16.gmra.mxu1 %vm2349_vm10, %v2310_v42 }
 0x2de   : > { %v1946_v7 = vpop.permute.xlu0 %1945 }
 0x2df   : > { %2015 = vst.msk [vmem:[#allocation2 + $0x54] sm:$0xf] %vm1993_vm7, %v1946_v7 }
 0x2e0   : > { %2136 = vst.msk [vmem:[#allocation2 + $0x54] sm:$0xf] %vm2114_vm8, %v2067_v63 }
 0x2e2   : > { %2076 = vrot.lane.b32.xlu1 %v4180_v38, %s3054_s12 }
 0x2e3   : > { %1955 = vrot.lane.b32.xlu2 %v3818_v34, %s3053_s11  ;;  %v2874_v34 = vunpack.c.l.bf16 %v2920_v49 }
 0x2e4   : > { %1794 = vrot.lane.b32.xlu0 %v3900_v23, %s3052_s10  ;;  %v2065_v48 = vpop.permute.xlu1 %2064  ;;  %v2875_v23 = vunpack.c.h.bf16 %v2920_v49 }
 0x2e5   : > { %2135 = vst.msk [vmem:[#allocation2 + $0x50] sm:$0xf] %vm2114_vm8, %v2065_v48  ;;  %v2035_v8 = vpop.permute.xlu2 %2034 }
 0x2e6   : > { %v1783_v51 = vpop.permute.xlu0 %1782 }
 0x2e7   : > { %1872 = vst.msk [vmem:[#allocation2 + $0x10] sm:$0xf] %vm1867_vm0, %v1783_v51 }
 0x2e8   : > { %1998 = vst.msk [vmem:[#allocation2 + $0x10] sm:$0xf] %vm1993_vm7, %v1912_v59 }
 0x2ea   : > { %1796 = vrot.lane.b32.xlu1 %v4014_v41, %s3052_s10 }
 0x2eb   : > { %2078 = vrot.lane.b32.xlu2 %v4203_v5, %s3054_s12 }
 0x2ec   : > { %1923 = vrot.lane.b32.xlu0 %v5217_v62, %s3053_s11  ;;  %v1785_v16 = vpop.permute.xlu1 %1784  ;;  %v2905_v56 = vld [vmem:[#allocation2 + $0x50] sm:$0xff]  }
 0x2ed   : > { %1873 = vst.msk [vmem:[#allocation2 + $0x14] sm:$0xf] %vm1867_vm0, %v1785_v16  ;;  %v1819_v4 = vpop.permute.xlu2 %1818  ;;  %v2810_v45 = vunpack.c.l.bf16 %v2905_v56  ;;  %v2811_v28 = vunpack.c.h.bf16 %v2905_v56 }
 0x2ee   : > { %v1914_v15 = vpop.permute.xlu0 %1913 }
 0x2ef   : > { %1999 = vst.msk [vmem:[#allocation2 + $0x14] sm:$0xf] %vm1993_vm7, %v1914_v15  ;;  %v2297_v37 = vmul.f32 %v2874_v34, %v2810_v45  ;;  %v2298_v41 = vmul.f32 %v2875_v23, %v2811_v28 }
 0x2f0   : > { %2120 = vst.msk [vmem:[#allocation2 + $0x14] sm:$0xf] %vm2114_vm8, %v2035_v8  ;;  %v1773_v8 = vrot.slane %v4255_v55, 4 }
 0x2f1   : > { %v2319_v53 = vpack.c.bf16 %v2298_v41, %v2297_v37 }
 0x2f2   : > { %1925 = vrot.lane.b32.xlu1 %v3962_v17, %s3053_s11  ;;  %v2912_v17 = vld [vmem:[%s5007_s5 + $0x10] sm:$0xff]  }
 0x2f3   : > { %1698 = vrot.lane.b32.xlu2 %v4203_v5, %s3051_s9  ;;  %2738 = vmatmul.msk.bf16.gmra.mxu2 %vm2349_vm10, %v2319_v53  ;;  %v2842_v5 = vunpack.c.l.bf16 %v2912_v17 }
 0x2f4   : > { %2044 = vrot.lane.b32.xlu0 %v4216_v58, %s3054_s12  ;;  %v2033_v46 = vpop.permute.xlu1 %2032  ;;  %v2843_v58 = vunpack.c.h.bf16 %v2912_v17 }
 0x2f5   : > { %2119 = vst.msk [vmem:[#allocation2 + $0x10] sm:$0xf] %vm2114_vm8, %v2033_v46  ;;  %v1950_v32 = vpop.permute.xlu2 %1949 }
 0x2f6   : > { %v1685_v50 = vpop.permute.xlu0 %1684 }
 0x2f7   : > { %1759 = vst.msk [vmem:[#allocation2 + $0x58] sm:$0xf] %vm1736_vm3, %v1685_v50 }
 0x2f8   : > { %1890 = vst.msk [vmem:[#allocation2 + $0x58] sm:$0xf] %vm1867_vm0, %v1819_v4 }
 0x2fa   : > { %2046 = vrot.lane.b32.xlu1 %v4041_v54, %s3054_s12 }
 0x2fb   : > { %1832 = vrot.lane.b32.xlu2 %v4279_v30, %s3052_s10 }
 0x2fc   : > { %1696 = vrot.lane.b32.xlu0 %v4180_v38, %s3051_s9  ;;  %v1687_v27 = vpop.permute.xlu1 %1686  ;;  %v2897_v0 = vld [vmem:[#allocation2 + $0x10] sm:$0xff]   ;;  %v5218_v38 = vor.u32 %v4142_v9, %v4134_v33 }
 0x2fd   : > { %1760 = vst.msk [vmem:[#allocation2 + $0x5c] sm:$0xf] %vm1736_vm3, %v1687_v27  ;;  %v1787_v3 = vpop.permute.xlu2 %1786  ;;  %v2778_v6 = vunpack.c.l.bf16 %v2897_v0  ;;  %v2779_v10 = vunpack.c.h.bf16 %v2897_v0 }
 0x2fe   : > { %1874 = vst.msk [vmem:[#allocation2 + $0x18] sm:$0xf] %vm1867_vm0, %v1787_v3  ;;  %v1821_v25 = vpop.permute.xlu0 %1820  ;;  %v1639_v14 = vrot.slane %v5218_v38, 4 }
 0x2ff   : > { %1891 = vst.msk [vmem:[#allocation2 + $0x5c] sm:$0xf] %vm1867_vm0, %v1821_v25  ;;  %v2281_v54 = vmul.f32 %v2842_v5, %v2778_v6  ;;  %v2282_v31 = vmul.f32 %v2843_v58, %v2779_v10 }
 0x300   : > { %2017 = vst.msk [vmem:[#allocation2 + $0x5c] sm:$0xf] %vm1993_vm7, %v1950_v32 }
 0x301   : > { %v2311_v30 = vpack.c.bf16 %v2282_v31, %v2281_v54 }
 0x302   : > { %1830 = vrot.lane.b32.xlu1 %v4234_v22, %s3052_s10  ;;  %v2921_v22 = vld [vmem:[%s5007_s5 + $0x58] sm:$0xff]  }
 0x303   : > { %1961 = vrot.lane.b32.xlu2 %v4102_v11, %s3053_s11  ;;  %2730 = vmatmul.msk.bf16.gmra.mxu1 %vm2349_vm10, %v2311_v30  ;;  %v2879_v24 = vunpack.c.h.bf16 %v2921_v22 }
 0x304   : > { %2082 = vrot.lane.b32.xlu0 %v1639_v14, %s3054_s12  ;;  %v1948_v63 = vpop.permute.xlu1 %1947 }
 0x305   : > { %2016 = vst.msk [vmem:[#allocation2 + $0x58] sm:$0xf] %vm1993_vm7, %v1948_v63  ;;  %v1918_v19 = vpop.permute.xlu2 %1917 }
 0x306   : > { %v2069_v26 = vpop.permute.xlu0 %2068 }
 0x307   : > { %2137 = vst.msk [vmem:[#allocation2 + $0x58] sm:$0xf] %vm2114_vm8, %v2069_v26 }
 0x30a   : > { %2080 = vrot.lane.b32.xlu1 %v4161_v29, %s3054_s12 }
 0x30b   : > { %1959 = vrot.lane.b32.xlu2 %v4056_v43, %s3053_s11  ;;  %v2878_v43 = vunpack.c.l.bf16 %v2921_v22 }
 0x30c   : > { %1800 = vrot.lane.b32.xlu0 %v4138_v20, %s3052_s10  ;;  %v2071_v11 = vpop.permute.xlu1 %2070  ;;  %v5219_v20 = vld [vmem:[#allocation48_spill] sm:$0xff] }
 0x30d   : > { %2138 = vst.msk [vmem:[#allocation2 + $0x5c] sm:$0xf] %vm2114_vm8, %v2071_v11  ;;  %v1689_v33 = vpop.permute.xlu2 %1688 }
 0x30e   : > { %1761 = vst.msk [vmem:[#allocation2 + $0x60] sm:$0xf] %vm1736_vm3, %v1689_v33  ;;  %v1789_v9 = vpop.permute.xlu0 %1788 }
 0x30f   : > { %1875 = vst.msk [vmem:[#allocation2 + $0x1c] sm:$0xf] %vm1867_vm0, %v1789_v9 }
 0x310   : > { %2001 = vst.msk [vmem:[#allocation2 + $0x1c] sm:$0xf] %vm1993_vm7, %v1918_v19  ;;  %v2914_v19 = vld [vmem:[%s5007_s5 + $0x20] sm:$0xff]  }
 0x311   : > { %v2850_v9 = vunpack.c.l.bf16 %v2914_v19  ;;  %v2851_v22 = vunpack.c.h.bf16 %v2914_v19 }
 0x312   : > { %1927 = vrot.lane.b32.xlu1 %v3972_v2, %s3053_s11 }
 0x313   : > { %1798 = vrot.lane.b32.xlu2 %v5219_v20, %s3052_s10 }
 0x314   : > { %2048 = vrot.lane.b32.xlu0 %v4261_v1, %s3054_s12  ;;  %v1916_v47 = vpop.permute.xlu1 %1915  ;;  %v2906_v18 = vld [vmem:[#allocation2 + $0x58] sm:$0xff]  }
 0x315   : > { %2000 = vst.msk [vmem:[#allocation2 + $0x18] sm:$0xf] %vm1993_vm7, %v1916_v47  ;;  %v1825_v36 = vpop.permute.xlu2 %1824  ;;  %v2814_v60 = vunpack.c.l.bf16 %v2906_v18  ;;  %v2815_v39 = vunpack.c.h.bf16 %v2906_v18 }
 0x316   : > { %v2037_v42 = vpop.permute.xlu0 %2036 }
 0x317   : > { %2121 = vst.msk [vmem:[#allocation2 + $0x18] sm:$0xf] %vm2114_vm8, %v2037_v42  ;;  %v2299_v12 = vmul.f32 %v2878_v43, %v2814_v60  ;;  %v2300_v2 = vmul.f32 %v2879_v24, %v2815_v39 }
 0x319   : > { %v2320_v59 = vpack.c.bf16 %v2300_v2, %v2299_v12 }
 0x31a   : > { %2050 = vrot.lane.b32.xlu1 %v4290_v44, %s3054_s12  ;;  %v2913_v44 = vld [vmem:[%s5007_s5 + $0x18] sm:$0xff]  }
 0x31b   : > { %1929 = vrot.lane.b32.xlu2 %v4092_v57, %s3053_s11  ;;  %2739 = vmatmul.msk.bf16.gmra.mxu2 %vm2349_vm10, %v2320_v59  ;;  %v2846_v57 = vunpack.c.l.bf16 %v2913_v44  ;;  %v2847_v51 = vunpack.c.h.bf16 %v2913_v44 }
 0x31c   : > { %1702 = vrot.lane.b32.xlu0 %v1639_v14, %s3051_s9  ;;  %v2039_v1 = vpop.permute.xlu1 %2038 }
 0x31d   : > { %2122 = vst.msk [vmem:[#allocation2 + $0x1c] sm:$0xf] %vm2114_vm8, %v2039_v1  ;;  %v2073_v7 = vpop.permute.xlu2 %2072 }
 0x31e   : > { %v1691_v48 = vpop.permute.xlu0 %1690 }
 0x31f   : > { %1762 = vst.msk [vmem:[#allocation2 + $0x64] sm:$0xf] %vm1736_vm3, %v1691_v48 }
 0x320   : > { %1893 = vst.msk [vmem:[#allocation2 + $0x64] sm:$0xf] %vm1867_vm0, %v1825_v36 }
 0x322   : > { %1834 = vrot.lane.b32.xlu1 %v1773_v8, %s3052_s10 }
 0x323   : > { %1700 = vrot.lane.b32.xlu2 %v4161_v29, %s3051_s9  ;;  %s243_s9 = sand.u32 1, %s3036_s22  }
 0x324   : > { %1804 = vrot.lane.b32.xlu0 %v4192_v61, %s3052_s10  ;;  %v1823_v49 = vpop.permute.xlu1 %1822  ;;  %v2898_v34 = vld [vmem:[#allocation2 + $0x18] sm:$0xff]   ;;  %v4781_v61 = vld [vmem:[%s5006_s4] ss:$0 sm:$0xff]  ;;  %s2637_s17 = sshll.u32 %s243_s9, 7  ;;  %s2556_s25 = scalar_lea.sflag [#allocation4], %s243_s9 }
 0x325   : > { %1892 = vst.msk [vmem:[#allocation2 + $0x60] sm:$0xf] %vm1867_vm0, %v1823_v49  ;;  %v1793_v55 = vpop.permute.xlu2 %1792  ;;  %v2782_v23 = vunpack.c.l.bf16 %v2898_v34  ;;  %v2783_v62 = vunpack.c.h.bf16 %v2898_v34  ;;  %s4795_s20 = scalar_lea.vmem [#allocation3], %s2637_s17  ;;  %s2998_s17 = scalar_lea.hbm %s2997_s16, 128 }
 0x326   : > { %1877 = vst.msk [vmem:[#allocation2 + $0x24] sm:$0xf] %vm1867_vm0, %v1793_v55  ;;  %v1952_v16 = vpop.permute.xlu0 %1951  ;;  %s2568_s14 = sshll.u32 %s4795_s20, 4  ;;  %p2999_p11 = scmp.ne.s32.totalorder %s2997_s16, %s2998_s17  ;;  %s2569_s14 = int_to_ptr.vmem [resolvable:$true] %s2568_s14 }
 0x327   : > { %2018 = vst.msk [vmem:[#allocation2 + $0x60] sm:$0xf] %vm1993_vm7, %v1952_v16  ;;  %v2283_v29 = vmul.f32 %v2846_v57, %v2782_v23  ;;  %v2284_v56 = vmul.f32 %v2847_v51, %v2783_v62  ;;  %v2923_v51 = vld [vmem:[%s5007_s5 + $0x68] sm:$0xff]  }
 0x328   : > { %2139 = vst.msk [vmem:[#allocation2 + $0x60] sm:$0xf] %vm2114_vm8, %v2073_v7  ;;  %v2886_v62 = vunpack.c.l.bf16 %v2923_v51  ;;  %v2887_v16 = vunpack.c.h.bf16 %v2923_v51  ;;  %p3000_p12 = pnand %p2999_p11, %p3129_p5 }
 0x329   : > { %v2312_v4 = vpack.c.bf16 %v2284_v56, %v2283_v29 }
 0x32a   : > { %1931 = vrot.lane.b32.xlu1 %v4096_v35, %s3053_s11  ;;  %p3001_p13 = pneg %p3000_p12 }
 0x32b   : > { %1802 = vrot.lane.b32.xlu2 %v4156_v40, %s3052_s10  ;;  %2731 = vmatmul.msk.bf16.gmra.mxu1 %vm2349_vm10, %v2312_v4 }
 0x32c   : > { %2052 = vrot.lane.b32.xlu0 %v4322_v52, %s3054_s12  ;;  %v1954_v45 = vpop.permute.xlu1 %1953  ;;  %v2922_v52 = vld [vmem:[%s5007_s5 + $0x60] sm:$0xff]  }
 0x32d   : > { %2019 = vst.msk [vmem:[#allocation2 + $0x64] sm:$0xf] %vm1993_vm7, %v1954_v45  ;;  %v2041_v28 = vpop.permute.xlu2 %2040  ;;  %v2882_v46 = vunpack.c.l.bf16 %v2922_v52  ;;  %v2883_v32 = vunpack.c.h.bf16 %v2922_v52 }
 0x32e   : > { %v2075_v35 = vpop.permute.xlu0 %2074  ;;  %v2450_v15 = vpop.f32.mrf.mxu2 }
 0x32f   : > { %2140 = vst.msk [vmem:[#allocation2 + $0x64] sm:$0xf] %vm2114_vm8, %v2075_v35  ;;  %v2451_v40 = vadd.f32 %v4781_v61, %v2450_v15 }
 0x331   : > { %v2506_v37 = vpack.c.bf16 %v2451_v40, %v2451_v40 }
 0x332   : > { %2054 = vrot.lane.b32.xlu1 %v4299_v21, %s3054_s12 }
 0x333   : > { %2539 = vst.msk [vmem:[%s4795_s20 + $0x40] sm:$0xf] %vm2522_vm11, %v2506_v37  ;;  %1933 = vrot.lane.b32.xlu2 %v3780_v13, %s3053_s11  ;;  %s3002_s11 = scalar_lea.hbm %s5008_s6, 256 }
 0x334   : > { %v1791_v41 = vpop.permute.xlu1 %1790  ;;  %p3004_p1 = scmp.lt.s32.totalorder %s3002_s11, %s2998_s17 }
 0x335   : > { %1876 = vst.msk [vmem:[#allocation2 + $0x20] sm:$0xf] %vm1867_vm0, %v1791_v41  ;;  %v1695_v53 = vpop.permute.xlu2 %1694 }
 0x336   : > { %1764 = vst.msk [vmem:[#allocation2 + $0x6c] sm:$0xf] %vm1736_vm3, %v1695_v53  ;;  %v1920_v21 = vpop.permute.xlu0 %1919  ;;  %v2452_v50 = vpop.f32.mrf.mxu2  ;;  %v2907_v17 = vld [vmem:[#allocation2 + $0x60] sm:$0xff]   ;;  %p3005_p2 = por %p3004_p1, %p3003_p0 }
 0x337   : > { %2002 = vst.msk [vmem:[#allocation2 + $0x20] sm:$0xf] %vm1993_vm7, %v1920_v21  ;;  %v2453_v5 = vadd.f32 %v4781_v61, %v2452_v50  ;;  %v2818_v58 = vunpack.c.l.bf16 %v2907_v17  ;;  %v2819_v27 = vunpack.c.h.bf16 %v2907_v17 }
 0x338   : > { %2123 = vst.msk [vmem:[#allocation2 + $0x20] sm:$0xf] %vm2114_vm8, %v2041_v28  ;;  %v2410_v13 = vpop.f32.mrf.mxu1  ;;  %p3006_p3 = pnand %p3005_p2, %p3001_p13 }
 0x339   : > { %v2507_v0 = vpack.c.bf16 %v2453_v5, %v2453_v5  ;;  %v2411_v3 = vadd.f32 %v4781_v61, %v2410_v13  ;;  %v2301_v6 = vmul.f32 %v2882_v46, %v2818_v58  ;;  %v2302_v10 = vmul.f32 %v2883_v32, %v2819_v27  ;;  %v2915_v58 = vld [vmem:[%s5007_s5 + $0x28] sm:$0xff]  }
 0x33a   : > { %v2854_v27 = vunpack.c.l.bf16 %v2915_v58  ;;  %v2855_v13 = vunpack.c.h.bf16 %v2915_v58 }
 0x33b   : > { %2540 = vst.msk [vmem:[%s4795_s20 + $0x44] sm:$0xf] %vm2522_vm11, %v2507_v0  ;;  %v2490_v25 = vpack.c.bf16 %v2411_v3, %v2411_v3  ;;  %v2321_v54 = vpack.c.bf16 %v2302_v10, %v2301_v6 }
 0x33c   : > { %v1922_v31 = vpop.permute.xlu1 %1921 }
 0x33d   : > { %2523 = vst.msk [vmem:[%s4795_s20] sm:$0xf] %vm2522_vm11, %v2490_v25  ;;  %v1956_v30 = vpop.permute.xlu2 %1955  ;;  %2740 = vmatmul.msk.bf16.gmra.mxu2 %vm2349_vm10, %v2321_v54 }
 0x33e   : > { %2003 = vst.msk [vmem:[#allocation2 + $0x24] sm:$0xf] %vm1993_vm7, %v1922_v31  ;;  %v2043_v38 = vpop.permute.xlu0 %2042 }
 0x33f   : > { %2124 = vst.msk [vmem:[#allocation2 + $0x24] sm:$0xf] %vm2114_vm8, %v2043_v38 }
 0x340   : > { %v2412_v14 = vpop.f32.mrf.mxu1 }
 0x341   : > { %v2413_v63 = vadd.f32 %v4781_v61, %v2412_v14 }
 0x343   : > { %v2491_v26 = vpack.c.bf16 %v2413_v63, %v2413_v63 }
 0x344   : > { %v1693_v11 = vpop.permute.xlu1 %1692 }
 0x345   : > { %2524 = vst.msk [vmem:[%s4795_s20 + $0x4] sm:$0xf] %vm2522_vm11, %v2491_v26  ;;  %v2079_v33 = vpop.permute.xlu2 %2078 }
 0x346   : > { %1763 = vst.msk [vmem:[#allocation2 + $0x68] sm:$0xf] %vm1736_vm3, %v1693_v11  ;;  %v1827_v20 = vpop.permute.xlu0 %1826  ;;  %v2899_v43 = vld [vmem:[#allocation2 + $0x20] sm:$0xff]  }
 0x347   : > { %1894 = vst.msk [vmem:[#allocation2 + $0x68] sm:$0xf] %vm1867_vm0, %v1827_v20  ;;  %v2786_v24 = vunpack.c.l.bf16 %v2899_v43  ;;  %v2787_v47 = vunpack.c.h.bf16 %v2899_v43 }
 0x348   : > { %2020 = vst.msk [vmem:[#allocation2 + $0x68] sm:$0xf] %vm1993_vm7, %v1956_v30 }
 0x349   : > { %v2285_v18 = vmul.f32 %v2850_v9, %v2786_v24  ;;  %v2286_v36 = vmul.f32 %v2851_v22, %v2787_v47  ;;  %v2924_v47 = vld [vmem:[%s5007_s5 + $0x70] sm:$0xff]  }
 0x34b   : > { %v2313_v60 = vpack.c.bf16 %v2286_v36, %v2285_v18 }
 0x34c   : > { %v1829_v39 = vpop.permute.xlu1 %1828 }
 0x34d   : > { %1895 = vst.msk [vmem:[#allocation2 + $0x6c] sm:$0xf] %vm1867_vm0, %v1829_v39  ;;  %v1699_v42 = vpop.permute.xlu2 %1698  ;;  %2732 = vmatmul.msk.bf16.gmra.mxu1 %vm2349_vm10, %v2313_v60  ;;  %v2890_v39 = vunpack.c.l.bf16 %v2924_v47 }
 0x34e   : > { %1766 = vst.msk [vmem:[#allocation2 + $0x74] sm:$0xf] %vm1736_vm3, %v1699_v42  ;;  %v1958_v12 = vpop.permute.xlu0 %1957  ;;  %v2891_v42 = vunpack.c.h.bf16 %v2924_v47 }
 0x34f   : > { %2021 = vst.msk [vmem:[#allocation2 + $0x6c] sm:$0xf] %vm1993_vm7, %v1958_v12 }
 0x350   : > { %2142 = vst.msk [vmem:[#allocation2 + $0x6c] sm:$0xf] %vm2114_vm8, %v2079_v33  ;;  %v2455_v2 = vpop.f32.mrf.mxu2 }
 0x351   : > { %v2456_v59 = vadd.f32 %v4781_v61, %v2455_v2 }
 0x353   : > { %v2508_v1 = vpack.c.bf16 %v2456_v59, %v2456_v59 }
 0x354   : > { %v2077_v7 = vpop.permute.xlu1 %2076 }
 0x355   : > { %2541 = vst.msk [vmem:[%s4795_s20 + $0x48] sm:$0xf] %vm2522_vm11, %v2508_v1  ;;  %v1833_v48 = vpop.permute.xlu2 %1832 }
 0x356   : > { %2141 = vst.msk [vmem:[#allocation2 + $0x68] sm:$0xf] %vm2114_vm8, %v2077_v7  ;;  %v1795_v8 = vpop.permute.xlu0 %1794 }
 0x357   : > { %1897 = vst.msk [vmem:[#allocation2 + $0x74] sm:$0xf] %vm1867_vm0, %v1833_v48 }
 0x358   : > { %1878 = vst.msk [vmem:[#allocation2 + $0x28] sm:$0xf] %vm1867_vm0, %v1795_v8  ;;  %v2457_v44 = vpop.f32.mrf.mxu2 }
 0x359   : > { %v2458_v57 = vadd.f32 %v4781_v61, %v2457_v44 }
 0x35a   : > { %v2415_v49 = vpop.f32.mrf.mxu1 }
 0x35b   : > { %v2509_v34 = vpack.c.bf16 %v2458_v57, %v2458_v57  ;;  %v2416_v55 = vadd.f32 %v4781_v61, %v2415_v49 }
 0x35c   : > { %v1797_v23 = vpop.permute.xlu1 %1796 }
 0x35d   : > { %2542 = vst.msk [vmem:[%s4795_s20 + $0x4c] sm:$0xf] %vm2522_vm11, %v2509_v34  ;;  %v2492_v29 = vpack.c.bf16 %v2416_v55, %v2416_v55  ;;  %v1962_v56 = vpop.permute.xlu2 %1961  ;;  %v2908_v4 = vld [vmem:[#allocation2 + $0x68] sm:$0xff]  }
 0x35e   : > { %1879 = vst.msk [vmem:[#allocation2 + $0x2c] sm:$0xf] %vm1867_vm0, %v1797_v23  ;;  %v1924_v45 = vpop.permute.xlu0 %1923  ;;  %v2822_v28 = vunpack.c.l.bf16 %v2908_v4  ;;  %v2823_v35 = vunpack.c.h.bf16 %v2908_v4 }
 0x35f   : > { %2525 = vst.msk [vmem:[%s4795_s20 + $0x8] sm:$0xf] %vm2522_vm11, %v2492_v29  ;;  %v2916_v29 = vld [vmem:[%s5007_s5 + $0x30] sm:$0xff]  }
 0x360   : > { %2023 = vst.msk [vmem:[#allocation2 + $0x74] sm:$0xf] %vm1993_vm7, %v1962_v56  ;;  %v2303_v15 = vmul.f32 %v2886_v62, %v2822_v28  ;;  %v2304_v40 = vmul.f32 %v2887_v16, %v2823_v35  ;;  %v1770_v62 = vld [vmem:[#allocation2 + $0x7c] sm:$0xf]  ;;  %v2859_v28 = vunpack.c.h.bf16 %v2916_v29 }
 0x361   : > { %2004 = vst.msk [vmem:[#allocation2 + $0x28] sm:$0xf] %vm1993_vm7, %v1924_v45  ;;  %v2858_v45 = vunpack.c.l.bf16 %v2916_v29 }
 0x362   : > { %v2417_v37 = vpop.f32.mrf.mxu1  ;;  %v2322_v52 = vpack.c.bf16 %v2304_v40, %v2303_v15 }
 0x363   : > { %v2418_v41 = vadd.f32 %v4781_v61, %v2417_v37 }
 0x364   : > { %2741 = vmatmul.msk.bf16.gmra.mxu2 %vm2349_vm10, %v2322_v52  ;;  %v1926_v53 = vpop.permute.xlu1 %1925 }
 0x365   : > { %v2493_v46 = vpack.c.bf16 %v2418_v41, %v2418_v41  ;;  %2005 = vst.msk [vmem:[#allocation2 + $0x2c] sm:$0xf] %vm1993_vm7, %v1926_v53  ;;  %v1960_v32 = vpop.permute.xlu2 %1959 }
 0x366   : > { %v2045_v21 = vpop.permute.xlu0 %2044 }
 0x367   : > { %2526 = vst.msk [vmem:[%s4795_s20 + $0xc] sm:$0xf] %vm2522_vm11, %v2493_v46  ;;  %v2146_v31 = vld [vmem:[#allocation2 + $0x74] sm:$0xf] }
 0x368   : > { %2125 = vst.msk [vmem:[#allocation2 + $0x28] sm:$0xf] %vm2114_vm8, %v2045_v21 }
 0x36c   : > { %v2047_v50 = vpop.permute.xlu1 %2046 }
 0x36d   : > { %2126 = vst.msk [vmem:[#allocation2 + $0x2c] sm:$0xf] %vm2114_vm8, %v2047_v50  ;;  %v1799_v17 = vpop.permute.xlu2 %1798 }
 0x36e   : > { %1880 = vst.msk [vmem:[#allocation2 + $0x30] sm:$0xf] %vm1867_vm0, %v1799_v17  ;;  %v1697_v5 = vpop.permute.xlu0 %1696 }
 0x36f   : > { %1765 = vst.msk [vmem:[#allocation2 + $0x70] sm:$0xf] %vm1736_vm3, %v1697_v5 }
 0x374   : > { %v1831_v0 = vpop.permute.xlu1 %1830  ;;  %v2900_v3 = vld [vmem:[#allocation2 + $0x28] sm:$0xff]  }
 0x375   : > { %1896 = vst.msk [vmem:[#allocation2 + $0x70] sm:$0xf] %vm1867_vm0, %v1831_v0  ;;  %v1930_v6 = vpop.permute.xlu2 %1929  ;;  %v2790_v10 = vunpack.c.l.bf16 %v2900_v3  ;;  %v2791_v25 = vunpack.c.h.bf16 %v2900_v3 }
 0x376   : > { %2022 = vst.msk [vmem:[#allocation2 + $0x70] sm:$0xf] %vm1993_vm7, %v1960_v32  ;;  %v2083_v54 = vpop.permute.xlu0 %2082  ;;  %v2460_v30 = vpop.f32.mrf.mxu2  ;;  %v2925_v32 = vld [vmem:[%s5007_s5 + $0x78] sm:$0xff]  }
 0x377   : > { %v2147_v38 = vsel %vm2145_vm12, %v2083_v54, %v2146_v31  ;;  %v2461_v14 = vadd.f32 %v4781_v61, %v2460_v30  ;;  %v2287_v63 = vmul.f32 %v2854_v27, %v2790_v10  ;;  %v2288_v19 = vmul.f32 %v2855_v13, %v2791_v25 }
 0x378   : > { %2148 = vst [vmem:[#allocation2 + $0x74] sm:$0xf] %v2147_v38  ;;  %v2894_v17 = vunpack.c.l.bf16 %v2925_v32  ;;  %v2895_v5 = vunpack.c.h.bf16 %v2925_v32 }
 0x379   : > { %v2510_v26 = vpack.c.bf16 %v2461_v14, %v2461_v14  ;;  %v2314_v11 = vpack.c.bf16 %v2288_v19, %v2287_v63  ;;  %v2917_v19 = vld [vmem:[%s5007_s5 + $0x38] sm:$0xff]  }
 0x37b   : > { %2543 = vst.msk [vmem:[%s4795_s20 + $0x50] sm:$0xf] %vm2522_vm11, %v2510_v26  ;;  %2733 = vmatmul.msk.bf16.gmra.mxu1 %vm2349_vm10, %v2314_v11 }
 0x37c   : > { %v2081_v33 = vpop.permute.xlu1 %2080 }
 0x37d   : > { %2143 = vst.msk [vmem:[#allocation2 + $0x70] sm:$0xf] %vm2114_vm8, %v2081_v33  ;;  %v1701_v9 = vpop.permute.xlu2 %1700 }
 0x37e   : > { %1767 = vst.msk [vmem:[#allocation2 + $0x78] sm:$0xf] %vm1736_vm3, %v1701_v9  ;;  %v1801_v22 = vpop.permute.xlu0 %1800  ;;  %v2462_v20 = vpop.f32.mrf.mxu2  ;;  %v2862_v9 = vunpack.c.l.bf16 %v2917_v19 }
 0x37f   : > { %1881 = vst.msk [vmem:[#allocation2 + $0x34] sm:$0xf] %vm1867_vm0, %v1801_v22  ;;  %v2463_v43 = vadd.f32 %v4781_v61, %v2462_v20  ;;  %v2863_v22 = vunpack.c.h.bf16 %v2917_v19 }
 0x380   : > { %2007 = vst.msk [vmem:[#allocation2 + $0x34] sm:$0xf] %vm1993_vm7, %v1930_v6  ;;  %v2420_v24 = vpop.f32.mrf.mxu1 }
 0x381   : > { %v2511_v18 = vpack.c.bf16 %v2463_v43, %v2463_v43  ;;  %v2421_v36 = vadd.f32 %v4781_v61, %v2420_v24 }
 0x383   : > { %2544 = vst.msk [vmem:[%s4795_s20 + $0x54] sm:$0xf] %vm2522_vm11, %v2511_v18  ;;  %v2494_v60 = vpack.c.bf16 %v2421_v36, %v2421_v36 }
 0x384   : > { %v1928_v12 = vpop.permute.xlu1 %1927  ;;  %v2909_v2 = vld [vmem:[#allocation2 + $0x70] sm:$0xff]  }
 0x385   : > { %2527 = vst.msk [vmem:[%s4795_s20 + $0x10] sm:$0xf] %vm2522_vm11, %v2494_v60  ;;  %v1803_v59 = vpop.permute.xlu2 %1802  ;;  %v2826_v1 = vunpack.c.l.bf16 %v2909_v2  ;;  %v2827_v7 = vunpack.c.h.bf16 %v2909_v2  ;;  %v1900_v56 = vld [vmem:[#allocation2 + $0x78] sm:$0x1] }
 0x386   : > { %2006 = vst.msk [vmem:[#allocation2 + $0x30] sm:$0xf] %vm1993_vm7, %v1928_v12  ;;  %v2049_v48 = vpop.permute.xlu0 %2048 }
 0x387   : > { %1882 = vst.msk [vmem:[#allocation2 + $0x38] sm:$0xf] %vm1867_vm0, %v1803_v59  ;;  %v2305_v8 = vmul.f32 %v2890_v39, %v2826_v1  ;;  %v2306_v44 = vmul.f32 %v2891_v42, %v2827_v7 }
 0x388   : > { %2127 = vst.msk [vmem:[#allocation2 + $0x30] sm:$0xf] %vm2114_vm8, %v2049_v48  ;;  %v2422_v57 = vpop.f32.mrf.mxu1 }
 0x389   : > { %v2423_v51 = vadd.f32 %v4781_v61, %v2422_v57  ;;  %v2323_v49 = vpack.c.bf16 %v2306_v44, %v2305_v8 }
 0x38b   : > { %v2495_v34 = vpack.c.bf16 %v2423_v51, %v2423_v51  ;;  %2742 = vmatmul.msk.bf16.gmra.mxu2 %vm2349_vm10, %v2323_v49 }
 0x38c   : > { %v2051_v55 = vpop.permute.xlu1 %2050 }
 0x38d   : > { %2528 = vst.msk [vmem:[%s4795_s20 + $0x14] sm:$0xf] %vm2522_vm11, %v2495_v34  ;;  %v1934_v41 = vpop.permute.xlu2 %1933 }
 0x38e   : > { %2128 = vst.msk [vmem:[#allocation2 + $0x34] sm:$0xf] %vm2114_vm8, %v2051_v55  ;;  %v1703_v23 = vpop.permute.xlu0 %1702 }
 0x38f   : > { %v1771_v16 = vsel %vm1769_vm13, %v1703_v23, %v1770_v62 }
 0x390   : > { %1772 = vst [vmem:[#allocation2 + $0x7c] sm:$0xf] %v1771_v16 }
 0x394   : > { %v1835_v4 = vpop.permute.xlu1 %1834 }
 0x395   : > { %v1901_v35 = vsel %vm1899_vm15, %v1835_v4, %v1900_v56  ;;  %v2901_v15 = vld [vmem:[#allocation2 + $0x30] sm:$0xff]  }
 0x396   : > { %1902 = vst [vmem:[#allocation2 + $0x78] sm:$0x1] %v1901_v35  ;;  %v1805_v40 = vpop.permute.xlu0 %1804  ;;  %v2794_v37 = vunpack.c.l.bf16 %v2901_v15  ;;  %v2795_v52 = vunpack.c.h.bf16 %v2901_v15 }
 0x397   : > { %1883 = vst.msk [vmem:[#allocation2 + $0x3c] sm:$0xf] %vm1867_vm0, %v1805_v40 }
 0x398   : > { %2009 = vst.msk [vmem:[#allocation2 + $0x3c] sm:$0xf] %vm1993_vm7, %v1934_v41  ;;  %v2289_v53 = vmul.f32 %v2858_v45, %v2794_v37  ;;  %v2290_v46 = vmul.f32 %v2859_v28, %v2795_v52 }
 0x39a   : > { %v2315_v21 = vpack.c.bf16 %v2290_v46, %v2289_v53 }
 0x39c   : > { %2734 = vmatmul.msk.bf16.gmra.mxu1 %vm2349_vm10, %v2315_v21  ;;  %v1932_v50 = vpop.permute.xlu1 %1931 }
 0x39d   : > { %2008 = vst.msk [vmem:[#allocation2 + $0x38] sm:$0xf] %vm1993_vm7, %v1932_v50  ;;  %v2910_v58 = vld [vmem:[#allocation2 + $0x78] sm:$0xff]  }
 0x39e   : > { %v2053_v27 = vpop.permute.xlu0 %2052  ;;  %v2465_v13 = vpop.f32.mrf.mxu2  ;;  %v2830_v0 = vunpack.c.l.bf16 %v2910_v58  ;;  %v2831_v3 = vunpack.c.h.bf16 %v2910_v58 }
 0x39f   : > { %2129 = vst.msk [vmem:[#allocation2 + $0x38] sm:$0xf] %vm2114_vm8, %v2053_v27  ;;  %v2466_v6 = vadd.f32 %v4781_v61, %v2465_v13 }
 0x3a0   : > { %v2307_v10 = vmul.f32 %v2894_v17, %v2830_v0  ;;  %v2308_v25 = vmul.f32 %v2895_v5, %v2831_v3 }
 0x3a1   : > { %v2512_v54 = vpack.c.bf16 %v2466_v6, %v2466_v6 }
 0x3a2   : > { %v2324_v31 = vpack.c.bf16 %v2308_v25, %v2307_v10 }
 0x3a3   : > { %2545 = vst.msk [vmem:[%s4795_s20 + $0x58] sm:$0xf] %vm2522_vm11, %v2512_v54 }
 0x3a4   : > { %2743 = vmatmul.msk.bf16.gmra.mxu2 %vm2349_vm10, %v2324_v31  ;;  %v2055_v30 = vpop.permute.xlu1 %2054 }
 0x3a5   : > { %2130 = vst.msk [vmem:[#allocation2 + $0x3c] sm:$0xf] %vm2114_vm8, %v2055_v30 }
 0x3a6   : > { %v2467_v38 = vpop.f32.mrf.mxu2 }
 0x3a7   : > { %v2468_v14 = vadd.f32 %v4781_v61, %v2467_v38 }
 0x3a8   : > { %v2425_v63 = vpop.f32.mrf.mxu1 }
 0x3a9   : > { %v2513_v26 = vpack.c.bf16 %v2468_v14, %v2468_v14  ;;  %v2426_v11 = vadd.f32 %v4781_v61, %v2425_v63 }
 0x3ab   : > { %2546 = vst.msk [vmem:[%s4795_s20 + $0x5c] sm:$0xf] %vm2522_vm11, %v2513_v26  ;;  %v2496_v33 = vpack.c.bf16 %v2426_v11, %v2426_v11 }
 0x3ac   : > { %v2902_v20 = vld [vmem:[#allocation2 + $0x38] sm:$0xff]  }
 0x3ad   : > { %2529 = vst.msk [vmem:[%s4795_s20 + $0x18] sm:$0xf] %vm2522_vm11, %v2496_v33  ;;  %v2798_v43 = vunpack.c.l.bf16 %v2902_v20  ;;  %v2799_v24 = vunpack.c.h.bf16 %v2902_v20 }
 0x3af   : > { %v2291_v47 = vmul.f32 %v2862_v9, %v2798_v43  ;;  %v2292_v18 = vmul.f32 %v2863_v22, %v2799_v24 }
 0x3b0   : > { %v2427_v36 = vpop.f32.mrf.mxu1 }
 0x3b1   : > { %v2428_v60 = vadd.f32 %v4781_v61, %v2427_v36  ;;  %v2316_v39 = vpack.c.bf16 %v2292_v18, %v2291_v47 }
 0x3b3   : > { %v2497_v42 = vpack.c.bf16 %v2428_v60, %v2428_v60  ;;  %2735 = vmatmul.msk.bf16.gmra.mxu1 %vm2349_vm10, %v2316_v39 }
 0x3b5   : > { %2530 = vst.msk [vmem:[%s4795_s20 + $0x1c] sm:$0xf] %vm2522_vm11, %v2497_v42 }
 0x3c0   : > { %v2470_v12 = vpop.f32.mrf.mxu2 }
 0x3c1   : > { %v2471_v2 = vadd.f32 %v4781_v61, %v2470_v12 }
 0x3c3   : > { %v2514_v59 = vpack.c.bf16 %v2471_v2, %v2471_v2 }
 0x3c5   : > { %2547 = vst.msk [vmem:[%s4795_s20 + $0x60] sm:$0xf] %vm2522_vm11, %v2514_v59 }
 0x3c8   : > { %v2472_v1 = vpop.f32.mrf.mxu2 }
 0x3c9   : > { %v2473_v7 = vadd.f32 %v4781_v61, %v2472_v1 }
 0x3ca   : > { %v2430_v48 = vpop.f32.mrf.mxu1 }
 0x3cb   : > { %v2515_v8 = vpack.c.bf16 %v2473_v7, %v2473_v7  ;;  %v2431_v44 = vadd.f32 %v4781_v61, %v2430_v48 }
 0x3cd   : > { %2548 = vst.msk [vmem:[%s4795_s20 + $0x64] sm:$0xf] %vm2522_vm11, %v2515_v8  ;;  %v2498_v57 = vpack.c.bf16 %v2431_v44, %v2431_v44 }
 0x3cf   : > { %2531 = vst.msk [vmem:[%s4795_s20 + $0x20] sm:$0xf] %vm2522_vm11, %v2498_v57 }
 0x3d2   : > { %v2432_v51 = vpop.f32.mrf.mxu1 }
 0x3d3   : > { %v2433_v49 = vadd.f32 %v4781_v61, %v2432_v51 }
 0x3d5   : > { %v2499_v34 = vpack.c.bf16 %v2433_v49, %v2433_v49 }
 0x3d7   : > { %2532 = vst.msk [vmem:[%s4795_s20 + $0x24] sm:$0xf] %vm2522_vm11, %v2499_v34 }
 0x3e7   : > { %v2475_v55 = vpop.f32.mrf.mxu2 }
 0x3e8   : > { %v2476_v23 = vadd.f32 %v4781_v61, %v2475_v55 }
 0x3ea   : > { %v2516_v62 = vpack.c.bf16 %v2476_v23, %v2476_v23 }
 0x3ec   : > { %2549 = vst.msk [vmem:[%s4795_s20 + $0x68] sm:$0xf] %vm2522_vm11, %v2516_v62 }
 0x3ef   : > { %v2477_v16 = vpop.f32.mrf.mxu2 }
 0x3f0   : > { %v2478_v29 = vadd.f32 %v4781_v61, %v2477_v16 }
 0x3f2   : > { %v2517_v56 = vpack.c.bf16 %v2478_v29, %v2478_v29 }
 0x3f4   : > { %2550 = vst.msk [vmem:[%s4795_s20 + $0x6c] sm:$0xf] %vm2522_vm11, %v2517_v56 }
 0x3f8   : > { %v2435_v4 = vpop.f32.mrf.mxu1 }
 0x3f9   : > { %v2436_v45 = vadd.f32 %v4781_v61, %v2435_v4 }
 0x3fb   : > { %v2500_v28 = vpack.c.bf16 %v2436_v45, %v2436_v45 }
 0x3fd   : > { %2533 = vst.msk [vmem:[%s4795_s20 + $0x28] sm:$0xf] %vm2522_vm11, %v2500_v28 }
 0x400   : > { %v2437_v35 = vpop.f32.mrf.mxu1 }
 0x401   : > { %v2438_v15 = vadd.f32 %v4781_v61, %v2437_v35 }
 0x403   : > { %v2501_v40 = vpack.c.bf16 %v2438_v15, %v2438_v15 }
 0x405   : > { %2534 = vst.msk [vmem:[%s4795_s20 + $0x2c] sm:$0xf] %vm2522_vm11, %v2501_v40 }
 0x40e   : > { %v2480_v37 = vpop.f32.mrf.mxu2 }
 0x40f   : > { %v2481_v52 = vadd.f32 %v4781_v61, %v2480_v37 }
 0x411   : > { %v2518_v41 = vpack.c.bf16 %v2481_v52, %v2481_v52 }
 0x413   : > { %2551 = vst.msk [vmem:[%s4795_s20 + $0x70] sm:$0xf] %vm2522_vm11, %v2518_v41 }
 0x416   : > { %v2482_v53 = vpop.f32.mrf.mxu2 }
 0x417   : > { %v2483_v46 = vadd.f32 %v4781_v61, %v2482_v53 }
 0x419   : > { %v2519_v32 = vpack.c.bf16 %v2483_v46, %v2483_v46  ;;  %v2440_v21 = vpop.f32.mrf.mxu1 }
 0x41a   : > { %v2441_v50 = vadd.f32 %v4781_v61, %v2440_v21 }
 0x41b   : > { %2552 = vst.msk [vmem:[%s4795_s20 + $0x74] sm:$0xf] %vm2522_vm11, %v2519_v32 }
 0x41c   : > { %v2502_v17 = vpack.c.bf16 %v2441_v50, %v2441_v50 }
 0x41e   : > { %2535 = vst.msk [vmem:[%s4795_s20 + $0x30] sm:$0xf] %vm2522_vm11, %v2502_v17 }
 0x421   : > { %v2442_v5 = vpop.f32.mrf.mxu1 }
 0x422   : > { %v2443_v58 = vadd.f32 %v4781_v61, %v2442_v5 }
 0x424   : > { %v2503_v27 = vpack.c.bf16 %v2443_v58, %v2443_v58 }
 0x426   : > { %2536 = vst.msk [vmem:[%s4795_s20 + $0x34] sm:$0xf] %vm2522_vm11, %v2503_v27 }
 0x427   : > { %v2485_v13 = vpop.f32.mrf.mxu2 }
 0x428   : > { %v2486_v0 = vadd.f32 %v4781_v61, %v2485_v13 }
 0x42a   : > { %v2520_v3 = vpack.c.bf16 %v2486_v0, %v2486_v0 }
 0x42c   : > { %2553 = vst.msk [vmem:[%s4795_s20 + $0x78] sm:$0xf] %vm2522_vm11, %v2520_v3 }
 0x42f   : > { %v2487_v6 = vpop.f32.mrf.mxu2 }
 0x430   : > { %v2488_v10 = vadd.f32 %v4781_v61, %v2487_v6  ;;  %v2445_v25 = vpop.f32.mrf.mxu1 }
 0x431   : > { %v2446_v54 = vadd.f32 %v4781_v61, %v2445_v25 }
 0x432   : > { %v2521_v31 = vpack.c.bf16 %v2488_v10, %v2488_v10 }
 0x433   : > { %v2504_v30 = vpack.c.bf16 %v2446_v54, %v2446_v54 }
 0x434   : > { %2554 = vst.msk [vmem:[%s4795_s20 + $0x7c] sm:$0xf] %vm2522_vm11, %v2521_v31 }
 0x435   : > { %2537 = vst.msk [vmem:[%s4795_s20 + $0x38] sm:$0xf] %vm2522_vm11, %v2504_v30 }
 0x438   : > { %v2447_v38 = vpop.f32.mrf.mxu1 }
 0x439   : > { %v2448_v14 = vadd.f32 %v4781_v61, %v2447_v38 }
 0x43b   : > { %v2505_v63 = vpack.c.bf16 %v2448_v14, %v2448_v14 }
 0x43d   : > { %2538 = vst.msk [vmem:[%s4795_s20 + $0x3c] sm:$0xf] %vm2522_vm11, %v2505_v63 }
 0x43e   : > { %3009 = shalt.err (!%p3006_p3)
}
 0x43f   : > { %s3055_s9 = smov 64  }
 0x440   : > { %2930 = dma.vmem_to_hbm [thread:$0]  (%p3129_p5), %s2569_s14, 2048, %s2571_s15, %s2556_s25, %s3055_s9, %s3055_s9, %s3047_s18  }
 0x441 PF: > { %p2936_p4 = scmp.ge.s32.totalorder %s3044_s24, 2  ;;  %s2585_s20 = sand.u32 1, %s3032_s21  }
 0x442   : > { %s2586_s28 = scalar_lea.sflag [#allocation4], %s2585_s20 }
 0x443   : > { %p2933_p7 = pnand %p2936_p4, %p3133_p6 }
 0x445   : > { %p2934_p8 = pneg %p2933_p7 }
 0x447   : > { %3027 = dma.done.wait (%p2934_p8), %s2586_s28, 2048  }
 0x448   : > { %3029 = vsyncadd (%p2934_p8), %s2586_s28, 4294965248  ;;  %p16_p9 = scmp.ge.s32.totalorder %s3116_s27, 4   ;;  %s5220_s21 = smov %s3036_s22 }
 0x449   : > { %s5221_s22 = smov %s3040_s23  ;;  %s5222_s23 = smov %s3127_s30 }
 0x44a   : > { %s5223_s24 = smov %s3116_s27  ;;  %18 = sbr.rel (!%p16_p9) target bundleno = 3 (0x3), region = 79 }
 0x44f   :  { %2592 = vsyncpa [#allocation4], 1 }
 0x450   :  { %2594 = vsyncpa [#allocation4 + $0x1], 1 }

</bundles_post_ra>
